<compile_context>
chip_gen: v7x
topology: tpu7x:2x2x1
jax: 0.10.0
libtpu: 0.0.40
codegen_flags: <defaults>
</compile_context>

<pallas_src>
import functools

import jax
import jax.numpy as jnp
from jax.experimental import pallas as pl
from jax.experimental.pallas import tpu as pltpu


def _spatial_attention_kernel(x_ref, wmat_ref, o_ref, *, inv_c):
    # x_ref:    (1, C, HWp)      one image, spatial flattened + lane-padded
    # wmat_ref: (2, HWp, HWp)    banded conv operator (weights + 'same' padding)
    # o_ref:    (1, C, HWp)
    x = x_ref[0]                                                     # (C, HWp)

    # Channel pooling with an f32 accumulator (no full-size f32 copy of x kept
    # live past this point).
    avg = jnp.sum(x, axis=0, keepdims=True, dtype=jnp.float32) * jnp.float32(inv_c)
    mx = jnp.max(x, axis=0, keepdims=True).astype(jnp.float32)       # (1, HWp)

    # 7x7 'same' conv over the 2 pooled maps as two MXU matvecs against the
    # precomputed banded operator (padding baked in; no masks, no shifted
    # misaligned slices, no padded scratch).
    att = jnp.dot(avg, wmat_ref[0], preferred_element_type=jnp.float32,
                  precision=jax.lax.Precision.HIGHEST)
    att = att + jnp.dot(mx, wmat_ref[1], preferred_element_type=jnp.float32,
                        precision=jax.lax.Precision.HIGHEST)
    att = jax.nn.sigmoid(att)                                        # (1, HWp) f32

    # Gate: re-read x (still resident in VMEM) and multiply in the model dtype;
    # att is cast once, so no widened stores / extra f32 temps on the big tensor.
    o_ref[0] = (x_ref[0] * att.astype(x_ref.dtype)).astype(o_ref.dtype)


def _build_conv_operator(weight, H, W, HW_p):
    """(2, HWp, HWp) operator M with att_flat = avg_flat @ M[0] + max_flat @ M[1].

    M[c, ih*W+iw, oh*W+ow] = weight[0, c, kh, kw] for every valid tap
    (ih = oh+kh-P, iw = ow+kw-P inside the image); out-of-image taps are simply
    absent, which reproduces conv2d's zero 'same' padding exactly.
    """
    K = weight.shape[-1]
    P = K // 2
    w = weight.reshape(2, K, K).astype(jnp.float32)
    c = jnp.arange(2)[:, None, None, None, None]
    kh = jnp.arange(K)[None, :, None, None, None]
    kw = jnp.arange(K)[None, None, :, None, None]
    oh = jnp.arange(H)[None, None, None, :, None]
    ow = jnp.arange(W)[None, None, None, None, :]
    ih = oh + kh - P
    iw = ow + kw - P
    valid = (ih >= 0) & (ih < H) & (iw >= 0) & (iw < W)
    in_idx = jnp.clip(ih, 0, H - 1) * W + jnp.clip(iw, 0, W - 1)
    out_idx = oh * W + ow
    shape = (2, K, K, H, W)
    c_b = jnp.broadcast_to(c, shape).reshape(-1)
    in_b = jnp.broadcast_to(in_idx, shape).reshape(-1)
    out_b = jnp.broadcast_to(out_idx, shape).reshape(-1)
    vals = jnp.broadcast_to(
        jnp.where(valid, w[:, :, :, None, None], 0.0), shape).reshape(-1)
    wmat = jnp.zeros((2, HW_p, HW_p), jnp.float32)
    return wmat.at[c_b, in_b, out_b].add(vals)


def spatial_attention_forward(x, weight, *, kernel_size=7):
    """x: (N, C, H, W) NCHW; weight: (1, 2, K, K) from nn.Conv2d(2, 1, K, bias=False)."""
    N, C, H, W = x.shape
    K = kernel_size
    assert weight.shape == (1, 2, K, K)
    assert K in (3, 7), "kernel size must be 3 or 7"
    HW = H * W
    HW_p = ((HW + 127) // 128) * 128          # lane-dense last dim (full 128-lane vst)

    x_flat = x.reshape(N, C, HW)
    if HW_p != HW:
        x_flat = jnp.pad(x_flat, ((0, 0), (0, 0), (0, HW_p - HW)))

    wmat = _build_conv_operator(weight, H, W, HW_p)   # (2, HWp, HWp) f32

    # TODO(synk): for large HW the banded operator (2*HW^2 f32) becomes too big --
    # fall back to a pltpu.roll-hoisted shift-and-add tap loop there, and for v7x
    # add a 'parallel' row-tile grid axis (+-P row halo) so blocks fit the 64 MiB
    # VMEM and both TensorCores are used even at batch 1.

    itemsize = jnp.dtype(x.dtype).itemsize
    cost = pl.CostEstimate(
        flops=int(N * (3 * C * HW_p + 2 * 2 * HW_p * HW_p)),
        transcendentals=int(N * HW_p),
        bytes_accessed=int(2 * N * C * HW_p * itemsize + 2 * HW_p * HW_p * 4),
    )

    block_bytes = C * HW_p * itemsize
    wmat_bytes = 2 * HW_p * HW_p * 4
    vmem_limit = int(min(max(4 * block_bytes + 2 * wmat_bytes + (4 << 20), 32 << 20),
                         100 << 20))

    kernel = functools.partial(_spatial_attention_kernel, inv_c=1.0 / C)

    out_flat = pl.pallas_call(
        kernel,
        out_shape=jax.ShapeDtypeStruct((N, C, HW_p), x.dtype),
        grid_spec=pltpu.PrefetchScalarGridSpec(
            num_scalar_prefetch=0,
            grid=(N,),
            in_specs=[
                pl.BlockSpec((1, C, HW_p), lambda n: (n, 0, 0)),
                pl.BlockSpec((2, HW_p, HW_p), lambda n: (0, 0, 0)),  # constant -> resident
            ],
            out_specs=pl.BlockSpec((1, C, HW_p), lambda n: (n, 0, 0)),
        ),
        compiler_params=pltpu.CompilerParams(
            dimension_semantics=("parallel",),
            vmem_limit_bytes=vmem_limit,
        ),
        cost_estimate=cost,
    )(x_flat, wmat)

    return out_flat[..., :HW].reshape(N, C, H, W)


def _reference(x, weight):
    avg = jnp.mean(x, axis=1, keepdims=True)
    mx = jnp.max(x, axis=1, keepdims=True)
    cat = jnp.concatenate([avg, mx], axis=1)
    K = weight.shape[-1]
    P = K // 2
    att = jax.lax.conv_general_dilated(
        cat, weight, window_strides=(1, 1), padding=((P, P), (P, P)),
        dimension_numbers=("NCHW", "OIHW", "NCHW"),
        precision=jax.lax.Precision.HIGHEST)
    return x * jax.nn.sigmoid(att)


if __name__ == "__main__":
    key = jax.random.PRNGKey(0)
    kx, kw = jax.random.split(key, 2)

    N, C, H, W = 2, 4, 16, 16
    K = 7  # module default: kernel_size=7, padding=3
    x = jax.random.normal(kx, (N, C, H, W), dtype=jnp.float32)
    weight = jax.random.normal(kw, (1, 2, K, K), dtype=jnp.float32) * 0.1

    out = spatial_attention_forward(x, weight, kernel_size=K)
    out = jax.block_until_ready(out)

    ref = _reference(x, weight)
    assert out.shape == (N, C, H, W)
    assert jnp.allclose(out, ref, atol=1e-4, rtol=1e-4), "mismatch vs reference"

    print("KERNEL_OK")
</pallas_src>

<mosaic_0001>
module attributes {stable_mosaic.version = 11 : i64} {
  func.func @_spatial_attention_kernel(%arg0: i32, %arg1: memref<1x4x256xf32, #tpu.memory_space<vmem>>, %arg2: memref<2x256x256xf32, #tpu.memory_space<vmem>>, %arg3: memref<1x4x256xf32, #tpu.memory_space<vmem>>) attributes {dimension_semantics = [#tpu.dimension_semantics<parallel>], iteration_bounds = array<i64: 2>, scalar_prefetch = 0 : i64, scratch_operands = 0 : i64, tpu.core_type = #tpu.core_type<tc>, window_params = [{transform_indices = @transform_0, window_bounds = array<i64: 1, 4, 256>}, {pipeline_mode = #tpu.pipeline_mode<synchronous>, transform_indices = @transform_1, window_bounds = array<i64: 2, 256, 256>}, {transform_indices = @transform_2, window_bounds = array<i64: 1, 4, 256>}]} {
    %c0 = arith.constant 0 : index
    %c0_0 = arith.constant 0 : index
    %c0_1 = arith.constant 0 : index
    %0 = vector.load %arg1[%c0, %c0_0, %c0_1] : memref<1x4x256xf32, #tpu.memory_space<vmem>>, vector<1x4x256xf32>
    %1 = vector.shape_cast %0 : vector<1x4x256xf32> to vector<4x256xf32>
    %cst = arith.constant dense<0.000000e+00> : vector<256xf32>
    %2 = vector.multi_reduction <add>, %1, %cst [0] : vector<4x256xf32> to vector<256xf32>
    %3 = vector.shape_cast %2 : vector<256xf32> to vector<1x256xf32>
    %cst_2 = arith.constant 2.500000e-01 : f32
    %4 = vector.broadcast %cst_2 : f32 to vector<1x256xf32>
    %5 = arith.mulf %3, %4 : vector<1x256xf32>
    %cst_3 = arith.constant dense<0xFF800000> : vector<256xf32>
    %6 = vector.multi_reduction <maximumf>, %1, %cst_3 [0] : vector<4x256xf32> to vector<256xf32>
    %7 = vector.shape_cast %6 : vector<256xf32> to vector<1x256xf32>
    %c0_4 = arith.constant 0 : index
    %c0_5 = arith.constant 0 : index
    %c0_6 = arith.constant 0 : index
    %8 = vector.load %arg2[%c0_4, %c0_5, %c0_6] : memref<2x256x256xf32, #tpu.memory_space<vmem>>, vector<1x256x256xf32>
    %9 = vector.shape_cast %8 : vector<1x256x256xf32> to vector<256x256xf32>
    %cst_7 = arith.constant dense<0.000000e+00> : vector<1x256xf32>
    %10 = tpu.matmul %5, %9, %cst_7 {dimension_numbers = #tpu.dot_dimension_numbers<[1], [0], [0], [1], [0, 0, 1, 1], [], []>, precision = #tpu.contract_precision<fp32>} : vector<1x256xf32>, vector<256x256xf32>, vector<1x256xf32> -> vector<1x256xf32>
    %c1 = arith.constant 1 : index
    %c0_8 = arith.constant 0 : index
    %c0_9 = arith.constant 0 : index
    %11 = vector.load %arg2[%c1, %c0_8, %c0_9] : memref<2x256x256xf32, #tpu.memory_space<vmem>>, vector<1x256x256xf32>
    %12 = vector.shape_cast %11 : vector<1x256x256xf32> to vector<256x256xf32>
    %cst_10 = arith.constant dense<0.000000e+00> : vector<1x256xf32>
    %13 = tpu.matmul %7, %12, %cst_10 {dimension_numbers = #tpu.dot_dimension_numbers<[1], [0], [0], [1], [0, 0, 1, 1], [], []>, precision = #tpu.contract_precision<fp32>} : vector<1x256xf32>, vector<256x256xf32>, vector<1x256xf32> -> vector<1x256xf32>
    %14 = arith.addf %10, %13 : vector<1x256xf32>
    %15 = arith.negf %14 : vector<1x256xf32>
    %16 = math.exp %15 : vector<1x256xf32>
    %cst_11 = arith.constant 1.000000e+00 : f32
    %17 = vector.broadcast %cst_11 : f32 to vector<1x256xf32>
    %18 = arith.addf %17, %16 : vector<1x256xf32>
    %19 = arith.divf %17, %18 : vector<1x256xf32>
    %c0_12 = arith.constant 0 : index
    %c0_13 = arith.constant 0 : index
    %c0_14 = arith.constant 0 : index
    %20 = vector.load %arg1[%c0_12, %c0_13, %c0_14] : memref<1x4x256xf32, #tpu.memory_space<vmem>>, vector<1x4x256xf32>
    %21 = vector.shape_cast %20 : vector<1x4x256xf32> to vector<4x256xf32>
    %22 = vector.broadcast %19 : vector<1x256xf32> to vector<4x256xf32>
    %23 = arith.mulf %21, %22 : vector<4x256xf32>
    %c0_15 = arith.constant 0 : index
    %c0_16 = arith.constant 0 : index
    %c0_17 = arith.constant 0 : index
    %24 = vector.load %arg3[%c0_15, %c0_16, %c0_17] : memref<1x4x256xf32, #tpu.memory_space<vmem>>, vector<1x4x256xf32>
    %25 = vector.shape_cast %24 : vector<1x4x256xf32> to vector<4x256xf32>
    %26 = vector.shape_cast %23 : vector<4x256xf32> to vector<1x4x256xf32>
    tpu.vector_store %arg3[%c0_15, %c0_16, %c0_17], %26 {strides = array<i32>} : memref<1x4x256xf32, #tpu.memory_space<vmem>>, vector<1x4x256xf32>,
    return
  }
  func.func @transform_0(%arg0: i32) -> (i32, i32, i32) {
    %c0_i32 = arith.constant 0 : i32
    %c0_i32_0 = arith.constant 0 : i32
    %c0_i32_1 = arith.constant 0 : i32
    return %arg0, %c0_i32, %c0_i32_0 : i32, i32, i32
  }
  func.func @transform_1(%arg0: i32) -> (i32, i32, i32) {
    %c0_i32 = arith.constant 0 : i32
    %c0_i32_0 = arith.constant 0 : i32
    %c0_i32_1 = arith.constant 0 : i32
    %c0_i32_2 = arith.constant 0 : i32
    return %c0_i32, %c0_i32_0, %c0_i32_1 : i32, i32, i32
  }
  func.func @transform_2(%arg0: i32) -> (i32, i32, i32) {
    %c0_i32 = arith.constant 0 : i32
    %c0_i32_0 = arith.constant 0 : i32
    %c0_i32_1 = arith.constant 0 : i32
    return %arg0, %c0_i32, %c0_i32_0 : i32, i32, i32
  }
}

</mosaic_0001>

<bundles_post_ra>
// kernel: tpu_custom_call.1
= control target key start
LH: loop header
LB: loop body
LE: loop exit
PB: predicated region body
PF: predicated region fallthrough
CT: control target
= control target key end

     0   :  { %7 = vsyncpa [#allocation3], 0  ;;  %s5893_s0 = inlined_call_operand.hbm [shape: f32[2,4,256], index: 0, kind: input, shape index: {}]   ;;  %s5894_s1 = inlined_call_operand.hbm [shape: f32[2,256,256], index: 1, kind: input, shape index: {}]   ;;  %s5895_s2 = inlined_call_operand.hbm [shape: f32[2,4,256], index: 2, kind: output, shape index: {}]  }
   0x1   :  { %9 = vsyncpa [#allocation3 + $0x1], 0 }
   0x2   :  { %10 = vsyncpa [#allocation6], 0 }
   0x3   :  { %11 = vsyncpa [#allocation4], 0 }
   0x4   :  { %13 = vsyncpa [#allocation4 + $0x1], 0  ;;  %s4057_s9 = smov 0   ;;  %s4059_s10 = smov 0  }
   0x5   :  { %s4061_s11 = smov 0   ;;  %s4063_s12 = smov 0  }
   0x6 LB: > { %s4078_s13 = sadd.s32 4294967295, %s4035_s12   ;;  %s3028_s14 = sadd.s32 4294967294, %s4035_s12   ;;  %s4035_s12 = sphi %s4063_s12, %s7204_s12   ;;  %s4031_s11 = sphi %s4061_s11, %s7203_s11   ;;  %s4027_s10 = sphi %s4059_s10, %s7202_s10   ;;  %s4023_s9 = sphi %s4057_s9, %s7201_s9  }
   0x7   : > { %p39_p0 = scmp.ne.s32.totalorder %s4027_s10, %s4023_s9  ;;  %p5896_p1 = scmp.eq.s32.totalorder %s4078_s13, 0 }
   0x8   : > { %p90_p3 = scmp.eq.s32.totalorder %s3028_s14, 1  ;;  %p3029_p5 = scmp.ge.s32.totalorder %s4035_s12, 1 }
   0x9   : > { %p4087_p4 = por %p5896_p1, %p39_p0  ;;  %p97_p7 = scmp.lt.s32.totalorder %s4035_s12, 3 }
   0xa   : > { %p4092_p6 = por %p90_p3, %p39_p0  ;;  %s4037_s18 = smov [#allocation5]  }
   0xb   : > { %s6411_s15 = scalar_select %p4087_p4, 1, 0 }
   0xc   : > { %s6412_s16 = scalar_select %p4092_p6, 1, 0 }
   0xd   : > { %p4097_p8 = pnand %p3029_p5, %p97_p7  ;;  %s109_s19 = sshll.u32 %s4037_s18, 4  ;;  %s4101_s19 = int_to_ptr.vmem [resolvable:$true] %s109_s19 }
   0xe   : > { %s4113_s21 = sadd.s32 1, %s4035_s12   ;;  %s26_s22 = sadd.s32 1, %s4031_s11 }
   0xf   : > { %s6413_s17 = scalar_select %p4097_p8, 1, 0 }
  0x10   : > { %p3846_p9 = pneg %p4097_p8  ;;  %s23_s23 = ssub.s32 %s4035_s12, %s4113_s21 }
  0x11   : > { %s3907_s26 = scalar_lea.hbm %s5894_s1, 16384 }
  0x12   : > { %p4108_p11 = pnand %p3846_p9, %p5896_p1  ;;  %p3908_p12 = scmp.ne.s32.totalorder %s5894_s1, %s3907_s26 }
  0x13   : > { %p3914_p5 = scmp.lt.u32.totalorder %s3907_s26, %s5894_s1 }
  0x14   : > { %p3909_p13 = pneg %p4108_p11 }
  0x16   : > { %p3910_p0 = pnand %p3909_p13, %p3908_p12 }
  0x18   : > { %p3911_p3 = pneg %p3910_p0 }
  0x1a   : > { %p3916_p7 = pnand %p3914_p5, %p3911_p3 }
  0x1c   : > { %3919 = shalt.err (!%p3916_p7)
}
  0x1d   : > { %s3920_s3 = scalar_lea.vmem %s4101_s19, 16384  ;;  %p3928_p2 = scmp.lt.s32.totalorder %s4101_s19, %s4101_s19 }
  0x1e   : > { %p3921_p9 = scmp.ne.s32.totalorder %s4101_s19, %s3920_s3  ;;  %p3929_p6 = scmp.lt.s32.totalorder %s3920_s3, %s3920_s3 }
  0x20   : > { %p3923_p10 = pnand %p3921_p9, %p3909_p13  ;;  %p3930_p4 = por %p3929_p6, %p3928_p2 }
  0x22   : > { %p3924_p1 = pneg %p3923_p10 }
  0x24   : > { %p3931_p8 = pnand %p3930_p4, %p3924_p1 }
  0x26   : > { %3934 = shalt.err (!%p3931_p8)
}
  0x27   : > { %s4038_s4 = smov 256   ;;  %s4039_s5 = smov 16  }
  0x28   : > { %3849 = dma.hbm_to_vmem [thread:$0]  (!%p4108_p11), %s5894_s1, 16384, %s4101_s19, [#allocation6], %s4038_s4, %s4038_s4, %s4039_s5  }
  0x29   : > { %p24_p2 = scmp.eq.s32.totalorder %s23_s23, 0  ;;  %p33_p1 = scmp.ne.s32.totalorder %s4031_s11, %s4027_s10 }
  0x2a   : > { %p34_p4 = scmp.eq.s32.totalorder %s4035_s12, 0  ;;  %p3859_p6 = scmp.lt.s32.totalorder %s4035_s12, 2 }
  0x2b   : > { %s4144_s8 = scalar_select %p24_p2, %s4031_s11, %s26_s22  }
  0x2c   : > { %p35_p8 = por %p34_p4, %p33_p1  ;;  %p6415_p10 = scmp.eq.s32.totalorder %s4078_s13, 1 }
  0x2d   : > { %s123_s18 = sand.u32 1, %s4031_s11   ;;  %s3046_s24 = sshll.u32 %s4035_s12, 7 }
  0x2e   : > { %p4148_p12 = por %p6415_p10, %p33_p1  ;;  %s3032_s25 = sshll.u32 %s123_s18, 3 }
  0x2f   : > { %s4157_s27 = scalar_lea.hbm %s5893_s0, %s3046_s24  ;;  %s127_s19 = scalar_lea.vmem [#allocation2], %s3032_s25 }
  0x30   : > { %s135_s22 = sshll.u32 %s127_s19, 4  ;;  %p4159_p11 = pnand %p3859_p6, %p35_p8  ;;  %s4163_s22 = int_to_ptr.vmem [resolvable:$true] %s135_s22 }
  0x31   : > { %s124_s28 = scalar_lea.sflag [#allocation3], %s123_s18  ;;  %s3935_s29 = scalar_lea.hbm %s4157_s27, 128 }
  0x32   : > { %p3936_p13 = scmp.ne.s32.totalorder %s4157_s27, %s3935_s29  ;;  %p3937_p0 = pneg %p4159_p11 }
  0x33   : > { %s3940_s4 = scalar_lea.hbm %s5893_s0, 256  ;;  %p3941_p7 = scmp.lt.u32.totalorder %s4157_s27, %s5893_s0 }
  0x34   : > { %p3938_p3 = pnand %p3937_p0, %p3936_p13  ;;  %p3942_p9 = scmp.lt.u32.totalorder %s3940_s4, %s3935_s29 }
  0x35   : > { %p3944_p1 = scmp.lt.u32.totalorder %s3935_s29, %s4157_s27 }
  0x36   : > { %p3939_p5 = pneg %p3938_p3  ;;  %p3943_p2 = por %p3942_p9, %p3941_p7 }
  0x38   : > { %p3945_p4 = por %p3944_p1, %p3943_p2 }
  0x3a   : > { %p3946_p6 = pnand %p3945_p4, %p3939_p5 }
  0x3c   : > { %3949 = shalt.err (!%p3946_p6)
}
  0x3d   : > { %s3950_s7 = scalar_lea.vmem %s4163_s22, 128  ;;  %s4040_s18 = smov [#allocation2]  }
  0x3e   : > { %p3951_p8 = scmp.ne.s32.totalorder %s4163_s22, %s3950_s7  ;;  %s3955_s24 = sshll.u32 %s4040_s18, 4  ;;  %s3956_s24 = int_to_ptr.vmem [resolvable:$false] %s3955_s24 }
  0x3f   : > { %s3957_s25 = scalar_lea.vmem %s3956_s24, 256  ;;  %p3958_p3 = scmp.lt.s32.totalorder %s4163_s22, %s3956_s24 }
  0x40   : > { %p3953_p10 = pnand %p3951_p8, %p3937_p0  ;;  %p3959_p7 = scmp.lt.s32.totalorder %s3957_s25, %s3950_s7 }
  0x42   : > { %p3954_p13 = pneg %p3953_p10  ;;  %p3960_p9 = por %p3959_p7, %p3958_p3 }
  0x44   : > { %p3961_p2 = pnand %p3960_p9, %p3954_p13 }
  0x46   : > { %3964 = shalt.err (!%p3961_p2)
}
  0x47   : > { %3853 = dma.hbm_to_vmem [thread:$0]  (!%p4159_p11), %s4157_s27, 128, %s4163_s22, %s124_s28  }
  0x48   : > { %p6418_p5 = scmp.ne.s32.totalorder %s6413_s17, 0 }
  0x4a   : > { %144 = sbr.rel (%p6418_p5) target bundleno = 831 (0x33f), region = 28 }
  0x51   : > { %s4193_s20 = sand.u32 1, %s4027_s10   ;;  %p6419_p0 = scmp.ne.s32.totalorder %s6411_s15, 0 }
  0x52   : > { %s3036_s26 = sshll.u32 %s4193_s20, 3  ;;  %s147_s19 = scalar_lea.sflag [#allocation3], %s4193_s20 }
  0x53   : > { %s4199_s29 = scalar_lea.vmem [#allocation2], %s3036_s26 }
  0x54   : > { %4010 = dma.done.wait (%p6419_p0), %s147_s19, 128  }
  0x55   : > { %4012 = vsyncadd (%p6419_p0), %s147_s19, 4294967168  ;;  %p6420_p11 = scmp.eq.s32.totalorder %s4078_s13, 0 }
  0x57   : > { %4014 = dma.done.wait (%p6420_p11), [#allocation6], 16384   ;;  %p6421_p1 = pmov %p6420_p11 }
  0x58   : > { %v276_v0 = vld [vmem:[#allocation5 + $0x208] sm:$0xff]  ;;  %v278_v1 = vld [vmem:[#allocation5 + $0x218] sm:$0xff]  ;;  %v275_v7 = vld [vmem:[#allocation5 + $0x200] sm:$0xff]  ;;  %vm179_vm0 = vcmask 1043456   ;;  %s3047_s15 = sshll.u32 %s4078_s13, 7  ;;  %s174_s17 = scalar_lea.vmem [#allocation7], %s3036_s26 }
  0x59   : > { %4016 = vsyncadd (%p6421_p1), [#allocation6], 4294950912  ;;  %v211_v2 = vld [vmem:[#allocation5 + $0x8] sm:$0xff]  ;;  %v339_v3 = vand.u32 4294901760, %v276_v0  ;;  %v343_v4 = vand.u32 4294901760, %v278_v1  ;;  %v213_v5 = vld [vmem:[#allocation5 + $0x18] sm:$0xff]  ;;  %s5849_s28 = scalar_lea.hbm %s5895_s2, %s3047_s15 }
  0x5a   : > { %v1623_v6 = vand.u32 4294901760, %v211_v2  ;;  %v277_v8 = vld [vmem:[#allocation5 + $0x210] sm:$0xff]  ;;  %v1627_v9 = vand.u32 4294901760, %v213_v5  ;;  %v341_v10 = vand.u32 4294901760, %v275_v7  ;;  %v210_v12 = vld [vmem:[#allocation5] sm:$0xff]  ;;  %v280_v14 = vld [vmem:[#allocation5 + $0x228] sm:$0xff] }
  0x5b   : > { %v345_v11 = vand.u32 4294901760, %v277_v8  ;;  %v212_v13 = vld [vmem:[#allocation5 + $0x10] sm:$0xff]  ;;  %v4209_v15 = vpack.c.bf16 %v343_v4, %v339_v3  ;;  %v4211_v16 = vsub.f32 %v276_v0, %v339_v3  ;;  %v4213_v17 = vsub.f32 %v278_v1, %v343_v4  ;;  %v282_v19 = vld [vmem:[#allocation5 + $0x238] sm:$0xff]  ;;  %v215_v20 = vld [vmem:[#allocation5 + $0x28] sm:$0xff]  ;;  %s2948_s27 = sshll.u32 %s174_s17, 4  ;;  %s2934_s30 = scalar_lea.sflag [#allocation4], %s4193_s20  ;;  %s5851_s27 = int_to_ptr.vmem [resolvable:$true] %s2948_s27 }
  0x5c   : > { %v4215_v18 = vsub.f32 %v211_v2, %v1623_v6  ;;  %v217_v21 = vld [vmem:[#allocation5 + $0x38] sm:$0xff]  ;;  %v4217_v22 = vpack.c.bf16 %v1627_v9, %v1623_v6  ;;  %v4219_v23 = vsub.f32 %v213_v5, %v1627_v9  ;;  %v4223_v25 = vsub.f32 %v275_v7, %v341_v10  ;;  %v279_v26 = vld [vmem:[#allocation5 + $0x220] sm:$0xff]  ;;  %v281_v31 = vld [vmem:[#allocation5 + $0x230] sm:$0xff]  ;;  %s3965_s3 = scalar_lea.vmem %s5851_s27, 128  ;;  %s4041_s13 = smov [#allocation7]  }
  0x5d   : > { %6422 = vst [vmem:[#allocation11_spill] sm:$0xff] %v4209_v15  ;;  %6423 = vst [vmem:[#allocation12_spill] sm:$0xff] %v4211_v16  ;;  %v4221_v24 = vpack.c.bf16 %v345_v11, %v341_v10  ;;  %3049 = vmatprep.subr.bf16.mxu1 %v4209_v15  ;;  %v4226_v27 = vsub.f32 %v277_v8, %v345_v11  ;;  %v1625_v28 = vand.u32 4294901760, %v210_v12  ;;  %v1629_v29 = vand.u32 4294901760, %v212_v13  ;;  %v214_v36 = vld [vmem:[#allocation5 + $0x20] sm:$0xff]  ;;  %v216_v37 = vld [vmem:[#allocation5 + $0x30] sm:$0xff]  ;;  %p3966_p4 = scmp.ne.s32.totalorder %s5851_s27, %s3965_s3 }
  0x5e   : > { %6424 = vst [vmem:[#allocation13_spill] sm:$0xff] %v4213_v17  ;;  %6425 = vst [vmem:[#allocation14_spill] sm:$0xff] %v4215_v18  ;;  %v347_v30 = vand.u32 4294901760, %v280_v14  ;;  %3433 = vmatprep.subr.bf16.mxu0 %v4217_v22  ;;  %v351_v32 = vand.u32 4294901760, %v282_v19  ;;  %v1631_v33 = vand.u32 4294901760, %v215_v20  ;;  %v1635_v34 = vand.u32 4294901760, %v217_v21 }
  0x5f   : > { %6426 = vst [vmem:[#allocation15_spill] sm:$0xff] %v4217_v22  ;;  %6427 = vst [vmem:[#allocation16_spill] sm:$0xff] %v4219_v23  ;;  %3051 = vmatpush1.bf16.msra.mxu1 %v4221_v24  ;;  %v349_v35 = vand.u32 4294901760, %v279_v26  ;;  %v4230_v38 = vpack.c.bf16 %v1629_v29, %v1625_v28  ;;  %v4232_v39 = vsub.f32 %v210_v12, %v1625_v28  ;;  %v284_v42 = vld [vmem:[#allocation5 + $0x248] sm:$0xff]  ;;  %v286_v43 = vld [vmem:[#allocation5 + $0x258] sm:$0xff]  ;;  %v353_v51 = vand.u32 4294901760, %v281_v31  ;;  %p3967_p6 = pnand %p3966_p4, %p4148_p12 }
  0x60   : > { %6428 = vst [vmem:[#allocation17_spill] sm:$0xff] %v4221_v24  ;;  %6429 = vst [vmem:[#allocation18_spill] sm:$0xff] %v4223_v25  ;;  %v4234_v40 = vsub.f32 %v212_v13, %v1629_v29  ;;  %v4236_v41 = vsub.f32 %v280_v14, %v347_v30  ;;  %v219_v44 = vld [vmem:[#allocation5 + $0x48] sm:$0xff]  ;;  %v4238_v45 = vpack.c.bf16 %v351_v32, %v347_v30  ;;  %v221_v49 = vld [vmem:[#allocation5 + $0x58] sm:$0xff]  ;;  %v1633_v53 = vand.u32 4294901760, %v214_v36  ;;  %s3969_s4 = sshll.u32 %s4041_s13, 4  ;;  %s3970_s4 = int_to_ptr.vmem [resolvable:$false] %s3969_s4 }
  0x61   : > { %6430 = vst [vmem:[#allocation19_spill] sm:$0xff] %v4226_v27  ;;  %6431 = vst [vmem:[#allocation20_spill] sm:$0xff] %v4230_v38  ;;  %v4240_v46 = vsub.f32 %v282_v19, %v351_v32  ;;  %v4242_v47 = vpack.c.bf16 %v1635_v34, %v1631_v33  ;;  %v4244_v48 = vsub.f32 %v215_v20, %v1631_v33  ;;  %3435 = vmatpush1.bf16.msra.mxu0 %v4230_v38  ;;  %v283_v58 = vld [vmem:[#allocation5 + $0x240] sm:$0xff]  ;;  %v285_v59 = vld [vmem:[#allocation5 + $0x250] sm:$0xff]  ;;  %p3968_p8 = pneg %p3967_p6  ;;  %s3971_s5 = scalar_lea.vmem %s3970_s4, 256 }
  0x62   : > { %6432 = vst [vmem:[#allocation21_spill] sm:$0xff] %v4232_v39  ;;  %6433 = vst [vmem:[#allocation22_spill] sm:$0xff] %v4234_v40  ;;  %v4247_v50 = vsub.f32 %v217_v21, %v1635_v34  ;;  %v4249_v52 = vsub.f32 %v279_v26, %v349_v35  ;;  %3053 = vmatprep.subr.bf16.mxu1 %v4238_v45  ;;  %v1637_v54 = vand.u32 4294901760, %v216_v37  ;;  %v355_v55 = vand.u32 4294901760, %v284_v42  ;;  %v218_v0 = vld [vmem:[#allocation5 + $0x40] sm:$0xff]  ;;  %v220_v1 = vld [vmem:[#allocation5 + $0x50] sm:$0xff]  ;;  %p3972_p10 = scmp.lt.s32.totalorder %s5851_s27, %s3970_s4  ;;  %p3973_p13 = scmp.lt.s32.totalorder %s3971_s5, %s3965_s3 }
  0x63   : > { %6434 = vst [vmem:[#allocation23_spill] sm:$0xff] %v4236_v41  ;;  %6435 = vst [vmem:[#allocation24_spill] sm:$0xff] %v4238_v45  ;;  %3437 = vmatprep.subr.bf16.mxu0 %v4242_v47  ;;  %v359_v56 = vand.u32 4294901760, %v286_v43  ;;  %v1639_v57 = vand.u32 4294901760, %v219_v44  ;;  %v4253_v60 = vpack.c.bf16 %v353_v51, %v349_v35  ;;  %v4255_v61 = vsub.f32 %v281_v31, %v353_v51  ;;  %v288_v2 = vld [vmem:[#allocation5 + $0x268] sm:$0xff]  ;;  %v290_v7 = vld [vmem:[#allocation5 + $0x278] sm:$0xff] }
  0x64   : > { %6436 = vst [vmem:[#allocation25_spill] sm:$0xff] %v4240_v46  ;;  %6437 = vst [vmem:[#allocation26_spill] sm:$0xff] %v4242_v47  ;;  %v4257_v62 = vsub.f32 %v214_v36, %v1633_v53  ;;  %v1643_v63 = vand.u32 4294901760, %v221_v49  ;;  %v4259_v3 = vpack.c.bf16 %v1637_v54, %v1633_v53  ;;  %v4261_v4 = vsub.f32 %v216_v37, %v1637_v54  ;;  %v223_v8 = vld [vmem:[#allocation5 + $0x68] sm:$0xff]  ;;  %v225_v9 = vld [vmem:[#allocation5 + $0x78] sm:$0xff]  ;;  %p3974_p3 = por %p3973_p13, %p3972_p10 }
  0x65   : > { %6438 = vst [vmem:[#allocation27_spill] sm:$0xff] %v4244_v48  ;;  %6439 = vst [vmem:[#allocation28_spill] sm:$0xff] %v4247_v50  ;;  %v4263_v5 = vpack.c.bf16 %v359_v56, %v355_v55  ;;  %v4265_v6 = vsub.f32 %v284_v42, %v355_v55  ;;  %3055 = vmatpush1.bf16.msra.mxu1 %v4253_v60  ;;  %v4268_v10 = vsub.f32 %v286_v43, %v359_v56  ;;  %v287_v31 = vld [vmem:[#allocation5 + $0x260] sm:$0xff]  ;;  %v289_v36 = vld [vmem:[#allocation5 + $0x270] sm:$0xff] }
  0x66   : > { %6440 = vst [vmem:[#allocation29_spill] sm:$0xff] %v4249_v52  ;;  %6441 = vst [vmem:[#allocation30_spill] sm:$0xff] %v4253_v60  ;;  %v4270_v11 = vpack.c.bf16 %v1643_v63, %v1639_v57  ;;  %v4272_v12 = vsub.f32 %v219_v44, %v1639_v57  ;;  %v4274_v13 = vsub.f32 %v221_v49, %v1643_v63  ;;  %3439 = vmatpush1.bf16.msra.mxu0 %v4259_v3  ;;  %v222_v37 = vld [vmem:[#allocation5 + $0x60] sm:$0xff]  ;;  %v224_v42 = vld [vmem:[#allocation5 + $0x70] sm:$0xff]  ;;  %p3975_p7 = pnand %p3974_p3, %p3968_p8 }
  0x67   : > { %6442 = vst [vmem:[#allocation31_spill] sm:$0xff] %v4255_v61  ;;  %6443 = vst [vmem:[#allocation32_spill] sm:$0xff] %v4257_v62  ;;  %3057 = vmatprep.subr.bf16.mxu1 %v4263_v5  ;;  %v357_v14 = vand.u32 4294901760, %v283_v58  ;;  %v361_v19 = vand.u32 4294901760, %v285_v59  ;;  %v1641_v20 = vand.u32 4294901760, %v218_v0  ;;  %v1645_v21 = vand.u32 4294901760, %v220_v1 }
  0x68   : > { %6444 = vst [vmem:[#allocation33_spill] sm:$0xff] %v4259_v3  ;;  %6445 = vst [vmem:[#allocation34_spill] sm:$0xff] %v4261_v4  ;;  %3441 = vmatprep.subr.bf16.mxu0 %v4270_v11  ;;  %v363_v26 = vand.u32 4294901760, %v288_v2  ;;  %v367_v28 = vand.u32 4294901760, %v290_v7  ;;  %v1647_v29 = vand.u32 4294901760, %v223_v8  ;;  %v1651_v30 = vand.u32 4294901760, %v225_v9 }
  0x69   : > { %6446 = vst [vmem:[#allocation35_spill] sm:$0xff] %v4263_v5  ;;  %6447 = vst [vmem:[#allocation36_spill] sm:$0xff] %v4265_v6  ;;  %v4279_v32 = vpack.c.bf16 %v361_v19, %v357_v14  ;;  %v4281_v33 = vsub.f32 %v283_v58, %v357_v14  ;;  %v4283_v34 = vsub.f32 %v285_v59, %v361_v19  ;;  %v292_v53 = vld [vmem:[#allocation5 + $0x288] sm:$0xff]  ;;  %v294_v54 = vld [vmem:[#allocation5 + $0x298] sm:$0xff]  ;;  %v365_v59 = vand.u32 4294901760, %v287_v31 }
  0x6a   : > { %6448 = vst [vmem:[#allocation37_spill] sm:$0xff] %v4268_v10  ;;  %6449 = vst [vmem:[#allocation38_spill] sm:$0xff] %v4270_v11  ;;  %v4285_v35 = vpack.c.bf16 %v1645_v21, %v1641_v20  ;;  %v4287_v43 = vsub.f32 %v218_v0, %v1641_v20  ;;  %v4289_v44 = vsub.f32 %v220_v1, %v1645_v21  ;;  %v227_v55 = vld [vmem:[#allocation5 + $0x88] sm:$0xff]  ;;  %v369_v0 = vand.u32 4294901760, %v289_v36  ;;  %v229_v14 = vld [vmem:[#allocation5 + $0x98] sm:$0xff] }
  0x6b   : > { %6450 = vst [vmem:[#allocation39_spill] sm:$0xff] %v4272_v12  ;;  %6451 = vst [vmem:[#allocation40_spill] sm:$0xff] %v4274_v13  ;;  %v4291_v49 = vpack.c.bf16 %v367_v28, %v363_v26  ;;  %v4293_v51 = vsub.f32 %v288_v2, %v363_v26  ;;  %3059 = vmatpush1.bf16.msra.mxu1 %v4279_v32  ;;  %v4297_v56 = vsub.f32 %v290_v7, %v367_v28  ;;  %v291_v26 = vld [vmem:[#allocation5 + $0x280] sm:$0xff]  ;;  %v293_v28 = vld [vmem:[#allocation5 + $0x290] sm:$0xff] }
  0x6c   : > { %6452 = vst [vmem:[#allocation41_spill] sm:$0xff] %v4279_v32  ;;  %6453 = vst [vmem:[#allocation42_spill] sm:$0xff] %v4281_v33  ;;  %3443 = vmatpush1.bf16.msra.mxu0 %v4285_v35  ;;  %v4299_v57 = vpack.c.bf16 %v1651_v30, %v1647_v29  ;;  %v4301_v58 = vsub.f32 %v223_v8, %v1647_v29  ;;  %v4304_v63 = vsub.f32 %v225_v9, %v1651_v30  ;;  %v226_v8 = vld [vmem:[#allocation5 + $0x80] sm:$0xff]  ;;  %v296_v32 = vld [vmem:[#allocation5 + $0x2a8] sm:$0xff] }
  0x6d   : > { %6454 = vst [vmem:[#allocation43_spill] sm:$0xff] %v4283_v34  ;;  %6455 = vst [vmem:[#allocation44_spill] sm:$0xff] %v4285_v35  ;;  %3061 = vmatprep.subr.bf16.mxu1 %v4291_v49  ;;  %v1649_v1 = vand.u32 4294901760, %v222_v37  ;;  %v1653_v2 = vand.u32 4294901760, %v224_v42  ;;  %v4307_v19 = vsub.f32 %v287_v31, %v365_v59  ;;  %v371_v20 = vand.u32 4294901760, %v292_v53  ;;  %v298_v11 = vld [vmem:[#allocation5 + $0x2b8] sm:$0xff] }
  0x6e   : > { %6456 = vst [vmem:[#allocation45_spill] sm:$0xff] %v4287_v43  ;;  %6457 = vst [vmem:[#allocation46_spill] sm:$0xff] %v4289_v44  ;;  %3445 = vmatprep.subr.bf16.mxu0 %v4299_v57  ;;  %v375_v7 = vand.u32 4294901760, %v294_v54  ;;  %v1655_v21 = vand.u32 4294901760, %v227_v55  ;;  %v4309_v29 = vpack.c.bf16 %v369_v0, %v365_v59  ;;  %v4311_v35 = vsub.f32 %v289_v36, %v369_v0  ;;  %v231_v47 = vld [vmem:[#allocation5 + $0xa8] sm:$0xff]  ;;  %v230_v38 = vld [vmem:[#allocation5 + $0xa0] sm:$0xff] }
  0x6f   : > { %6458 = vst [vmem:[#allocation47_spill] sm:$0xff] %v4291_v49  ;;  %6459 = vst [vmem:[#allocation48_spill] sm:$0xff] %v4293_v51  ;;  %v4313_v9 = vpack.c.bf16 %v1653_v2, %v1649_v1  ;;  %v4315_v30 = vsub.f32 %v222_v37, %v1649_v1  ;;  %v228_v49 = vld [vmem:[#allocation5 + $0x90] sm:$0xff]  ;;  %v4321_v3 = vsub.f32 %v292_v53, %v371_v20  ;;  %v1659_v36 = vand.u32 4294901760, %v229_v14  ;;  %v233_v53 = vld [vmem:[#allocation5 + $0xb8] sm:$0xff] }
  0x70   : > { %6460 = vst [vmem:[#allocation49_spill] sm:$0xff] %v4297_v56  ;;  %6461 = vst [vmem:[#allocation50_spill] sm:$0xff] %v4299_v57  ;;  %v4317_v57 = vsub.f32 %v224_v42, %v1653_v2  ;;  %v4319_v31 = vpack.c.bf16 %v375_v7, %v371_v20  ;;  %v4323_v5 = vsub.f32 %v294_v54, %v375_v7  ;;  %3063 = vmatpush1.bf16.msra.mxu1 %v4309_v29  ;;  %v232_v15 = vld [vmem:[#allocation5 + $0xb0] sm:$0xff] }
  0x71   : > { %6462 = vst [vmem:[#allocation51_spill] sm:$0xff] %v4301_v58  ;;  %6463 = vst [vmem:[#allocation52_spill] sm:$0xff] %v4304_v63  ;;  %3447 = vmatpush1.bf16.msra.mxu0 %v4313_v9  ;;  %v4327_v59 = vsub.f32 %v227_v55, %v1655_v21  ;;  %v373_v37 = vand.u32 4294901760, %v291_v26  ;;  %v377_v0 = vand.u32 4294901760, %v293_v28  ;;  %v1657_v1 = vand.u32 4294901760, %v226_v8  ;;  %v295_v55 = vld [vmem:[#allocation5 + $0x2a0] sm:$0xff] }
  0x72   : > { %6464 = vst [vmem:[#allocation53_spill] sm:$0xff] %v4307_v19  ;;  %6465 = vst [vmem:[#allocation54_spill] sm:$0xff] %v4309_v29  ;;  %3065 = vmatprep.subr.bf16.mxu1 %v4319_v31  ;;  %v1661_v42 = vand.u32 4294901760, %v228_v49  ;;  %v379_v2 = vand.u32 4294901760, %v296_v32  ;;  %v383_v60 = vand.u32 4294901760, %v298_v11  ;;  %v4330_v20 = vpack.c.bf16 %v1659_v36, %v1655_v21  ;;  %v297_v29 = vld [vmem:[#allocation5 + $0x2b0] sm:$0xff] }
  0x73   : > { %6466 = vst [vmem:[#allocation55_spill] sm:$0xff] %v4311_v35  ;;  %6467 = vst [vmem:[#allocation56_spill] sm:$0xff] %v4313_v9  ;;  %v4332_v54 = vsub.f32 %v229_v14, %v1659_v36  ;;  %v4334_v7 = vpack.c.bf16 %v377_v0, %v373_v37  ;;  %v4336_v9 = vsub.f32 %v291_v26, %v373_v37  ;;  %v300_v21 = vld [vmem:[#allocation5 + $0x2c8] sm:$0xff]  ;;  %v381_v37 = vand.u32 4294901760, %v295_v55 }
  0x74   : > { %6468 = vst [vmem:[#allocation57_spill] sm:$0xff] %v4315_v30  ;;  %6469 = vst [vmem:[#allocation58_spill] sm:$0xff] %v4317_v57  ;;  %v4338_v45 = vsub.f32 %v293_v28, %v377_v0  ;;  %v4342_v24 = vsub.f32 %v226_v8, %v1657_v1  ;;  %v4344_v22 = vsub.f32 %v228_v49, %v1661_v42  ;;  %3449 = vmatprep.subr.bf16.mxu0 %v4330_v20 }
  0x75   : > { %6470 = vst [vmem:[#allocation59_spill] sm:$0xff] %v4319_v31  ;;  %6471 = vst [vmem:[#allocation60_spill] sm:$0xff] %v4321_v3  ;;  %v4340_v31 = vpack.c.bf16 %v1661_v42, %v1657_v1  ;;  %3067 = vmatpush1.bf16.msra.mxu1 %v4334_v7  ;;  %v4348_v14 = vpack.c.bf16 %v383_v60, %v379_v2  ;;  %v4350_v26 = vsub.f32 %v296_v32, %v379_v2 }
  0x76   : > { %6472 = vst [vmem:[#allocation61_spill] sm:$0xff] %v4323_v5  ;;  %6473 = vst [vmem:[#allocation62_spill] sm:$0xff] %v4327_v59  ;;  %v302_v59 = vld [vmem:[#allocation5 + $0x2d8] sm:$0xff]  ;;  %v4352_v36 = vsub.f32 %v298_v11, %v383_v60  ;;  %v1663_v28 = vand.u32 4294901760, %v231_v47  ;;  %v1667_v8 = vand.u32 4294901760, %v233_v53  ;;  %v385_v49 = vand.u32 4294901760, %v297_v29 }
  0x77   : > { %6474 = vst [vmem:[#allocation63_spill] sm:$0xff] %v4330_v20  ;;  %6475 = vst [vmem:[#allocation64_spill] sm:$0xff] %v4332_v54  ;;  %3451 = vmatpush1.bf16.msra.mxu0 %v4340_v31  ;;  %v1665_v0 = vand.u32 4294901760, %v230_v38  ;;  %3069 = vmatprep.subr.bf16.mxu1 %v4348_v14  ;;  %v1669_v42 = vand.u32 4294901760, %v232_v15  ;;  %v387_v20 = vand.u32 4294901760, %v300_v21  ;;  %v4364_v2 = vsub.f32 %v295_v55, %v381_v37  ;;  %v306_v54 = vld [vmem:[#allocation5 + $0x2f8] sm:$0xff] }
  0x78   : > { %6476 = vst [vmem:[#allocation65_spill] sm:$0xff] %v4334_v7  ;;  %6477 = vst [vmem:[#allocation66_spill] sm:$0xff] %v4336_v9  ;;  %v4356_v1 = vsub.f32 %v231_v47, %v1663_v28  ;;  %v391_v7 = vand.u32 4294901760, %v302_v59  ;;  %v4358_v32 = vpack.c.bf16 %v1667_v8, %v1663_v28  ;;  %v4360_v60 = vsub.f32 %v233_v53, %v1667_v8  ;;  %v236_v9 = vld [vmem:[#allocation5 + $0xd0] sm:$0xff]  ;;  %v304_v28 = vld [vmem:[#allocation5 + $0x2e8] sm:$0xff] }
  0x79   : > { %6478 = vst [vmem:[#allocation67_spill] sm:$0xff] %v4338_v45  ;;  %6479 = vst [vmem:[#allocation68_spill] sm:$0xff] %v4340_v31  ;;  %v4362_v11 = vpack.c.bf16 %v385_v49, %v381_v37  ;;  %v299_v31 = vld [vmem:[#allocation5 + $0x2c0] sm:$0xff]  ;;  %v4366_v45 = vsub.f32 %v297_v29, %v385_v49  ;;  %v4368_v47 = vpack.c.bf16 %v1669_v42, %v1665_v0 }
  0x7a   : > { %6480 = vst [vmem:[#allocation69_spill] sm:$0xff] %v4342_v24  ;;  %6481 = vst [vmem:[#allocation70_spill] sm:$0xff] %v4344_v22  ;;  %v235_v22 = vld [vmem:[#allocation5 + $0xc8] sm:$0xff]  ;;  %v237_v24 = vld [vmem:[#allocation5 + $0xd8] sm:$0xff]  ;;  %3453 = vmatprep.subr.bf16.mxu0 %v4358_v32  ;;  %v4376_v53 = vpack.c.bf16 %v391_v7, %v387_v20  ;;  %v4378_v55 = vsub.f32 %v300_v21, %v387_v20  ;;  %v4380_v8 = vsub.f32 %v302_v59, %v391_v7 }
  0x7b   : > { %6482 = vst [vmem:[#allocation71_spill] sm:$0xff] %v4348_v14  ;;  %6483 = vst [vmem:[#allocation72_spill] sm:$0xff] %v4350_v26  ;;  %v234_v26 = vld [vmem:[#allocation5 + $0xc0] sm:$0xff]  ;;  %v4370_v14 = vsub.f32 %v230_v38, %v1665_v0  ;;  %3071 = vmatpush1.bf16.msra.mxu1 %v4362_v11  ;;  %v1671_v29 = vand.u32 4294901760, %v235_v22  ;;  %3455 = vmatpush1.bf16.msra.mxu0 %v4368_v47  ;;  %v1675_v38 = vand.u32 4294901760, %v237_v24  ;;  %v389_v37 = vand.u32 4294901760, %v299_v31 }
  0x7c   : > { %6484 = vst [vmem:[#allocation73_spill] sm:$0xff] %v4352_v36  ;;  %6485 = vst [vmem:[#allocation74_spill] sm:$0xff] %v4356_v1  ;;  %v301_v36 = vld [vmem:[#allocation5 + $0x2d0] sm:$0xff]  ;;  %v4372_v1 = vsub.f32 %v232_v15, %v1669_v42  ;;  %v1673_v49 = vand.u32 4294901760, %v234_v26  ;;  %3073 = vmatprep.subr.bf16.mxu1 %v4376_v53  ;;  %v1677_v42 = vand.u32 4294901760, %v236_v9 }
  0x7d   : > { %6486 = vst [vmem:[#allocation75_spill] sm:$0xff] %v4358_v32  ;;  %6487 = vst [vmem:[#allocation76_spill] sm:$0xff] %v4360_v60  ;;  %v393_v15 = vand.u32 4294901760, %v301_v36  ;;  %v4384_v0 = vsub.f32 %v235_v22, %v1671_v29  ;;  %v395_v32 = vand.u32 4294901760, %v304_v28  ;;  %v4386_v20 = vpack.c.bf16 %v1675_v38, %v1671_v29  ;;  %v308_v29 = vld [vmem:[#allocation5 + $0x308] sm:$0xff]  ;;  %v310_v60 = vld [vmem:[#allocation5 + $0x318] sm:$0xff] }
  0x7e   : > { %6488 = vst [vmem:[#allocation77_spill] sm:$0xff] %v4362_v11  ;;  %6489 = vst [vmem:[#allocation78_spill] sm:$0xff] %v4364_v2  ;;  %v399_v11 = vand.u32 4294901760, %v306_v54  ;;  %v4388_v59 = vsub.f32 %v237_v24, %v1675_v38  ;;  %v4392_v21 = vsub.f32 %v299_v31, %v389_v37  ;;  %v4396_v22 = vpack.c.bf16 %v1677_v42, %v1673_v49  ;;  %v240_v2 = vld [vmem:[#allocation5 + $0xf0] sm:$0xff] }
  0x7f   : > { %6490 = vst [vmem:[#allocation79_spill] sm:$0xff] %v4366_v45  ;;  %6491 = vst [vmem:[#allocation80_spill] sm:$0xff] %v4368_v47  ;;  %v4390_v7 = vpack.c.bf16 %v393_v15, %v389_v37  ;;  %v303_v47 = vld [vmem:[#allocation5 + $0x2e0] sm:$0xff]  ;;  %v4394_v45 = vsub.f32 %v301_v36, %v393_v15  ;;  %3457 = vmatprep.subr.bf16.mxu0 %v4386_v20  ;;  %v4406_v31 = vsub.f32 %v304_v28, %v395_v32 }
  0x80   : > { %6492 = vst [vmem:[#allocation81_spill] sm:$0xff] %v4370_v14  ;;  %6493 = vst [vmem:[#allocation82_spill] sm:$0xff] %v4372_v1  ;;  %v239_v1 = vld [vmem:[#allocation5 + $0xe8] sm:$0xff]  ;;  %v241_v14 = vld [vmem:[#allocation5 + $0xf8] sm:$0xff]  ;;  %v4404_v24 = vpack.c.bf16 %v399_v11, %v395_v32  ;;  %v4408_v38 = vsub.f32 %v306_v54, %v399_v11  ;;  %3459 = vmatpush1.bf16.msra.mxu0 %v4396_v22  ;;  %v397_v37 = vand.u32 4294901760, %v303_v47 }
  0x81   : > { %6494 = vst [vmem:[#allocation83_spill] sm:$0xff] %v4376_v53  ;;  %6495 = vst [vmem:[#allocation84_spill] sm:$0xff] %v4378_v55  ;;  %v238_v55 = vld [vmem:[#allocation5 + $0xe0] sm:$0xff]  ;;  %v4398_v53 = vsub.f32 %v234_v26, %v1673_v49  ;;  %3075 = vmatpush1.bf16.msra.mxu1 %v4390_v7  ;;  %v1679_v36 = vand.u32 4294901760, %v239_v1  ;;  %v1683_v26 = vand.u32 4294901760, %v241_v14 }
  0x82   : > { %6496 = vst [vmem:[#allocation85_spill] sm:$0xff] %v4380_v8  ;;  %6497 = vst [vmem:[#allocation86_spill] sm:$0xff] %v4384_v0  ;;  %v305_v8 = vld [vmem:[#allocation5 + $0x2f0] sm:$0xff]  ;;  %v4400_v0 = vsub.f32 %v236_v9, %v1677_v42  ;;  %v1681_v15 = vand.u32 4294901760, %v238_v55  ;;  %3077 = vmatprep.subr.bf16.mxu1 %v4404_v24  ;;  %v1685_v42 = vand.u32 4294901760, %v240_v2  ;;  %v4420_v28 = vsub.f32 %v303_v47, %v397_v37 }
  0x83   : > { %6498 = vst [vmem:[#allocation87_spill] sm:$0xff] %v4386_v20  ;;  %6499 = vst [vmem:[#allocation88_spill] sm:$0xff] %v4388_v59  ;;  %v401_v9 = vand.u32 4294901760, %v305_v8  ;;  %v4412_v49 = vsub.f32 %v239_v1, %v1679_v36  ;;  %v403_v20 = vand.u32 4294901760, %v308_v29  ;;  %v4414_v32 = vpack.c.bf16 %v1683_v26, %v1679_v36  ;;  %v312_v36 = vld [vmem:[#allocation5 + $0x328] sm:$0xff]  ;;  %v314_v59 = vld [vmem:[#allocation5 + $0x338] sm:$0xff] }
  0x84   : > { %6500 = vst [vmem:[#allocation89_spill] sm:$0xff] %v4390_v7  ;;  %6501 = vst [vmem:[#allocation90_spill] sm:$0xff] %v4392_v21  ;;  %v407_v7 = vand.u32 4294901760, %v310_v60  ;;  %v4416_v54 = vsub.f32 %v241_v14, %v1683_v26  ;;  %v4424_v1 = vpack.c.bf16 %v1685_v42, %v1681_v15  ;;  %v244_v21 = vld [vmem:[#allocation5 + $0x110] sm:$0xff] }
  0x85   : > { %6502 = vst [vmem:[#allocation91_spill] sm:$0xff] %v4394_v45  ;;  %6503 = vst [vmem:[#allocation92_spill] sm:$0xff] %v4396_v22  ;;  %v4418_v11 = vpack.c.bf16 %v401_v9, %v397_v37  ;;  %v307_v22 = vld [vmem:[#allocation5 + $0x300] sm:$0xff]  ;;  %v4422_v45 = vsub.f32 %v305_v8, %v401_v9  ;;  %3461 = vmatprep.subr.bf16.mxu0 %v4414_v32  ;;  %v4434_v47 = vsub.f32 %v308_v29, %v403_v20 }
  0x86   : > { %6504 = vst [vmem:[#allocation93_spill] sm:$0xff] %v4398_v53  ;;  %6505 = vst [vmem:[#allocation94_spill] sm:$0xff] %v4400_v0  ;;  %v243_v0 = vld [vmem:[#allocation5 + $0x108] sm:$0xff]  ;;  %v245_v53 = vld [vmem:[#allocation5 + $0x118] sm:$0xff]  ;;  %v4432_v14 = vpack.c.bf16 %v407_v7, %v403_v20  ;;  %v4436_v26 = vsub.f32 %v310_v60, %v407_v7  ;;  %3463 = vmatpush1.bf16.msra.mxu0 %v4424_v1  ;;  %v405_v37 = vand.u32 4294901760, %v307_v22 }
  0x87   : > { %6506 = vst [vmem:[#allocation95_spill] sm:$0xff] %v4404_v24  ;;  %6507 = vst [vmem:[#allocation96_spill] sm:$0xff] %v4406_v31  ;;  %v242_v31 = vld [vmem:[#allocation5 + $0x100] sm:$0xff]  ;;  %v4426_v24 = vsub.f32 %v238_v55, %v1681_v15  ;;  %3079 = vmatpush1.bf16.msra.mxu1 %v4418_v11  ;;  %v1687_v8 = vand.u32 4294901760, %v243_v0  ;;  %v1691_v55 = vand.u32 4294901760, %v245_v53 }
  0x88   : > { %6508 = vst [vmem:[#allocation97_spill] sm:$0xff] %v4408_v38  ;;  %6509 = vst [vmem:[#allocation98_spill] sm:$0xff] %v4412_v49  ;;  %v309_v38 = vld [vmem:[#allocation5 + $0x310] sm:$0xff]  ;;  %v4428_v49 = vsub.f32 %v240_v2, %v1685_v42  ;;  %v1689_v9 = vand.u32 4294901760, %v242_v31  ;;  %3081 = vmatprep.subr.bf16.mxu1 %v4432_v14  ;;  %v1693_v42 = vand.u32 4294901760, %v244_v21  ;;  %v4448_v29 = vsub.f32 %v307_v22, %v405_v37 }
  0x89   : > { %6510 = vst [vmem:[#allocation99_spill] sm:$0xff] %v4414_v32  ;;  %6511 = vst [vmem:[#allocation100_spill] sm:$0xff] %v4416_v54  ;;  %v409_v2 = vand.u32 4294901760, %v309_v38  ;;  %v4440_v15 = vsub.f32 %v243_v0, %v1687_v8  ;;  %v411_v32 = vand.u32 4294901760, %v312_v36  ;;  %v4442_v20 = vpack.c.bf16 %v1691_v55, %v1687_v8  ;;  %v316_v8 = vld [vmem:[#allocation5 + $0x348] sm:$0xff]  ;;  %v318_v54 = vld [vmem:[#allocation5 + $0x358] sm:$0xff] }
  0x8a   : > { %6512 = vst [vmem:[#allocation101_spill] sm:$0xff] %v4418_v11  ;;  %6513 = vst [vmem:[#allocation102_spill] sm:$0xff] %v4420_v28  ;;  %v415_v11 = vand.u32 4294901760, %v314_v59  ;;  %v4444_v60 = vsub.f32 %v245_v53, %v1691_v55  ;;  %v4452_v0 = vpack.c.bf16 %v1693_v42, %v1689_v9  ;;  %v248_v28 = vld [vmem:[#allocation5 + $0x130] sm:$0xff] }
  0x8b   : > { %6514 = vst [vmem:[#allocation103_spill] sm:$0xff] %v4422_v45  ;;  %6515 = vst [vmem:[#allocation104_spill] sm:$0xff] %v4424_v1  ;;  %v4446_v7 = vpack.c.bf16 %v409_v2, %v405_v37  ;;  %v311_v1 = vld [vmem:[#allocation5 + $0x320] sm:$0xff]  ;;  %v4450_v45 = vsub.f32 %v309_v38, %v409_v2  ;;  %3465 = vmatprep.subr.bf16.mxu0 %v4442_v20  ;;  %v4462_v22 = vsub.f32 %v312_v36, %v411_v32 }
  0x8c   : > { %6516 = vst [vmem:[#allocation105_spill] sm:$0xff] %v4426_v24  ;;  %6517 = vst [vmem:[#allocation106_spill] sm:$0xff] %v4428_v49  ;;  %v247_v49 = vld [vmem:[#allocation5 + $0x128] sm:$0xff]  ;;  %v249_v24 = vld [vmem:[#allocation5 + $0x138] sm:$0xff]  ;;  %v4460_v53 = vpack.c.bf16 %v415_v11, %v411_v32  ;;  %v4464_v55 = vsub.f32 %v314_v59, %v415_v11  ;;  %3467 = vmatpush1.bf16.msra.mxu0 %v4452_v0  ;;  %v413_v37 = vand.u32 4294901760, %v311_v1 }
  0x8d   : > { %6518 = vst [vmem:[#allocation107_spill] sm:$0xff] %v4432_v14  ;;  %6519 = vst [vmem:[#allocation108_spill] sm:$0xff] %v4434_v47  ;;  %v246_v47 = vld [vmem:[#allocation5 + $0x120] sm:$0xff]  ;;  %v4454_v14 = vsub.f32 %v242_v31, %v1689_v9  ;;  %3083 = vmatpush1.bf16.msra.mxu1 %v4446_v7  ;;  %v1695_v38 = vand.u32 4294901760, %v247_v49  ;;  %v1699_v31 = vand.u32 4294901760, %v249_v24 }
  0x8e   : > { %6520 = vst [vmem:[#allocation109_spill] sm:$0xff] %v4436_v26  ;;  %6521 = vst [vmem:[#allocation110_spill] sm:$0xff] %v4440_v15  ;;  %v313_v26 = vld [vmem:[#allocation5 + $0x330] sm:$0xff]  ;;  %v4456_v15 = vsub.f32 %v244_v21, %v1693_v42  ;;  %v1697_v2 = vand.u32 4294901760, %v246_v47  ;;  %3085 = vmatprep.subr.bf16.mxu1 %v4460_v53  ;;  %v1701_v42 = vand.u32 4294901760, %v248_v28  ;;  %v4476_v36 = vsub.f32 %v311_v1, %v413_v37 }
  0x8f   : > { %6522 = vst [vmem:[#allocation111_spill] sm:$0xff] %v4442_v20  ;;  %6523 = vst [vmem:[#allocation112_spill] sm:$0xff] %v4444_v60  ;;  %v417_v21 = vand.u32 4294901760, %v313_v26  ;;  %v4468_v9 = vsub.f32 %v247_v49, %v1695_v38  ;;  %v419_v20 = vand.u32 4294901760, %v316_v8  ;;  %v4470_v32 = vpack.c.bf16 %v1699_v31, %v1695_v38  ;;  %v320_v38 = vld [vmem:[#allocation5 + $0x368] sm:$0xff]  ;;  %v322_v60 = vld [vmem:[#allocation5 + $0x378] sm:$0xff] }
  0x90   : > { %6524 = vst [vmem:[#allocation113_spill] sm:$0xff] %v4446_v7  ;;  %6525 = vst [vmem:[#allocation114_spill] sm:$0xff] %v4448_v29  ;;  %v423_v7 = vand.u32 4294901760, %v318_v54  ;;  %v4472_v59 = vsub.f32 %v249_v24, %v1699_v31  ;;  %v4480_v49 = vpack.c.bf16 %v1701_v42, %v1697_v2  ;;  %v252_v29 = vld [vmem:[#allocation5 + $0x150] sm:$0xff] }
  0x91   : > { %6526 = vst [vmem:[#allocation115_spill] sm:$0xff] %v4450_v45  ;;  %6527 = vst [vmem:[#allocation116_spill] sm:$0xff] %v4452_v0  ;;  %v4474_v11 = vpack.c.bf16 %v417_v21, %v413_v37  ;;  %v315_v0 = vld [vmem:[#allocation5 + $0x340] sm:$0xff]  ;;  %v4478_v45 = vsub.f32 %v313_v26, %v417_v21  ;;  %3469 = vmatprep.subr.bf16.mxu0 %v4470_v32  ;;  %v4490_v1 = vsub.f32 %v316_v8, %v419_v20 }
  0x92   : > { %6528 = vst [vmem:[#allocation117_spill] sm:$0xff] %v4454_v14  ;;  %6529 = vst [vmem:[#allocation118_spill] sm:$0xff] %v4456_v15  ;;  %v251_v15 = vld [vmem:[#allocation5 + $0x148] sm:$0xff]  ;;  %v253_v14 = vld [vmem:[#allocation5 + $0x158] sm:$0xff]  ;;  %v4488_v24 = vpack.c.bf16 %v423_v7, %v419_v20  ;;  %v4492_v31 = vsub.f32 %v318_v54, %v423_v7  ;;  %3471 = vmatpush1.bf16.msra.mxu0 %v4480_v49  ;;  %v421_v37 = vand.u32 4294901760, %v315_v0 }
  0x93   : > { %6530 = vst [vmem:[#allocation119_spill] sm:$0xff] %v4460_v53  ;;  %6531 = vst [vmem:[#allocation120_spill] sm:$0xff] %v4462_v22  ;;  %v250_v22 = vld [vmem:[#allocation5 + $0x140] sm:$0xff]  ;;  %v4482_v53 = vsub.f32 %v246_v47, %v1697_v2  ;;  %3087 = vmatpush1.bf16.msra.mxu1 %v4474_v11  ;;  %v1703_v26 = vand.u32 4294901760, %v251_v15  ;;  %v1707_v47 = vand.u32 4294901760, %v253_v14 }
  0x94   : > { %6532 = vst [vmem:[#allocation121_spill] sm:$0xff] %v4464_v55  ;;  %6533 = vst [vmem:[#allocation122_spill] sm:$0xff] %v4468_v9  ;;  %v317_v55 = vld [vmem:[#allocation5 + $0x350] sm:$0xff]  ;;  %v4484_v9 = vsub.f32 %v248_v28, %v1701_v42  ;;  %v1705_v21 = vand.u32 4294901760, %v250_v22  ;;  %3089 = vmatprep.subr.bf16.mxu1 %v4488_v24  ;;  %v1709_v42 = vand.u32 4294901760, %v252_v29  ;;  %v4504_v8 = vsub.f32 %v315_v0, %v421_v37 }
  0x95   : > { %6534 = vst [vmem:[#allocation123_spill] sm:$0xff] %v4470_v32  ;;  %6535 = vst [vmem:[#allocation124_spill] sm:$0xff] %v4472_v59  ;;  %v425_v28 = vand.u32 4294901760, %v317_v55  ;;  %v4496_v2 = vsub.f32 %v251_v15, %v1703_v26  ;;  %v427_v32 = vand.u32 4294901760, %v320_v38  ;;  %v4498_v20 = vpack.c.bf16 %v1707_v47, %v1703_v26  ;;  %v324_v26 = vld [vmem:[#allocation5 + $0x388] sm:$0xff]  ;;  %v326_v59 = vld [vmem:[#allocation5 + $0x398] sm:$0xff] }
  0x96   : > { %6536 = vst [vmem:[#allocation125_spill] sm:$0xff] %v4474_v11  ;;  %6537 = vst [vmem:[#allocation126_spill] sm:$0xff] %v4476_v36  ;;  %v431_v11 = vand.u32 4294901760, %v322_v60  ;;  %v4500_v54 = vsub.f32 %v253_v14, %v1707_v47  ;;  %v4508_v15 = vpack.c.bf16 %v1709_v42, %v1705_v21  ;;  %v256_v36 = vld [vmem:[#allocation5 + $0x170] sm:$0xff] }
  0x97   : > { %6538 = vst [vmem:[#allocation127_spill] sm:$0xff] %v4478_v45  ;;  %6539 = vst [vmem:[#allocation128_spill] sm:$0xff] %v4480_v49  ;;  %v4502_v7 = vpack.c.bf16 %v425_v28, %v421_v37  ;;  %v319_v49 = vld [vmem:[#allocation5 + $0x360] sm:$0xff]  ;;  %v4506_v45 = vsub.f32 %v317_v55, %v425_v28  ;;  %3473 = vmatprep.subr.bf16.mxu0 %v4498_v20  ;;  %v4518_v0 = vsub.f32 %v320_v38, %v427_v32 }
  0x98   : > { %6540 = vst [vmem:[#allocation129_spill] sm:$0xff] %v4482_v53  ;;  %6541 = vst [vmem:[#allocation130_spill] sm:$0xff] %v4484_v9  ;;  %v255_v9 = vld [vmem:[#allocation5 + $0x168] sm:$0xff]  ;;  %v257_v53 = vld [vmem:[#allocation5 + $0x178] sm:$0xff]  ;;  %v4516_v14 = vpack.c.bf16 %v431_v11, %v427_v32  ;;  %v4520_v47 = vsub.f32 %v322_v60, %v431_v11  ;;  %3475 = vmatpush1.bf16.msra.mxu0 %v4508_v15  ;;  %v429_v37 = vand.u32 4294901760, %v319_v49 }
  0x99   : > { %6542 = vst [vmem:[#allocation131_spill] sm:$0xff] %v4488_v24  ;;  %6543 = vst [vmem:[#allocation132_spill] sm:$0xff] %v4490_v1  ;;  %v254_v1 = vld [vmem:[#allocation5 + $0x160] sm:$0xff]  ;;  %v4510_v24 = vsub.f32 %v250_v22, %v1705_v21  ;;  %3091 = vmatpush1.bf16.msra.mxu1 %v4502_v7  ;;  %v1711_v55 = vand.u32 4294901760, %v255_v9  ;;  %v1715_v22 = vand.u32 4294901760, %v257_v53 }
  0x9a   : > { %6544 = vst [vmem:[#allocation133_spill] sm:$0xff] %v4492_v31  ;;  %6545 = vst [vmem:[#allocation134_spill] sm:$0xff] %v4496_v2  ;;  %v321_v31 = vld [vmem:[#allocation5 + $0x370] sm:$0xff]  ;;  %v4512_v2 = vsub.f32 %v252_v29, %v1709_v42  ;;  %v1713_v28 = vand.u32 4294901760, %v254_v1  ;;  %3093 = vmatprep.subr.bf16.mxu1 %v4516_v14  ;;  %v1717_v42 = vand.u32 4294901760, %v256_v36  ;;  %v4532_v38 = vsub.f32 %v319_v49, %v429_v37 }
  0x9b   : > { %6546 = vst [vmem:[#allocation135_spill] sm:$0xff] %v4498_v20  ;;  %6547 = vst [vmem:[#allocation136_spill] sm:$0xff] %v4500_v54  ;;  %v433_v29 = vand.u32 4294901760, %v321_v31  ;;  %v4524_v21 = vsub.f32 %v255_v9, %v1711_v55  ;;  %v435_v20 = vand.u32 4294901760, %v324_v26  ;;  %v4526_v32 = vpack.c.bf16 %v1715_v22, %v1711_v55  ;;  %v328_v55 = vld [vmem:[#allocation5 + $0x3a8] sm:$0xff]  ;;  %v330_v54 = vld [vmem:[#allocation5 + $0x3b8] sm:$0xff] }
  0x9c   : > { %6548 = vst [vmem:[#allocation137_spill] sm:$0xff] %v4502_v7  ;;  %6549 = vst [vmem:[#allocation138_spill] sm:$0xff] %v4504_v8  ;;  %v439_v7 = vand.u32 4294901760, %v326_v59  ;;  %v4528_v60 = vsub.f32 %v257_v53, %v1715_v22  ;;  %v4536_v9 = vpack.c.bf16 %v1717_v42, %v1713_v28  ;;  %v260_v8 = vld [vmem:[#allocation5 + $0x190] sm:$0xff] }
  0x9d   : > { %6550 = vst [vmem:[#allocation139_spill] sm:$0xff] %v4506_v45  ;;  %6551 = vst [vmem:[#allocation140_spill] sm:$0xff] %v4508_v15  ;;  %v4530_v11 = vpack.c.bf16 %v433_v29, %v429_v37  ;;  %v323_v15 = vld [vmem:[#allocation5 + $0x380] sm:$0xff]  ;;  %v4534_v45 = vsub.f32 %v321_v31, %v433_v29  ;;  %3477 = vmatprep.subr.bf16.mxu0 %v4526_v32  ;;  %v4546_v49 = vsub.f32 %v324_v26, %v435_v20 }
  0x9e   : > { %6552 = vst [vmem:[#allocation141_spill] sm:$0xff] %v4510_v24  ;;  %6553 = vst [vmem:[#allocation142_spill] sm:$0xff] %v4512_v2  ;;  %v259_v2 = vld [vmem:[#allocation5 + $0x188] sm:$0xff]  ;;  %v261_v24 = vld [vmem:[#allocation5 + $0x198] sm:$0xff]  ;;  %v4544_v53 = vpack.c.bf16 %v439_v7, %v435_v20  ;;  %v4548_v22 = vsub.f32 %v326_v59, %v439_v7  ;;  %3479 = vmatpush1.bf16.msra.mxu0 %v4536_v9  ;;  %v437_v37 = vand.u32 4294901760, %v323_v15 }
  0x9f   : > { %6554 = vst [vmem:[#allocation143_spill] sm:$0xff] %v4516_v14  ;;  %6555 = vst [vmem:[#allocation144_spill] sm:$0xff] %v4518_v0  ;;  %v258_v0 = vld [vmem:[#allocation5 + $0x180] sm:$0xff]  ;;  %v4538_v14 = vsub.f32 %v254_v1, %v1713_v28  ;;  %3095 = vmatpush1.bf16.msra.mxu1 %v4530_v11  ;;  %v1719_v31 = vand.u32 4294901760, %v259_v2  ;;  %v1723_v1 = vand.u32 4294901760, %v261_v24 }
  0xa0   : > { %6556 = vst [vmem:[#allocation145_spill] sm:$0xff] %v4520_v47  ;;  %6557 = vst [vmem:[#allocation146_spill] sm:$0xff] %v4524_v21  ;;  %v325_v47 = vld [vmem:[#allocation5 + $0x390] sm:$0xff]  ;;  %v4540_v21 = vsub.f32 %v256_v36, %v1717_v42  ;;  %v1721_v29 = vand.u32 4294901760, %v258_v0  ;;  %3097 = vmatprep.subr.bf16.mxu1 %v4544_v53  ;;  %v1725_v42 = vand.u32 4294901760, %v260_v8  ;;  %v4560_v26 = vsub.f32 %v323_v15, %v437_v37 }
  0xa1   : > { %6558 = vst [vmem:[#allocation147_spill] sm:$0xff] %v4526_v32  ;;  %6559 = vst [vmem:[#allocation148_spill] sm:$0xff] %v4528_v60  ;;  %v441_v36 = vand.u32 4294901760, %v325_v47  ;;  %v4552_v28 = vsub.f32 %v259_v2, %v1719_v31  ;;  %v443_v32 = vand.u32 4294901760, %v328_v55  ;;  %v4554_v20 = vpack.c.bf16 %v1723_v1, %v1719_v31  ;;  %v332_v31 = vld [vmem:[#allocation5 + $0x3c8] sm:$0xff]  ;;  %v334_v60 = vld [vmem:[#allocation5 + $0x3d8] sm:$0xff] }
  0xa2   : > { %6560 = vst [vmem:[#allocation149_spill] sm:$0xff] %v4530_v11  ;;  %6561 = vst [vmem:[#allocation150_spill] sm:$0xff] %v4532_v38  ;;  %v447_v11 = vand.u32 4294901760, %v330_v54  ;;  %v4556_v59 = vsub.f32 %v261_v24, %v1723_v1  ;;  %v4564_v2 = vpack.c.bf16 %v1725_v42, %v1721_v29  ;;  %v264_v38 = vld [vmem:[#allocation5 + $0x1b0] sm:$0xff] }
  0xa3   : > { %6562 = vst [vmem:[#allocation151_spill] sm:$0xff] %v4534_v45  ;;  %6563 = vst [vmem:[#allocation152_spill] sm:$0xff] %v4536_v9  ;;  %v4558_v7 = vpack.c.bf16 %v441_v36, %v437_v37  ;;  %v327_v9 = vld [vmem:[#allocation5 + $0x3a0] sm:$0xff]  ;;  %v4562_v45 = vsub.f32 %v325_v47, %v441_v36  ;;  %3481 = vmatprep.subr.bf16.mxu0 %v4554_v20  ;;  %v4574_v15 = vsub.f32 %v328_v55, %v443_v32 }
  0xa4   : > { %6564 = vst [vmem:[#allocation153_spill] sm:$0xff] %v4538_v14  ;;  %6565 = vst [vmem:[#allocation154_spill] sm:$0xff] %v4540_v21  ;;  %v263_v21 = vld [vmem:[#allocation5 + $0x1a8] sm:$0xff]  ;;  %v265_v14 = vld [vmem:[#allocation5 + $0x1b8] sm:$0xff]  ;;  %v4572_v24 = vpack.c.bf16 %v447_v11, %v443_v32  ;;  %v4576_v1 = vsub.f32 %v330_v54, %v447_v11  ;;  %3483 = vmatpush1.bf16.msra.mxu0 %v4564_v2  ;;  %v445_v37 = vand.u32 4294901760, %v327_v9 }
  0xa5   : > { %6566 = vst [vmem:[#allocation155_spill] sm:$0xff] %v4544_v53  ;;  %6567 = vst [vmem:[#allocation156_spill] sm:$0xff] %v4546_v49  ;;  %v262_v49 = vld [vmem:[#allocation5 + $0x1a0] sm:$0xff]  ;;  %v4566_v53 = vsub.f32 %v258_v0, %v1721_v29  ;;  %3099 = vmatpush1.bf16.msra.mxu1 %v4558_v7  ;;  %v1727_v47 = vand.u32 4294901760, %v263_v21  ;;  %v1731_v0 = vand.u32 4294901760, %v265_v14 }
  0xa6   : > { %6568 = vst [vmem:[#allocation157_spill] sm:$0xff] %v4548_v22  ;;  %6569 = vst [vmem:[#allocation158_spill] sm:$0xff] %v4552_v28  ;;  %v329_v22 = vld [vmem:[#allocation5 + $0x3b0] sm:$0xff]  ;;  %v4568_v28 = vsub.f32 %v260_v8, %v1725_v42  ;;  %v1729_v36 = vand.u32 4294901760, %v262_v49  ;;  %3101 = vmatprep.subr.bf16.mxu1 %v4572_v24  ;;  %v1733_v42 = vand.u32 4294901760, %v264_v38  ;;  %v4588_v55 = vsub.f32 %v327_v9, %v445_v37 }
  0xa7   : > { %6570 = vst [vmem:[#allocation159_spill] sm:$0xff] %v4554_v20  ;;  %6571 = vst [vmem:[#allocation160_spill] sm:$0xff] %v4556_v59  ;;  %v449_v8 = vand.u32 4294901760, %v329_v22  ;;  %v4580_v29 = vsub.f32 %v263_v21, %v1727_v47  ;;  %v451_v20 = vand.u32 4294901760, %v332_v31  ;;  %v4582_v32 = vpack.c.bf16 %v1731_v0, %v1727_v47  ;;  %v336_v47 = vld [vmem:[#allocation5 + $0x3e8] sm:$0xff]  ;;  %v338_v59 = vld [vmem:[#allocation5 + $0x3f8] sm:$0xff] }
  0xa8   : > { %6572 = vst [vmem:[#allocation161_spill] sm:$0xff] %v4558_v7  ;;  %6573 = vst [vmem:[#allocation162_spill] sm:$0xff] %v4560_v26  ;;  %v455_v7 = vand.u32 4294901760, %v334_v60  ;;  %v4584_v54 = vsub.f32 %v265_v14, %v1731_v0  ;;  %v4592_v21 = vpack.c.bf16 %v1733_v42, %v1729_v36  ;;  %v268_v26 = vld [vmem:[#allocation5 + $0x1d0] sm:$0xff] }
  0xa9   : > { %6574 = vst [vmem:[#allocation163_spill] sm:$0xff] %v4562_v45  ;;  %6575 = vst [vmem:[#allocation164_spill] sm:$0xff] %v4564_v2  ;;  %v4586_v11 = vpack.c.bf16 %v449_v8, %v445_v37  ;;  %v331_v2 = vld [vmem:[#allocation5 + $0x3c0] sm:$0xff]  ;;  %v4590_v45 = vsub.f32 %v329_v22, %v449_v8  ;;  %3485 = vmatprep.subr.bf16.mxu0 %v4582_v32  ;;  %v4602_v9 = vsub.f32 %v332_v31, %v451_v20 }
  0xaa   : > { %6576 = vst [vmem:[#allocation165_spill] sm:$0xff] %v4566_v53  ;;  %6577 = vst [vmem:[#allocation166_spill] sm:$0xff] %v4568_v28  ;;  %v267_v28 = vld [vmem:[#allocation5 + $0x1c8] sm:$0xff]  ;;  %v269_v53 = vld [vmem:[#allocation5 + $0x1d8] sm:$0xff]  ;;  %v4600_v14 = vpack.c.bf16 %v455_v7, %v451_v20  ;;  %v4604_v22 = vsub.f32 %v334_v60, %v455_v7  ;;  %3487 = vmatpush1.bf16.msra.mxu0 %v4592_v21 }
  0xab   : > { %6578 = vst [vmem:[#allocation167_spill] sm:$0xff] %v4572_v24  ;;  %6579 = vst [vmem:[#allocation168_spill] sm:$0xff] %v4574_v15  ;;  %v266_v15 = vld [vmem:[#allocation5 + $0x1c0] sm:$0xff]  ;;  %v4594_v24 = vsub.f32 %v262_v49, %v1729_v36  ;;  %3103 = vmatpush1.bf16.msra.mxu1 %v4586_v11  ;;  %v1735_v0 = vand.u32 4294901760, %v267_v28  ;;  %v1739_v49 = vand.u32 4294901760, %v269_v53  ;;  %v273_v20 = vld [vmem:[#allocation5 + $0x1f8] sm:$0xff] }
  0xac   : > { %6580 = vst [vmem:[#allocation169_spill] sm:$0xff] %v4576_v1  ;;  %6581 = vst [vmem:[#allocation170_spill] sm:$0xff] %v4580_v29  ;;  %v333_v1 = vld [vmem:[#allocation5 + $0x3d0] sm:$0xff]  ;;  %v4596_v29 = vsub.f32 %v264_v38, %v1733_v42  ;;  %v453_v38 = vand.u32 4294901760, %v331_v2  ;;  %v1737_v8 = vand.u32 4294901760, %v266_v15  ;;  %3105 = vmatprep.subr.bf16.mxu1 %v4600_v14  ;;  %v1741_v42 = vand.u32 4294901760, %v268_v26 }
  0xad   : > { %6582 = vst [vmem:[#allocation171_spill] sm:$0xff] %v4582_v32  ;;  %6583 = vst [vmem:[#allocation172_spill] sm:$0xff] %v4584_v54  ;;  %v457_v37 = vand.u32 4294901760, %v333_v1  ;;  %v4608_v36 = vsub.f32 %v267_v28, %v1735_v0  ;;  %v459_v32 = vand.u32 4294901760, %v336_v47  ;;  %v4610_v31 = vpack.c.bf16 %v1739_v49, %v1735_v0  ;;  %v175_v0 = vld [vmem:[%s4199_s29] sm:$0xff] }
  0xae   : > { %6584 = vst [vmem:[#allocation173_spill] sm:$0xff] %v4586_v11  ;;  %6585 = vst [vmem:[#allocation174_spill] sm:$0xff] %v4588_v55  ;;  %v463_v11 = vand.u32 4294901760, %v338_v59  ;;  %v4612_v60 = vsub.f32 %v269_v53, %v1739_v49  ;;  %v4620_v28 = vpack.c.bf16 %v1741_v42, %v1737_v8  ;;  %v272_v55 = vld [vmem:[#allocation5 + $0x1f0] sm:$0xff] }
  0xaf   : > { %6586 = vst [vmem:[#allocation175_spill] sm:$0xff] %v4590_v45  ;;  %6587 = vst [vmem:[#allocation176_spill] sm:$0xff] %v4592_v21  ;;  %v4614_v7 = vpack.c.bf16 %v457_v37, %v453_v38  ;;  %v4616_v21 = vsub.f32 %v331_v2, %v453_v38  ;;  %v4624_v45 = vsub.f32 %v268_v26, %v1741_v42  ;;  %3489 = vmatprep.subr.bf16.mxu0 %v4610_v31 }
  0xb0   : > { %6588 = vst [vmem:[#allocation177_spill] sm:$0xff] %v4594_v24  ;;  %6589 = vst [vmem:[#allocation178_spill] sm:$0xff] %v4596_v29  ;;  %v271_v29 = vld [vmem:[#allocation5 + $0x1e8] sm:$0xff]  ;;  %v270_v24 = vld [vmem:[#allocation5 + $0x1e0] sm:$0xff]  ;;  %v4629_v53 = vpack.c.bf16 %v463_v11, %v459_v32  ;;  %v4631_v2 = vsub.f32 %v336_v47, %v459_v32  ;;  %v4633_v49 = vsub.f32 %v338_v59, %v463_v11  ;;  %3491 = vmatpush1.bf16.msra.mxu0 %v4620_v28 }
  0xb1   : > { %6590 = vst [vmem:[#allocation179_spill] sm:$0xff] %v4600_v14  ;;  %6591 = vst [vmem:[#allocation180_spill] sm:$0xff] %v4602_v9  ;;  %v337_v9 = vld [vmem:[#allocation5 + $0x3f0] sm:$0xff]  ;;  %v4618_v14 = vsub.f32 %v333_v1, %v457_v37  ;;  %3107 = vmatpush1.bf16.msra.mxu1 %v4614_v7  ;;  %v1743_v1 = vand.u32 4294901760, %v271_v29  ;;  %v1747_v38 = vand.u32 4294901760, %v273_v20  ;;  %v1745_v26 = vand.u32 4294901760, %v270_v24 }
  0xb2   : > { %6592 = vst [vmem:[#allocation181_spill] sm:$0xff] %v4604_v22  ;;  %6593 = vst [vmem:[#allocation182_spill] sm:$0xff] %v4608_v36  ;;  %v335_v22 = vld [vmem:[#allocation5 + $0x3e0] sm:$0xff]  ;;  %v4622_v36 = vsub.f32 %v266_v15, %v1737_v8  ;;  %v465_v37 = vand.u32 4294901760, %v337_v9  ;;  %3109 = vmatprep.subr.bf16.mxu1 %v4629_v53  ;;  %v1749_v42 = vand.u32 4294901760, %v272_v55 }
  0xb3   : > { %6594 = vst [vmem:[#allocation183_spill] sm:$0xff] %v4610_v31  ;;  %6595 = vst [vmem:[#allocation184_spill] sm:$0xff] %v4612_v60  ;;  %v461_v15 = vand.u32 4294901760, %v335_v22  ;;  %v4637_v8 = vsub.f32 %v271_v29, %v1743_v1  ;;  %v177_v31 = vcombine.high %v175_v0, %v175_v0  ;;  %v4642_v32 = vsub.f32 %v273_v20, %v1747_v38 }
  0xb4   : > { %6596 = vst [vmem:[#allocation185_spill] sm:$0xff] %v4614_v7  ;;  %6597 = vst [vmem:[#allocation186_spill] sm:$0xff] %v4616_v21  ;;  %v6101_v7 = vand.u32 4294901760, %v4211_v16  ;;  %v4648_v47 = vsub.f32 %v337_v9, %v465_v37  ;;  %v4654_v29 = vsub.f32 %v272_v55, %v1749_v42  ;;  %v6117_v55 = vand.u32 4294901760, %v4215_v18 }
  0xb5   : > { %6598 = vst [vmem:[#allocation187_spill] sm:$0xff] %v4618_v14  ;;  %6599 = vst [vmem:[#allocation188_spill] sm:$0xff] %v4620_v28  ;;  %v4644_v59 = vpack.c.bf16 %v465_v37, %v461_v15  ;;  %v4646_v11 = vsub.f32 %v335_v22, %v461_v15  ;;  %v4650_v28 = vpack.c.bf16 %v1749_v42, %v1745_v26  ;;  %v6110_v22 = vand.u32 4294901760, %v4213_v17 }
  0xb6   : > { %6600 = vst [vmem:[#allocation189_spill] sm:$0xff] %v4622_v36  ;;  %6601 = vst [vmem:[#allocation190_spill] sm:$0xff] %v4624_v45  ;;  %v4640_v45 = vpack.c.bf16 %v1747_v38, %v1743_v1  ;;  %v203_v1 = vsel %vm179_vm0, %v177_v31, -inf  ;;  %v487_v20 = vsub.f32 %v4211_v16, %v6101_v7  ;;  %v187_v9 = vsel %vm179_vm0, %v177_v31, 0.0 }
  0xb7   : > { %6602 = vst [vmem:[#allocation191_spill] sm:$0xff] %v4629_v53  ;;  %6603 = vst [vmem:[#allocation192_spill] sm:$0xff] %v4631_v2  ;;  %3111 = vmatpush1.bf16.msra.mxu1 %v4644_v59  ;;  %v188_v38 = vrot.slane %v187_v9, 4  ;;  %v6118_v15 = vand.u32 4294901760, %v4219_v23  ;;  %v196_v42 = vsel %vm179_vm0, %v175_v0, -inf  ;;  %v6123_v7 = vand.u32 4294901760, %v4223_v25 }
  0xb8   : > { %6604 = vst [vmem:[#allocation193_spill] sm:$0xff] %v4633_v49  ;;  %6605 = vst [vmem:[#allocation194_spill] sm:$0xff] %v4637_v8  ;;  %v4652_v49 = vsub.f32 %v270_v24, %v1745_v26  ;;  %3493 = vmatprep.subr.bf16.mxu0 %v4640_v45  ;;  %v204_v24 = vrot.slane %v203_v1, 4  ;;  %v488_v37 = vand.u32 4294901760, %v487_v20  ;;  %v499_v26 = vsub.f32 %v4213_v17, %v6110_v22 }
  0xb9   : > { %6606 = vst [vmem:[#allocation195_spill] sm:$0xff] %v4640_v45  ;;  %6607 = vst [vmem:[#allocation196_spill] sm:$0xff] %v4642_v32  ;;  %3495 = vmatpush1.bf16.msra.mxu0 %v4650_v28  ;;  %v189_v45 = vadd.f32 %v188_v38, %v187_v9  ;;  %v1771_v31 = vsub.f32 %v4215_v18, %v6117_v55  ;;  %v197_v20 = vrot.slane %v196_v42, 4  ;;  %v6134_v17 = vand.u32 4294901760, %v4226_v27 }
  0xba   : > { %6608 = vst [vmem:[#allocation197_spill] sm:$0xff] %v4644_v59  ;;  %6609 = vst [vmem:[#allocation198_spill] sm:$0xff] %v4646_v11  ;;  %v205_v59 = vmax.f32 %v203_v1, %v204_v24  ;;  %v500_v53 = vand.u32 4294901760, %v499_v26  ;;  %v493_v22 = vsub.f32 %v4223_v25, %v6123_v7  ;;  %v180_v18 = vsel %vm179_vm0, %v175_v0, 0.0 }
  0xbb   : > { %6610 = vst [vmem:[#allocation199_spill] sm:$0xff] %v4648_v47  ;;  %6611 = vst [vmem:[#allocation200_spill] sm:$0xff] %v4650_v28  ;;  %v1783_v28 = vsub.f32 %v4219_v23, %v6118_v15  ;;  %v1772_v1 = vand.u32 4294901760, %v1771_v31  ;;  %v198_v38 = vmax.f32 %v196_v42, %v197_v20  ;;  %v505_v55 = vsub.f32 %v4226_v27, %v6134_v17 }
  0xbc   : > { %6612 = vst [vmem:[#allocation201_spill] sm:$0xff] %v4652_v49  ;;  %6613 = vst [vmem:[#allocation202_spill] sm:$0xff] %v4654_v29  ;;  %v206_v16 = vrot.slane %v205_v59, 2  ;;  %v190_v29 = vrot.slane %v189_v45, 2  ;;  %v3112_v24 = vpack.c.bf16 %v500_v53, %v488_v37  ;;  %v494_v49 = vand.u32 4294901760, %v493_v22 }
  0xbd   : > { %v1784_v9 = vand.u32 4294901760, %v1783_v28  ;;  %v199_v7 = vrot.slane %v198_v38, 2  ;;  %v506_v25 = vand.u32 4294901760, %v505_v55  ;;  %v181_v47 = vrot.slane %v180_v18, 4 }
  0xbe   : > { %v207_v15 = vmax.f32 %v205_v59, %v206_v16  ;;  %v191_v26 = vadd.f32 %v190_v29, %v189_v45  ;;  %3113 = vmatprep.subr.bf16.mxu1 %v3112_v24  ;;  %v6130_v11 = vand.u32 4294901760, %v4232_v39  ;;  %v6128_v53 = vand.u32 4294901760, %v4234_v40 }
  0xbf   : > { %v3496_v23 = vpack.c.bf16 %v1784_v9, %v1772_v1  ;;  %v6133_v22 = vand.u32 4294901760, %v4236_v41  ;;  %v200_v37 = vmax.f32 %v198_v38, %v199_v7  ;;  %v4689_v42 = vpack.c.bf16 %v506_v25, %v494_v49 }
  0xc0   : > { %v208_v31 = vrot.slane %v207_v15, 1  ;;  %v192_v28 = vrot.slane %v191_v26, 1  ;;  %v182_v16 = vadd.f32 %v181_v47, %v180_v18  ;;  %v1777_v45 = vsub.f32 %v4232_v39, %v6130_v11 }
  0xc1   : > { %3497 = vmatprep.subr.bf16.mxu0 %v3496_v23  ;;  %v1789_v29 = vsub.f32 %v4234_v40, %v6128_v53  ;;  %v511_v23 = vsub.f32 %v4236_v41, %v6133_v22  ;;  %v201_v55 = vrot.slane %v200_v37, 1  ;;  %v6131_v25 = vand.u32 4294901760, %v4240_v46 }
  0xc2   : > { %v209_v0 = vmax.f32 %v207_v15, %v208_v31  ;;  %v193_v59 = vadd.f32 %v192_v28, %v191_v26  ;;  %v183_v20 = vrot.slane %v182_v16, 2  ;;  %v1778_v7 = vand.u32 4294901760, %v1777_v45 }
  0xc3   : > { %v1790_v47 = vand.u32 4294901760, %v1789_v29  ;;  %v512_v1 = vand.u32 4294901760, %v511_v23  ;;  %v202_v15 = vmax.f32 %v200_v37, %v201_v55  ;;  %v523_v24 = vsub.f32 %v4240_v46, %v6131_v25 }
  0xc4   : > { %v4701_v18 = vand.u32 4294901760, %v209_v0  ;;  %v195_v49 = vmul.f32 0.25, %v193_v59  ;;  %v184_v9 = vadd.f32 %v183_v20, %v182_v16  ;;  %v6129_v38 = vand.u32 4294901760, %v4244_v48 }
  0xc5   : > { %v4712_v28 = vpack.c.bf16 %v1790_v47, %v1778_v7  ;;  %v6132_v45 = vand.u32 4294901760, %v4247_v50  ;;  %v4715_v59 = vand.u32 4294901760, %v202_v15  ;;  %v524_v37 = vand.u32 4294901760, %v523_v24 }
  0xc6   : > { %6614 = vst [vmem:[#allocation203_spill] sm:$0xff] %v4701_v18  ;;  %v4708_v26 = vsub.f32 %v209_v0, %v4701_v18  ;;  %v4710_v31 = vand.u32 4294901760, %v195_v49  ;;  %v185_v29 = vrot.slane %v184_v9, 1  ;;  %v1795_v16 = vsub.f32 %v4244_v48, %v6129_v38 }
  0xc7   : > { %6617 = vst [vmem:[#allocation206_spill] sm:$0xff] %v4715_v59  ;;  %v1807_v0 = vsub.f32 %v4247_v50, %v6132_v45  ;;  %v6135_v20 = vand.u32 4294901760, %v4249_v52  ;;  %v4729_v7 = vsub.f32 %v202_v15, %v4715_v59  ;;  %v3116_v24 = vpack.c.bf16 %v524_v37, %v512_v1 }
  0xc8   : > { %6615 = vst [vmem:[#allocation204_spill] sm:$0xff] %v4708_v26  ;;  %6616 = vst [vmem:[#allocation205_spill] sm:$0xff] %v4710_v31  ;;  %v6138_v23 = vand.u32 4294901760, %v4708_v26  ;;  %v4722_v55 = vsub.f32 %v195_v49, %v4710_v31  ;;  %v186_v47 = vadd.f32 %v185_v29, %v184_v9  ;;  %v1796_v53 = vand.u32 4294901760, %v1795_v16 }
  0xc9   : > { %6619 = vst [vmem:[#allocation208_spill] sm:$0xff] %v4729_v7  ;;  %v1808_v49 = vand.u32 4294901760, %v1807_v0  ;;  %v517_v25 = vsub.f32 %v4249_v52, %v6135_v20  ;;  %v6137_v45 = vand.u32 4294901760, %v4729_v7  ;;  %v6141_v15 = vand.u32 4294901760, %v4255_v61 }
  0xca   : > { %6618 = vst [vmem:[#allocation207_spill] sm:$0xff] %v4722_v55  ;;  %v470_v38 = vsub.f32 %v4708_v26, %v6138_v23  ;;  %v6136_v11 = vand.u32 4294901760, %v4722_v55  ;;  %v194_v22 = vmul.f32 0.25, %v186_v47  ;;  %v6143_v9 = vand.u32 4294901760, %v4257_v62 }
  0xcb   : > { %v3500_v37 = vpack.c.bf16 %v1808_v49, %v1796_v53  ;;  %v518_v16 = vand.u32 4294901760, %v517_v25  ;;  %v476_v0 = vsub.f32 %v4729_v7, %v6137_v45  ;;  %v529_v47 = vsub.f32 %v4255_v61, %v6141_v15 }
  0xcc   : > { %v471_v1 = vand.u32 4294901760, %v470_v38  ;;  %v1754_v29 = vsub.f32 %v4722_v55, %v6136_v11  ;;  %v4747_v17 = vand.u32 4294901760, %v194_v22  ;;  %v1801_v38 = vsub.f32 %v4257_v62, %v6143_v9 }
  0xcd   : > { %v6142_v11 = vand.u32 4294901760, %v4261_v4  ;;  %v6146_v53 = vand.u32 4294901760, %v4265_v6  ;;  %v6148_v25 = vand.u32 4294901760, %v4268_v10  ;;  %v477_v49 = vand.u32 4294901760, %v476_v0 }
  0xce   : > { %6620 = vst [vmem:[#allocation209_spill] sm:$0xff] %v4747_v17  ;;  %472 = vmatprep.mubr.f32.mxu1 %v471_v1  ;;  %v1755_v20 = vand.u32 4294901760, %v1754_v29  ;;  %v4759_v45 = vsub.f32 %v194_v22, %v4747_v17  ;;  %v530_v23 = vand.u32 4294901760, %v529_v47  ;;  %v1802_v7 = vand.u32 4294901760, %v1801_v38 }
  0xcf   : > { %v1813_v15 = vsub.f32 %v4261_v4, %v6142_v11  ;;  %v535_v1 = vsub.f32 %v4265_v6, %v6146_v53  ;;  %v547_v29 = vsub.f32 %v4268_v10, %v6148_v25  ;;  %v6147_v0 = vand.u32 4294901760, %v4272_v12  ;;  %478 = vmatmul.mubr.f32.vlgmr.msra.gmra.mrb[0].mxu1 %v477_v49 }
  0xd0   : > { %6621 = vst [vmem:[#allocation210_spill] sm:$0xff] %v4759_v45  ;;  %1756 = vmatprep.mubr.f32.mxu0 %v1755_v20  ;;  %v6168_v22 = vand.u32 4294901760, %v4759_v45  ;;  %v3118_v47 = vpack.c.bf16 %v530_v23, %v518_v16  ;;  %v6153_v20 = vand.u32 4294901760, %v4274_v13  ;;  %v6154_v38 = vand.u32 4294901760, %v4281_v33  ;;  %3115 = vmatpush1.bf16.msra.mxu1 %v4689_v42 }
  0xd1   : > { %v1814_v11 = vand.u32 4294901760, %v1813_v15  ;;  %v536_v9 = vand.u32 4294901760, %v535_v1  ;;  %v548_v55 = vand.u32 4294901760, %v547_v29  ;;  %v1819_v53 = vsub.f32 %v4272_v12, %v6147_v0  ;;  %869 = vmatprep.mubr.f32.mxu1 %v4701_v18  ;;  %3117 = vmatprep.subr.bf16.mxu1 %v3116_v24 }
  0xd2   : > { %v1760_v49 = vsub.f32 %v4759_v45, %v6168_v22  ;;  %v1831_v23 = vsub.f32 %v4274_v13, %v6153_v20  ;;  %v541_v42 = vsub.f32 %v4281_v33, %v6154_v38  ;;  %v6167_v15 = vand.u32 4294901760, %v4283_v34 }
  0xd3   : > { %v3502_v16 = vpack.c.bf16 %v1814_v11, %v1802_v7  ;;  %v3120_v1 = vpack.c.bf16 %v548_v55, %v536_v9  ;;  %v1820_v29 = vand.u32 4294901760, %v1819_v53  ;;  %v6156_v0 = vand.u32 4294901760, %v4287_v43 }
  0xd4   : > { %v1761_v25 = vand.u32 4294901760, %v1760_v49  ;;  %v1832_v18 = vand.u32 4294901760, %v1831_v23  ;;  %v542_v26 = vand.u32 4294901760, %v541_v42  ;;  %v553_v24 = vsub.f32 %v4283_v34, %v6167_v15  ;;  %3119 = vmatpush1.bf16.msra.mxu1 %v3118_v47  ;;  %v6626_v15 = vld [vmem:[#allocation69_spill] sm:$0xff] }
  0xd5   : > { %v1825_v20 = vsub.f32 %v4287_v43, %v6156_v0  ;;  %v6155_v38 = vand.u32 4294901760, %v4289_v44  ;;  %v6158_v11 = vand.u32 4294901760, %v4293_v51  ;;  %v6157_v55 = vand.u32 4294901760, %v4297_v56  ;;  %3121 = vmatprep.subr.bf16.mxu1 %v3120_v1 }
  0xd6   : > { %1762 = vmatmul.mubr.f32.vlgmr.msra.gmra.mrb[0].mxu0 %v1761_v25  ;;  %v3504_v7 = vpack.c.bf16 %v1832_v18, %v1820_v29  ;;  %v554_v9 = vand.u32 4294901760, %v553_v24  ;;  %v6159_v53 = vand.u32 4294901760, %v4301_v58  ;;  %v6165_v49 = vand.u32 4294901760, %v4304_v63 }
  0xd7   : > { %3499 = vmatpush1.bf16.msra.mxu0 %v4712_v28  ;;  %v1826_v47 = vand.u32 4294901760, %v1825_v20  ;;  %v1837_v23 = vsub.f32 %v4289_v44, %v6155_v38  ;;  %v559_v42 = vsub.f32 %v4293_v51, %v6158_v11  ;;  %v571_v18 = vsub.f32 %v4297_v56, %v6157_v55  ;;  %2153 = vmatprep.mubr.f32.mxu0 %v4710_v31 }
  0xd8   : > { %3501 = vmatprep.subr.bf16.mxu0 %v3500_v37  ;;  %v3122_v25 = vpack.c.bf16 %v554_v9, %v542_v26  ;;  %v1843_v28 = vsub.f32 %v4301_v58, %v6159_v53  ;;  %v1855_v20 = vsub.f32 %v4304_v63, %v6165_v49  ;;  %v6160_v1 = vand.u32 4294901760, %v4307_v19 }
  0xd9   : > { %v1838_v29 = vand.u32 4294901760, %v1837_v23  ;;  %v560_v24 = vand.u32 4294901760, %v559_v42  ;;  %v572_v38 = vand.u32 4294901760, %v571_v18  ;;  %v6163_v0 = vand.u32 4294901760, %v4311_v35 }
  0xda   : > { %3123 = vmatpush1.bf16.msra.mxu1 %v3122_v25  ;;  %v1844_v55 = vand.u32 4294901760, %v1843_v28  ;;  %v1856_v11 = vand.u32 4294901760, %v1855_v20  ;;  %v565_v26 = vsub.f32 %v4307_v19, %v6160_v1  ;;  %v6161_v37 = vand.u32 4294901760, %v4315_v30 }
  0xdb   : > { %3503 = vmatpush1.bf16.msra.mxu0 %v3502_v16  ;;  %v3506_v9 = vpack.c.bf16 %v1838_v29, %v1826_v47  ;;  %v3124_v53 = vpack.c.bf16 %v572_v38, %v560_v24  ;;  %v577_v23 = vsub.f32 %v4311_v35, %v6163_v0  ;;  %v6162_v42 = vand.u32 4294901760, %v4317_v57  ;;  %v6622_v47 = vld [vmem:[#allocation62_spill] sm:$0xff] }
  0xdc   : > { %3505 = vmatprep.subr.bf16.mxu0 %v3504_v7  ;;  %v3508_v18 = vpack.c.bf16 %v1856_v11, %v1844_v55  ;;  %v566_v25 = vand.u32 4294901760, %v565_v26  ;;  %v1849_v28 = vsub.f32 %v4315_v30, %v6161_v37  ;;  %v6164_v20 = vand.u32 4294901760, %v4321_v3  ;;  %v6623_v55 = vld [vmem:[#allocation64_spill] sm:$0xff]  ;;  %v6624_v26 = vld [vmem:[#allocation66_spill] sm:$0xff]  ;;  %v6665_v30 = vld [vmem:[#allocation127_spill] sm:$0xff] }
  0xdd   : > { %3125 = vmatprep.subr.bf16.mxu1 %v3124_v53  ;;  %v578_v1 = vand.u32 4294901760, %v577_v23  ;;  %v1861_v38 = vsub.f32 %v4317_v57, %v6162_v42  ;;  %v6166_v16 = vand.u32 4294901760, %v4323_v5  ;;  %v6171_v29 = vand.u32 4294901760, %v6622_v47 }
  0xde   : > { %v1850_v24 = vand.u32 4294901760, %v1849_v28  ;;  %v583_v11 = vsub.f32 %v4321_v3, %v6164_v20  ;;  %v6172_v7 = vand.u32 4294901760, %v6623_v55  ;;  %v6175_v37 = vand.u32 4294901760, %v6624_v26 }
  0xdf   : > { %3507 = vmatpush1.bf16.msra.mxu0 %v3506_v9  ;;  %v3126_v53 = vpack.c.bf16 %v578_v1, %v566_v25  ;;  %v1862_v23 = vand.u32 4294901760, %v1861_v38  ;;  %v595_v42 = vsub.f32 %v4323_v5, %v6166_v16  ;;  %v1867_v0 = vsub.f32 %v6622_v47, %v6171_v29  ;;  %v6625_v1 = vld [vmem:[#allocation67_spill] sm:$0xff] }
  0xe0   : > { %3509 = vmatprep.subr.bf16.mxu0 %v3508_v18  ;;  %v584_v28 = vand.u32 4294901760, %v583_v11  ;;  %v1879_v20 = vsub.f32 %v6623_v55, %v6172_v7  ;;  %v589_v9 = vsub.f32 %v6624_v26, %v6175_v37  ;;  %v6177_v25 = vand.u32 4294901760, %v6625_v1  ;;  %v6627_v11 = vld [vmem:[#allocation70_spill] sm:$0xff] }
  0xe1   : > { %3127 = vmatpush1.bf16.msra.mxu1 %v3126_v53  ;;  %v3510_v38 = vpack.c.bf16 %v1862_v23, %v1850_v24  ;;  %v596_v49 = vand.u32 4294901760, %v595_v42  ;;  %v1868_v16 = vand.u32 4294901760, %v1867_v0  ;;  %v6179_v22 = vand.u32 4294901760, %v6626_v15  ;;  %v6628_v53 = vld [vmem:[#allocation72_spill] sm:$0xff]  ;;  %v6629_v42 = vld [vmem:[#allocation73_spill] sm:$0xff] }
  0xe2   : > { %v1880_v31 = vand.u32 4294901760, %v1879_v20  ;;  %v590_v29 = vand.u32 4294901760, %v589_v9  ;;  %v601_v18 = vsub.f32 %v6625_v1, %v6177_v25  ;;  %v6180_v7 = vand.u32 4294901760, %v6627_v11  ;;  %v6630_v9 = vld [vmem:[#allocation74_spill] sm:$0xff] }
  0xe3   : > { %3511 = vmatpush1.bf16.msra.mxu0 %v3510_v38  ;;  %v3128_v45 = vpack.c.bf16 %v596_v49, %v584_v28  ;;  %v1873_v37 = vsub.f32 %v6626_v15, %v6179_v22  ;;  %v6182_v24 = vand.u32 4294901760, %v6628_v53  ;;  %v6185_v0 = vand.u32 4294901760, %v6629_v42  ;;  %v6631_v38 = vld [vmem:[#allocation76_spill] sm:$0xff]  ;;  %v6633_v15 = vld [vmem:[#allocation79_spill] sm:$0xff] }
  0xe4   : > { %v3512_v23 = vpack.c.bf16 %v1880_v31, %v1868_v16  ;;  %v602_v26 = vand.u32 4294901760, %v601_v18  ;;  %v1885_v20 = vsub.f32 %v6627_v11, %v6180_v7  ;;  %v6187_v25 = vand.u32 4294901760, %v6630_v9  ;;  %v6632_v7 = vld [vmem:[#allocation78_spill] sm:$0xff] }
  0xe5   : > { %3129 = vmatprep.subr.bf16.mxu1 %v3128_v45  ;;  %v1874_v1 = vand.u32 4294901760, %v1873_v37  ;;  %v607_v49 = vsub.f32 %v6628_v53, %v6182_v24  ;;  %v619_v28 = vsub.f32 %v6629_v42, %v6185_v0  ;;  %v6189_v22 = vand.u32 4294901760, %v6631_v38 }
  0xe6   : > { %3513 = vmatprep.subr.bf16.mxu0 %v3512_v23  ;;  %v3130_v31 = vpack.c.bf16 %v602_v26, %v590_v29  ;;  %v1886_v16 = vand.u32 4294901760, %v1885_v20  ;;  %v1891_v18 = vsub.f32 %v6630_v9, %v6187_v25  ;;  %v6190_v45 = vand.u32 4294901760, %v6632_v7  ;;  %v6634_v26 = vld [vmem:[#allocation81_spill] sm:$0xff] }
  0xe7   : > { %v608_v37 = vand.u32 4294901760, %v607_v49  ;;  %v620_v11 = vand.u32 4294901760, %v619_v28  ;;  %v1903_v24 = vsub.f32 %v6631_v38, %v6189_v22  ;;  %v6192_v53 = vand.u32 4294901760, %v6633_v15  ;;  %v6635_v28 = vld [vmem:[#allocation82_spill] sm:$0xff] }
  0xe8   : > { %3131 = vmatpush1.bf16.msra.mxu1 %v3130_v31  ;;  %v3514_v0 = vpack.c.bf16 %v1886_v16, %v1874_v1  ;;  %v1892_v42 = vand.u32 4294901760, %v1891_v18  ;;  %v613_v29 = vsub.f32 %v6632_v7, %v6190_v45  ;;  %v6194_v23 = vand.u32 4294901760, %v6634_v26  ;;  %v6636_v31 = vld [vmem:[#allocation84_spill] sm:$0xff]  ;;  %v6637_v18 = vld [vmem:[#allocation85_spill] sm:$0xff] }
  0xe9   : > { %v3132_v20 = vpack.c.bf16 %v620_v11, %v608_v37  ;;  %v1904_v25 = vand.u32 4294901760, %v1903_v24  ;;  %v625_v49 = vsub.f32 %v6633_v15, %v6192_v53  ;;  %v6196_v9 = vand.u32 4294901760, %v6635_v28  ;;  %v6638_v37 = vld [vmem:[#allocation86_spill] sm:$0xff] }
  0xea   : > { %3515 = vmatpush1.bf16.msra.mxu0 %v3514_v0  ;;  %v614_v22 = vand.u32 4294901760, %v613_v29  ;;  %v1897_v1 = vsub.f32 %v6634_v26, %v6194_v23  ;;  %v6198_v16 = vand.u32 4294901760, %v6636_v31  ;;  %v6201_v45 = vand.u32 4294901760, %v6637_v18  ;;  %v6639_v23 = vld [vmem:[#allocation88_spill] sm:$0xff] }
  0xeb   : > { %3133 = vmatprep.subr.bf16.mxu1 %v3132_v20  ;;  %v3516_v7 = vpack.c.bf16 %v1904_v25, %v1892_v42  ;;  %v626_v11 = vand.u32 4294901760, %v625_v49  ;;  %v1909_v24 = vsub.f32 %v6635_v28, %v6196_v9  ;;  %v6203_v53 = vand.u32 4294901760, %v6638_v37  ;;  %v6640_v49 = vld [vmem:[#allocation90_spill] sm:$0xff] }
  0xec   : > { %v1898_v15 = vand.u32 4294901760, %v1897_v1  ;;  %v631_v0 = vsub.f32 %v6636_v31, %v6198_v16  ;;  %v643_v29 = vsub.f32 %v6637_v18, %v6201_v45  ;;  %v6205_v26 = vand.u32 4294901760, %v6639_v23  ;;  %v6641_v31 = vld [vmem:[#allocation91_spill] sm:$0xff] }
  0xed   : > { %3517 = vmatprep.subr.bf16.mxu0 %v3516_v7  ;;  %v3134_v25 = vpack.c.bf16 %v626_v11, %v614_v22  ;;  %v1910_v42 = vand.u32 4294901760, %v1909_v24  ;;  %v1915_v20 = vsub.f32 %v6638_v37, %v6203_v53  ;;  %v6206_v9 = vand.u32 4294901760, %v6640_v49  ;;  %v6642_v7 = vld [vmem:[#allocation93_spill] sm:$0xff] }
  0xee   : > { %v632_v1 = vand.u32 4294901760, %v631_v0  ;;  %v644_v28 = vand.u32 4294901760, %v643_v29  ;;  %v1927_v16 = vsub.f32 %v6639_v23, %v6205_v26  ;;  %v6208_v38 = vand.u32 4294901760, %v6641_v31  ;;  %v6643_v29 = vld [vmem:[#allocation94_spill] sm:$0xff] }
  0xef   : > { %3135 = vmatpush1.bf16.msra.mxu1 %v3134_v25  ;;  %v3518_v45 = vpack.c.bf16 %v1910_v42, %v1898_v15  ;;  %v1916_v18 = vand.u32 4294901760, %v1915_v20  ;;  %v637_v22 = vsub.f32 %v6640_v49, %v6206_v9  ;;  %v6210_v11 = vand.u32 4294901760, %v6642_v7  ;;  %v6644_v25 = vld [vmem:[#allocation96_spill] sm:$0xff]  ;;  %v6645_v20 = vld [vmem:[#allocation97_spill] sm:$0xff] }
  0xf0   : > { %v3136_v24 = vpack.c.bf16 %v644_v28, %v632_v1  ;;  %v1928_v53 = vand.u32 4294901760, %v1927_v16  ;;  %v649_v0 = vsub.f32 %v6641_v31, %v6208_v38  ;;  %v6212_v37 = vand.u32 4294901760, %v6643_v29  ;;  %v6646_v1 = vld [vmem:[#allocation98_spill] sm:$0xff] }
  0xf1   : > { %3519 = vmatpush1.bf16.msra.mxu0 %v3518_v45  ;;  %v638_v26 = vand.u32 4294901760, %v637_v22  ;;  %v1921_v15 = vsub.f32 %v6642_v7, %v6210_v11  ;;  %v6214_v42 = vand.u32 4294901760, %v6644_v25  ;;  %v6217_v9 = vand.u32 4294901760, %v6645_v20  ;;  %v6647_v11 = vld [vmem:[#allocation100_spill] sm:$0xff] }
  0xf2   : > { %3137 = vmatprep.subr.bf16.mxu1 %v3136_v24  ;;  %v3520_v49 = vpack.c.bf16 %v1928_v53, %v1916_v18  ;;  %v650_v28 = vand.u32 4294901760, %v649_v0  ;;  %v1933_v16 = vsub.f32 %v6643_v29, %v6212_v37  ;;  %v6219_v38 = vand.u32 4294901760, %v6646_v1  ;;  %v6648_v0 = vld [vmem:[#allocation102_spill] sm:$0xff] }
  0xf3   : > { %v1922_v31 = vand.u32 4294901760, %v1921_v15  ;;  %v655_v45 = vsub.f32 %v6644_v25, %v6214_v42  ;;  %v667_v22 = vsub.f32 %v6645_v20, %v6217_v9  ;;  %v6221_v7 = vand.u32 4294901760, %v6647_v11  ;;  %v6649_v25 = vld [vmem:[#allocation103_spill] sm:$0xff] }
  0xf4   : > { %3521 = vmatprep.subr.bf16.mxu0 %v3520_v49  ;;  %v3138_v53 = vpack.c.bf16 %v650_v28, %v638_v26  ;;  %v1934_v18 = vand.u32 4294901760, %v1933_v16  ;;  %v1939_v24 = vsub.f32 %v6646_v1, %v6219_v38  ;;  %v6222_v37 = vand.u32 4294901760, %v6648_v0  ;;  %v6650_v49 = vld [vmem:[#allocation105_spill] sm:$0xff] }
  0xf5   : > { %v656_v15 = vand.u32 4294901760, %v655_v45  ;;  %v668_v29 = vand.u32 4294901760, %v667_v22  ;;  %v1951_v42 = vsub.f32 %v6647_v11, %v6221_v7  ;;  %v6224_v23 = vand.u32 4294901760, %v6649_v25  ;;  %v6651_v22 = vld [vmem:[#allocation106_spill] sm:$0xff] }
  0xf6   : > { %3139 = vmatpush1.bf16.msra.mxu1 %v3138_v53  ;;  %v3522_v9 = vpack.c.bf16 %v1934_v18, %v1922_v31  ;;  %v1940_v20 = vand.u32 4294901760, %v1939_v24  ;;  %v661_v26 = vsub.f32 %v6648_v0, %v6222_v37  ;;  %v6226_v28 = vand.u32 4294901760, %v6650_v49  ;;  %v6652_v53 = vld [vmem:[#allocation108_spill] sm:$0xff]  ;;  %v6653_v24 = vld [vmem:[#allocation109_spill] sm:$0xff] }
  0xf7   : > { %v3140_v16 = vpack.c.bf16 %v668_v29, %v656_v15  ;;  %v1952_v38 = vand.u32 4294901760, %v1951_v42  ;;  %v673_v45 = vsub.f32 %v6649_v25, %v6224_v23  ;;  %v6228_v1 = vand.u32 4294901760, %v6651_v22  ;;  %v6654_v15 = vld [vmem:[#allocation110_spill] sm:$0xff] }
  0xf8   : > { %3523 = vmatpush1.bf16.msra.mxu0 %v3522_v9  ;;  %v662_v7 = vand.u32 4294901760, %v661_v26  ;;  %v1945_v31 = vsub.f32 %v6650_v49, %v6226_v28  ;;  %v6230_v18 = vand.u32 4294901760, %v6652_v53  ;;  %v6233_v37 = vand.u32 4294901760, %v6653_v24  ;;  %v6655_v28 = vld [vmem:[#allocation112_spill] sm:$0xff] }
  0xf9   : > { %3141 = vmatprep.subr.bf16.mxu1 %v3140_v16  ;;  %v3524_v0 = vpack.c.bf16 %v1952_v38, %v1940_v20  ;;  %v674_v29 = vand.u32 4294901760, %v673_v45  ;;  %v1957_v42 = vsub.f32 %v6651_v22, %v6228_v1  ;;  %v6235_v23 = vand.u32 4294901760, %v6654_v15  ;;  %v6656_v45 = vld [vmem:[#allocation114_spill] sm:$0xff] }
  0xfa   : > { %v1946_v25 = vand.u32 4294901760, %v1945_v31  ;;  %v679_v9 = vsub.f32 %v6652_v53, %v6230_v18  ;;  %v691_v26 = vsub.f32 %v6653_v24, %v6233_v37  ;;  %v6237_v49 = vand.u32 4294901760, %v6655_v28  ;;  %v6657_v53 = vld [vmem:[#allocation115_spill] sm:$0xff] }
  0xfb   : > { %3525 = vmatprep.subr.bf16.mxu0 %v3524_v0  ;;  %v3142_v38 = vpack.c.bf16 %v674_v29, %v662_v7  ;;  %v1958_v20 = vand.u32 4294901760, %v1957_v42  ;;  %v1963_v16 = vsub.f32 %v6654_v15, %v6235_v23  ;;  %v6238_v1 = vand.u32 4294901760, %v6656_v45  ;;  %v6658_v0 = vld [vmem:[#allocation117_spill] sm:$0xff] }
  0xfc   : > { %v680_v31 = vand.u32 4294901760, %v679_v9  ;;  %v692_v22 = vand.u32 4294901760, %v691_v26  ;;  %v1975_v18 = vsub.f32 %v6655_v28, %v6237_v49  ;;  %v6240_v11 = vand.u32 4294901760, %v6657_v53  ;;  %v6659_v26 = vld [vmem:[#allocation118_spill] sm:$0xff] }
  0xfd   : > { %3143 = vmatpush1.bf16.msra.mxu1 %v3142_v38  ;;  %v3526_v37 = vpack.c.bf16 %v1958_v20, %v1946_v25  ;;  %v1964_v24 = vand.u32 4294901760, %v1963_v16  ;;  %v685_v7 = vsub.f32 %v6656_v45, %v6238_v1  ;;  %v6242_v29 = vand.u32 4294901760, %v6658_v0  ;;  %v6660_v38 = vld [vmem:[#allocation120_spill] sm:$0xff]  ;;  %v6661_v16 = vld [vmem:[#allocation121_spill] sm:$0xff] }
  0xfe   : > { %v3144_v42 = vpack.c.bf16 %v692_v22, %v680_v31  ;;  %v1976_v23 = vand.u32 4294901760, %v1975_v18  ;;  %v697_v9 = vsub.f32 %v6657_v53, %v6240_v11  ;;  %v6244_v15 = vand.u32 4294901760, %v6659_v26  ;;  %v6662_v31 = vld [vmem:[#allocation122_spill] sm:$0xff] }
  0xff   : > { %3527 = vmatpush1.bf16.msra.mxu0 %v3526_v37  ;;  %v686_v49 = vand.u32 4294901760, %v685_v7  ;;  %v1969_v25 = vsub.f32 %v6658_v0, %v6242_v29  ;;  %v6247_v20 = vand.u32 4294901760, %v6660_v38  ;;  %v6251_v1 = vand.u32 4294901760, %v6661_v16  ;;  %v6663_v29 = vld [vmem:[#allocation124_spill] sm:$0xff] }
 0x100   : > { %3145 = vmatprep.subr.bf16.mxu1 %v3144_v42  ;;  %v3528_v28 = vpack.c.bf16 %v1976_v23, %v1964_v24  ;;  %v698_v22 = vand.u32 4294901760, %v697_v9  ;;  %v1981_v18 = vsub.f32 %v6659_v26, %v6244_v15  ;;  %v6253_v11 = vand.u32 4294901760, %v6662_v31  ;;  %v6664_v9 = vld [vmem:[#allocation126_spill] sm:$0xff] }
 0x101   : > { %v1970_v55 = vand.u32 4294901760, %v1969_v25  ;;  %v703_v37 = vsub.f32 %v6660_v38, %v6247_v20  ;;  %v715_v7 = vsub.f32 %v6661_v16, %v6251_v1  ;;  %v6255_v47 = vand.u32 4294901760, %v6663_v29 }
 0x102   : > { %3529 = vmatprep.subr.bf16.mxu0 %v3528_v28  ;;  %v3146_v23 = vpack.c.bf16 %v698_v22, %v686_v49  ;;  %v1982_v24 = vand.u32 4294901760, %v1981_v18  ;;  %v1987_v42 = vsub.f32 %v6662_v31, %v6253_v11  ;;  %v6256_v15 = vand.u32 4294901760, %v6664_v9  ;;  %v6666_v28 = vld [vmem:[#allocation129_spill] sm:$0xff] }
 0x103   : > { %v704_v25 = vand.u32 4294901760, %v703_v37  ;;  %v716_v57 = vand.u32 4294901760, %v715_v7  ;;  %v1999_v20 = vsub.f32 %v6663_v29, %v6255_v47  ;;  %v6258_v38 = vand.u32 4294901760, %v6665_v30  ;;  %v6667_v7 = vld [vmem:[#allocation130_spill] sm:$0xff] }
 0x104   : > { %3147 = vmatpush1.bf16.msra.mxu1 %v3146_v23  ;;  %v3530_v1 = vpack.c.bf16 %v1982_v24, %v1970_v55  ;;  %v1988_v16 = vand.u32 4294901760, %v1987_v42  ;;  %v709_v49 = vsub.f32 %v6664_v9, %v6256_v15  ;;  %v6260_v22 = vand.u32 4294901760, %v6666_v28  ;;  %v6668_v23 = vld [vmem:[#allocation132_spill] sm:$0xff]  ;;  %v6669_v42 = vld [vmem:[#allocation133_spill] sm:$0xff] }
 0x105   : > { %v3148_v18 = vpack.c.bf16 %v716_v57, %v704_v25  ;;  %v2000_v11 = vand.u32 4294901760, %v1999_v20  ;;  %v721_v37 = vsub.f32 %v6665_v30, %v6258_v38  ;;  %v6262_v31 = vand.u32 4294901760, %v6667_v7  ;;  %v6670_v25 = vld [vmem:[#allocation134_spill] sm:$0xff] }
 0x106   : > { %3531 = vmatpush1.bf16.msra.mxu0 %v3530_v1  ;;  %v710_v47 = vand.u32 4294901760, %v709_v49  ;;  %v1993_v55 = vsub.f32 %v6666_v28, %v6260_v22  ;;  %v6264_v24 = vand.u32 4294901760, %v6668_v23  ;;  %v6267_v15 = vand.u32 4294901760, %v6669_v42  ;;  %v6671_v22 = vld [vmem:[#allocation136_spill] sm:$0xff] }
 0x107   : > { %3149 = vmatprep.subr.bf16.mxu1 %v3148_v18  ;;  %v3532_v9 = vpack.c.bf16 %v2000_v11, %v1988_v16  ;;  %v722_v57 = vand.u32 4294901760, %v721_v37  ;;  %v2005_v20 = vsub.f32 %v6667_v7, %v6262_v31  ;;  %v6269_v38 = vand.u32 4294901760, %v6670_v25  ;;  %v6672_v37 = vld [vmem:[#allocation138_spill] sm:$0xff] }
 0x108   : > { %v1994_v30 = vand.u32 4294901760, %v1993_v55  ;;  %v727_v1 = vsub.f32 %v6668_v23, %v6264_v24  ;;  %v739_v49 = vsub.f32 %v6669_v42, %v6267_v15  ;;  %v6271_v28 = vand.u32 4294901760, %v6671_v22  ;;  %v6673_v23 = vld [vmem:[#allocation139_spill] sm:$0xff] }
 0x109   : > { %3533 = vmatprep.subr.bf16.mxu0 %v3532_v9  ;;  %v3150_v11 = vpack.c.bf16 %v722_v57, %v710_v47  ;;  %v2006_v16 = vand.u32 4294901760, %v2005_v20  ;;  %v2011_v18 = vsub.f32 %v6670_v25, %v6269_v38  ;;  %v6272_v31 = vand.u32 4294901760, %v6672_v37  ;;  %v6674_v9 = vld [vmem:[#allocation141_spill] sm:$0xff] }
 0x10a   : > { %v728_v55 = vand.u32 4294901760, %v727_v1  ;;  %v740_v7 = vand.u32 4294901760, %v739_v49  ;;  %v2023_v24 = vsub.f32 %v6671_v22, %v6271_v28  ;;  %v6274_v29 = vand.u32 4294901760, %v6673_v23  ;;  %v6675_v49 = vld [vmem:[#allocation142_spill] sm:$0xff] }
 0x10b   : > { %3151 = vmatpush1.bf16.msra.mxu1 %v3150_v11  ;;  %v3534_v15 = vpack.c.bf16 %v2006_v16, %v1994_v30  ;;  %v2012_v42 = vand.u32 4294901760, %v2011_v18  ;;  %v733_v47 = vsub.f32 %v6672_v37, %v6272_v31  ;;  %v6276_v57 = vand.u32 4294901760, %v6674_v9  ;;  %v6676_v11 = vld [vmem:[#allocation144_spill] sm:$0xff]  ;;  %v6677_v18 = vld [vmem:[#allocation145_spill] sm:$0xff] }
 0x10c   : > { %v3152_v20 = vpack.c.bf16 %v740_v7, %v728_v55  ;;  %v2024_v38 = vand.u32 4294901760, %v2023_v24  ;;  %v745_v1 = vsub.f32 %v6673_v23, %v6274_v29  ;;  %v6278_v25 = vand.u32 4294901760, %v6675_v49  ;;  %v6678_v55 = vld [vmem:[#allocation146_spill] sm:$0xff] }
 0x10d   : > { %3535 = vmatpush1.bf16.msra.mxu0 %v3534_v15  ;;  %v734_v28 = vand.u32 4294901760, %v733_v47  ;;  %v2017_v30 = vsub.f32 %v6674_v9, %v6276_v57  ;;  %v6280_v16 = vand.u32 4294901760, %v6676_v11  ;;  %v6283_v31 = vand.u32 4294901760, %v6677_v18  ;;  %v6679_v57 = vld [vmem:[#allocation148_spill] sm:$0xff] }
 0x10e   : > { %3153 = vmatprep.subr.bf16.mxu1 %v3152_v20  ;;  %v3536_v37 = vpack.c.bf16 %v2024_v38, %v2012_v42  ;;  %v746_v7 = vand.u32 4294901760, %v745_v1  ;;  %v2029_v24 = vsub.f32 %v6675_v49, %v6278_v25  ;;  %v6285_v29 = vand.u32 4294901760, %v6678_v55  ;;  %v6680_v1 = vld [vmem:[#allocation150_spill] sm:$0xff] }
 0x10f   : > { %v2018_v23 = vand.u32 4294901760, %v2017_v30  ;;  %v751_v15 = vsub.f32 %v6676_v11, %v6280_v16  ;;  %v763_v47 = vsub.f32 %v6677_v18, %v6283_v31  ;;  %v6287_v9 = vand.u32 4294901760, %v6679_v57  ;;  %v6681_v11 = vld [vmem:[#allocation151_spill] sm:$0xff] }
 0x110   : > { %3537 = vmatprep.subr.bf16.mxu0 %v3536_v37  ;;  %v3154_v38 = vpack.c.bf16 %v746_v7, %v734_v28  ;;  %v2030_v42 = vand.u32 4294901760, %v2029_v24  ;;  %v2035_v20 = vsub.f32 %v6678_v55, %v6285_v29  ;;  %v6288_v25 = vand.u32 4294901760, %v6680_v1  ;;  %v6682_v37 = vld [vmem:[#allocation153_spill] sm:$0xff] }
 0x111   : > { %v752_v30 = vand.u32 4294901760, %v751_v15  ;;  %v764_v49 = vand.u32 4294901760, %v763_v47  ;;  %v2047_v16 = vsub.f32 %v6679_v57, %v6287_v9  ;;  %v6290_v22 = vand.u32 4294901760, %v6681_v11  ;;  %v6683_v47 = vld [vmem:[#allocation154_spill] sm:$0xff] }
 0x112   : > { %3155 = vmatpush1.bf16.msra.mxu1 %v3154_v38  ;;  %v3538_v31 = vpack.c.bf16 %v2030_v42, %v2018_v23  ;;  %v2036_v18 = vand.u32 4294901760, %v2035_v20  ;;  %v757_v28 = vsub.f32 %v6680_v1, %v6288_v25  ;;  %v6292_v7 = vand.u32 4294901760, %v6682_v37  ;;  %v6684_v38 = vld [vmem:[#allocation156_spill] sm:$0xff]  ;;  %v6685_v20 = vld [vmem:[#allocation157_spill] sm:$0xff] }
 0x113   : > { %v3156_v24 = vpack.c.bf16 %v764_v49, %v752_v30  ;;  %v2048_v29 = vand.u32 4294901760, %v2047_v16  ;;  %v769_v15 = vsub.f32 %v6681_v11, %v6290_v22  ;;  %v6294_v55 = vand.u32 4294901760, %v6683_v47  ;;  %v6686_v30 = vld [vmem:[#allocation158_spill] sm:$0xff] }
 0x114   : > { %3539 = vmatpush1.bf16.msra.mxu0 %v3538_v31  ;;  %v758_v9 = vand.u32 4294901760, %v757_v28  ;;  %v2041_v23 = vsub.f32 %v6682_v37, %v6292_v7  ;;  %v6296_v42 = vand.u32 4294901760, %v6684_v38  ;;  %v6299_v25 = vand.u32 4294901760, %v6685_v20  ;;  %v6687_v7 = vld [vmem:[#allocation160_spill] sm:$0xff] }
 0x115   : > { %3157 = vmatprep.subr.bf16.mxu1 %v3156_v24  ;;  %v3540_v1 = vpack.c.bf16 %v2048_v29, %v2036_v18  ;;  %v770_v49 = vand.u32 4294901760, %v769_v15  ;;  %v2053_v16 = vsub.f32 %v6683_v47, %v6294_v55  ;;  %v6301_v22 = vand.u32 4294901760, %v6686_v30  ;;  %v6688_v15 = vld [vmem:[#allocation162_spill] sm:$0xff] }
 0x116   : > { %v2042_v11 = vand.u32 4294901760, %v2041_v23  ;;  %v775_v31 = vsub.f32 %v6684_v38, %v6296_v42  ;;  %v787_v28 = vsub.f32 %v6685_v20, %v6299_v25  ;;  %v6303_v37 = vand.u32 4294901760, %v6687_v7  ;;  %v6689_v38 = vld [vmem:[#allocation163_spill] sm:$0xff] }
 0x117   : > { %3541 = vmatprep.subr.bf16.mxu0 %v3540_v1  ;;  %v3158_v29 = vpack.c.bf16 %v770_v49, %v758_v9  ;;  %v2054_v18 = vand.u32 4294901760, %v2053_v16  ;;  %v2059_v24 = vsub.f32 %v6686_v30, %v6301_v22  ;;  %v6304_v55 = vand.u32 4294901760, %v6688_v15  ;;  %v6690_v1 = vld [vmem:[#allocation165_spill] sm:$0xff] }
 0x118   : > { %v776_v23 = vand.u32 4294901760, %v775_v31  ;;  %v788_v47 = vand.u32 4294901760, %v787_v28  ;;  %v2071_v42 = vsub.f32 %v6687_v7, %v6303_v37  ;;  %v6306_v57 = vand.u32 4294901760, %v6689_v38  ;;  %v6691_v28 = vld [vmem:[#allocation166_spill] sm:$0xff]  ;;  %v6767_v7 = vld [vmem:[#allocation72_spill] sm:$0xff] }
 0x119   : > { %3159 = vmatpush1.bf16.msra.mxu1 %v3158_v29  ;;  %v3542_v25 = vpack.c.bf16 %v2054_v18, %v2042_v11  ;;  %v2060_v20 = vand.u32 4294901760, %v2059_v24  ;;  %v781_v9 = vsub.f32 %v6688_v15, %v6304_v55  ;;  %v6308_v49 = vand.u32 4294901760, %v6690_v1  ;;  %v6692_v29 = vld [vmem:[#allocation168_spill] sm:$0xff]  ;;  %v6693_v24 = vld [vmem:[#allocation169_spill] sm:$0xff] }
 0x11a   : > { %v3160_v16 = vpack.c.bf16 %v788_v47, %v776_v23  ;;  %v2072_v22 = vand.u32 4294901760, %v2071_v42  ;;  %v793_v31 = vsub.f32 %v6689_v38, %v6306_v57  ;;  %v6309_v30 = vand.u32 4294901760, %v6691_v28  ;;  %v6694_v23 = vld [vmem:[#allocation170_spill] sm:$0xff] }
 0x11b   : > { %3543 = vmatpush1.bf16.msra.mxu0 %v3542_v25  ;;  %v782_v37 = vand.u32 4294901760, %v781_v9  ;;  %v2065_v11 = vsub.f32 %v6690_v1, %v6308_v49  ;;  %v6311_v18 = vand.u32 4294901760, %v6692_v29  ;;  %v6314_v55 = vand.u32 4294901760, %v6693_v24 }
 0x11c   : > { %3161 = vmatprep.subr.bf16.mxu1 %v3160_v16  ;;  %v3544_v15 = vpack.c.bf16 %v2072_v22, %v2060_v20  ;;  %v794_v47 = vand.u32 4294901760, %v793_v31  ;;  %v2077_v42 = vsub.f32 %v6691_v28, %v6309_v30  ;;  %v6316_v57 = vand.u32 4294901760, %v6694_v23  ;;  %v6695_v31 = vld [vmem:[#allocation174_spill] sm:$0xff] }
 0x11d   : > { %v2066_v38 = vand.u32 4294901760, %v2065_v11  ;;  %v799_v25 = vsub.f32 %v6692_v29, %v6311_v18  ;;  %v811_v9 = vsub.f32 %v6693_v24, %v6314_v55  ;;  %v6318_v49 = vand.u32 4294901760, %v4584_v54  ;;  %v6696_v29 = vld [vmem:[#allocation175_spill] sm:$0xff] }
 0x11e   : > { %3545 = vmatprep.subr.bf16.mxu0 %v3544_v15  ;;  %v3162_v22 = vpack.c.bf16 %v794_v47, %v782_v37  ;;  %v2078_v20 = vand.u32 4294901760, %v2077_v42  ;;  %v2083_v16 = vsub.f32 %v6694_v23, %v6316_v57  ;;  %v6319_v30 = vand.u32 4294901760, %v6695_v31  ;;  %v6697_v15 = vld [vmem:[#allocation177_spill] sm:$0xff] }
 0x11f   : > { %v800_v11 = vand.u32 4294901760, %v799_v25  ;;  %v812_v28 = vand.u32 4294901760, %v811_v9  ;;  %v2095_v18 = vsub.f32 %v4584_v54, %v6318_v49  ;;  %v6321_v1 = vand.u32 4294901760, %v6696_v29  ;;  %v6698_v9 = vld [vmem:[#allocation178_spill] sm:$0xff] }
 0x120   : > { %3163 = vmatpush1.bf16.msra.mxu1 %v3162_v22  ;;  %v3546_v55 = vpack.c.bf16 %v2078_v20, %v2066_v38  ;;  %v2084_v24 = vand.u32 4294901760, %v2083_v16  ;;  %v805_v37 = vsub.f32 %v6695_v31, %v6319_v30  ;;  %v6323_v47 = vand.u32 4294901760, %v6697_v15  ;;  %v6699_v22 = vld [vmem:[#allocation180_spill] sm:$0xff]  ;;  %v6700_v16 = vld [vmem:[#allocation181_spill] sm:$0xff]  ;;  %v6763_v54 = vld [vmem:[#allocation62_spill] sm:$0xff] }
 0x121   : > { %v3164_v42 = vpack.c.bf16 %v812_v28, %v800_v11  ;;  %v2096_v57 = vand.u32 4294901760, %v2095_v18  ;;  %v817_v25 = vsub.f32 %v6696_v29, %v6321_v1  ;;  %v6324_v23 = vand.u32 4294901760, %v6698_v9  ;;  %v6701_v11 = vld [vmem:[#allocation182_spill] sm:$0xff] }
 0x122   : > { %3547 = vmatpush1.bf16.msra.mxu0 %v3546_v55  ;;  %v806_v49 = vand.u32 4294901760, %v805_v37  ;;  %v2089_v38 = vsub.f32 %v6697_v15, %v6323_v47  ;;  %v6325_v20 = vand.u32 4294901760, %v6699_v22  ;;  %v6327_v30 = vand.u32 4294901760, %v6700_v16  ;;  %v6768_v15 = vld [vmem:[#allocation73_spill] sm:$0xff] }
 0x123   : > { %3165 = vmatprep.subr.bf16.mxu1 %v3164_v42  ;;  %v3548_v31 = vpack.c.bf16 %v2096_v57, %v2084_v24  ;;  %v818_v28 = vand.u32 4294901760, %v817_v25  ;;  %v2101_v18 = vsub.f32 %v6698_v9, %v6324_v23  ;;  %v6329_v1 = vand.u32 4294901760, %v6701_v11  ;;  %v6758_v9 = vld [vmem:[#allocation199_spill] sm:$0xff] }
 0x124   : > { %v2090_v29 = vand.u32 4294901760, %v2089_v38  ;;  %v823_v55 = vsub.f32 %v6699_v22, %v6325_v20  ;;  %v835_v37 = vsub.f32 %v6700_v16, %v6327_v30  ;;  %v6330_v47 = vand.u32 4294901760, %v4612_v60 }
 0x125   : > { %3549 = vmatprep.subr.bf16.mxu0 %v3548_v31  ;;  %v3166_v57 = vpack.c.bf16 %v818_v28, %v806_v49  ;;  %v2102_v24 = vand.u32 4294901760, %v2101_v18  ;;  %v2107_v42 = vsub.f32 %v6701_v11, %v6329_v1  ;;  %v6331_v25 = vand.u32 4294901760, %v4616_v21 }
 0x126   : > { %v824_v38 = vand.u32 4294901760, %v823_v55  ;;  %v836_v23 = vand.u32 4294901760, %v835_v37  ;;  %v2119_v20 = vsub.f32 %v4612_v60, %v6330_v47  ;;  %v6332_v22 = vand.u32 4294901760, %v4618_v14  ;;  %v6702_v37 = vld [vmem:[#allocation190_spill] sm:$0xff] }
 0x127   : > { %3167 = vmatpush1.bf16.msra.mxu1 %v3166_v57  ;;  %v3550_v30 = vpack.c.bf16 %v2102_v24, %v2090_v29  ;;  %v2108_v16 = vand.u32 4294901760, %v2107_v42  ;;  %v829_v49 = vsub.f32 %v4616_v21, %v6331_v25  ;;  %v6333_v31 = vand.u32 4294901760, %v4622_v36  ;;  %v6703_v24 = vld [vmem:[#allocation193_spill] sm:$0xff]  ;;  %v6761_v21 = vld [vmem:[#allocation58_spill] sm:$0xff] }
 0x128   : > { %v3168_v28 = vpack.c.bf16 %v836_v23, %v824_v38  ;;  %v2120_v18 = vand.u32 4294901760, %v2119_v20  ;;  %v841_v55 = vsub.f32 %v4618_v14, %v6332_v22  ;;  %v6334_v1 = vand.u32 4294901760, %v6702_v37 }
 0x129   : > { %3551 = vmatpush1.bf16.msra.mxu0 %v3550_v30  ;;  %v830_v47 = vand.u32 4294901760, %v829_v49  ;;  %v2113_v29 = vsub.f32 %v4622_v36, %v6333_v31  ;;  %v6336_v57 = vand.u32 4294901760, %v4631_v2  ;;  %v6341_v42 = vand.u32 4294901760, %v6703_v24 }
 0x12a   : > { %3169 = vmatprep.subr.bf16.mxu1 %v3168_v28  ;;  %v3552_v25 = vpack.c.bf16 %v2120_v18, %v2108_v16  ;;  %v842_v23 = vand.u32 4294901760, %v841_v55  ;;  %v2125_v20 = vsub.f32 %v6702_v37, %v6334_v1  ;;  %v6343_v38 = vand.u32 4294901760, %v4637_v8  ;;  %v6704_v55 = vld [vmem:[#allocation198_spill] sm:$0xff] }
 0x12b   : > { %v2114_v22 = vand.u32 4294901760, %v2113_v29  ;;  %v847_v30 = vsub.f32 %v4631_v2, %v6336_v57  ;;  %v859_v49 = vsub.f32 %v6703_v24, %v6341_v42  ;;  %v6346_v31 = vand.u32 4294901760, %v4642_v32  ;;  %v6705_v2 = vld [vmem:[#allocation199_spill] sm:$0xff] }
 0x12c   : > { %3553 = vmatprep.subr.bf16.mxu0 %v3552_v25  ;;  %v3170_v16 = vpack.c.bf16 %v842_v23, %v830_v47  ;;  %v2126_v28 = vand.u32 4294901760, %v2125_v20  ;;  %v2131_v18 = vsub.f32 %v4637_v8, %v6343_v38  ;;  %v6347_v1 = vand.u32 4294901760, %v6704_v55  ;;  %v6706_v25 = vld [vmem:[#allocation201_spill] sm:$0xff] }
 0x12d   : > { %v848_v29 = vand.u32 4294901760, %v847_v30  ;;  %v860_v37 = vand.u32 4294901760, %v859_v49  ;;  %v2143_v57 = vsub.f32 %v4642_v32, %v6346_v31  ;;  %v6348_v36 = vand.u32 4294901760, %v6705_v2  ;;  %v6707_v49 = vld [vmem:[#allocation202_spill] sm:$0xff] }
 0x12e   : > { %3171 = vmatpush1.bf16.msra.mxu1 %v3170_v16  ;;  %v3554_v42 = vpack.c.bf16 %v2126_v28, %v2114_v22  ;;  %v2132_v24 = vand.u32 4294901760, %v2131_v18  ;;  %v853_v47 = vsub.f32 %v6704_v55, %v6347_v1  ;;  %v6353_v23 = vand.u32 4294901760, %v6706_v25  ;;  %v6708_v18 = vld [vmem:[#allocation12_spill] sm:$0xff] }
 0x12f   : > { %v3172_v20 = vpack.c.bf16 %v860_v37, %v848_v29  ;;  %v2144_v38 = vand.u32 4294901760, %v2143_v57  ;;  %v865_v30 = vsub.f32 %v6705_v2, %v6348_v36  ;;  %v6354_v8 = vand.u32 4294901760, %v6707_v49  ;;  %v6709_v29 = vld [vmem:[#allocation13_spill] sm:$0xff] }
 0x130   : > { %3555 = vmatpush1.bf16.msra.mxu0 %v3554_v42  ;;  %v854_v31 = vand.u32 4294901760, %v853_v47  ;;  %v2137_v22 = vsub.f32 %v6706_v25, %v6353_v23  ;;  %v3176_v1 = vpack.c.bf16 %v6709_v29, %v6708_v18  ;;  %v6710_v42 = vld [vmem:[#allocation14_spill] sm:$0xff]  ;;  %v6711_v47 = vld [vmem:[#allocation16_spill] sm:$0xff]  ;;  %v6748_v18 = vld [vmem:[#allocation175_spill] sm:$0xff] }
 0x131   : > { %3173 = vmatprep.subr.bf16.mxu1 %v3172_v20  ;;  %v3556_v16 = vpack.c.bf16 %v2144_v38, %v2132_v24  ;;  %v866_v28 = vand.u32 4294901760, %v865_v30  ;;  %v2149_v37 = vsub.f32 %v6707_v49, %v6354_v8  ;;  %v3560_v55 = vpack.c.bf16 %v6711_v47, %v6710_v42  ;;  %v6712_v23 = vld [vmem:[#allocation18_spill] sm:$0xff]  ;;  %v6714_v8 = vld [vmem:[#allocation121_spill] sm:$0xff]  ;;  %v6774_v49 = vld [vmem:[#allocation79_spill] sm:$0xff] }
 0x132   : > { %v2138_v57 = vand.u32 4294901760, %v2137_v22  ;;  %v3178_v24 = vpack.c.bf16 %v4226_v27, %v6712_v23  ;;  %v3180_v38 = vpack.c.bf16 %v4240_v46, %v4236_v41  ;;  %v3562_v20 = vpack.c.bf16 %v4234_v40, %v4232_v39  ;;  %v6738_v40 = vld [vmem:[#allocation157_spill] sm:$0xff]  ;;  %v6740_v46 = vld [vmem:[#allocation162_spill] sm:$0xff]  ;;  %v6741_v41 = vld [vmem:[#allocation163_spill] sm:$0xff] }
 0x133   : > { %3557 = vmatprep.subr.bf16.mxu0 %v3556_v16  ;;  %v3174_v36 = vpack.c.bf16 %v866_v28, %v854_v31  ;;  %v2150_v2 = vand.u32 4294901760, %v2149_v37  ;;  %v3564_v31 = vpack.c.bf16 %v4247_v50, %v4244_v48  ;;  %v3570_v30 = vpack.c.bf16 %v4289_v44, %v4287_v43  ;;  %v6716_v44 = vld [vmem:[#allocation124_spill] sm:$0xff]  ;;  %v6718_v43 = vld [vmem:[#allocation127_spill] sm:$0xff]  ;;  %v6736_v50 = vld [vmem:[#allocation154_spill] sm:$0xff] }
 0x134   : > { %v3188_v22 = vpack.c.bf16 %v4297_v56, %v4293_v51  ;;  %v3572_v16 = vpack.c.bf16 %v4304_v63, %v4301_v58  ;;  %v3190_v28 = vpack.c.bf16 %v4311_v35, %v4307_v19  ;;  %v3192_v37 = vpack.c.bf16 %v4323_v5, %v4321_v3  ;;  %v6717_v58 = vld [vmem:[#allocation126_spill] sm:$0xff]  ;;  %v6721_v5 = vld [vmem:[#allocation132_spill] sm:$0xff]  ;;  %v6722_v3 = vld [vmem:[#allocation133_spill] sm:$0xff] }
 0x135   : > { %3175 = vmatpush1.bf16.msra.mxu1 %v3174_v36  ;;  %v3558_v32 = vpack.c.bf16 %v2150_v2, %v2138_v57  ;;  %v3182_v36 = vpack.c.bf16 %v4255_v61, %v4249_v52  ;;  %v3566_v2 = vpack.c.bf16 %v4261_v4, %v4257_v62  ;;  %v6720_v19 = vld [vmem:[#allocation130_spill] sm:$0xff]  ;;  %v6729_v63 = vld [vmem:[#allocation144_spill] sm:$0xff]  ;;  %v6730_v62 = vld [vmem:[#allocation145_spill] sm:$0xff] }
 0x136   : > { %3177 = vmatprep.subr.bf16.mxu1 %v3176_v1  ;;  %v3184_v1 = vpack.c.bf16 %v4268_v10, %v4265_v6  ;;  %v6723_v57 = vld [vmem:[#allocation134_spill] sm:$0xff]  ;;  %v6732_v6 = vld [vmem:[#allocation148_spill] sm:$0xff]  ;;  %v6734_v52 = vld [vmem:[#allocation151_spill] sm:$0xff] }
 0x137   : > { %3559 = vmatpush1.bf16.msra.mxu0 %v3558_v32  ;;  %v3568_v32 = vpack.c.bf16 %v4274_v13, %v4272_v12  ;;  %v6726_v13 = vld [vmem:[#allocation139_spill] sm:$0xff]  ;;  %v6728_v12 = vld [vmem:[#allocation142_spill] sm:$0xff]  ;;  %v6744_v56 = vld [vmem:[#allocation168_spill] sm:$0xff] }
 0x138   : > { %3561 = vmatprep.subr.bf16.mxu0 %v3560_v55  ;;  %871 = vmatmul.mubr.f32.vlgmr.msra.gmra.mrb[0].mxu1 %v4715_v59  ;;  %v3186_v55 = vpack.c.bf16 %v4283_v34, %v4281_v33  ;;  %v6715_v59 = vld [vmem:[#allocation122_spill] sm:$0xff]  ;;  %v6724_v34 = vld [vmem:[#allocation136_spill] sm:$0xff]  ;;  %v6745_v47 = vld [vmem:[#allocation169_spill] sm:$0xff] }
 0x139   : > { %3179 = vmatpush1.bf16.msra.mxu1 %v3178_v24  ;;  %v6725_v33 = vld [vmem:[#allocation138_spill] sm:$0xff]  ;;  %v6737_v24 = vld [vmem:[#allocation156_spill] sm:$0xff]  ;;  %v6754_v51 = vld [vmem:[#allocation193_spill] sm:$0xff] }
 0x13a   : > { %2155 = vmatmul.mubr.f32.vlgmr.msra.gmra.mrb[0].mxu0 %v4747_v17  ;;  %3181 = vmatprep.subr.bf16.mxu1 %v3180_v38  ;;  %v6713_v38 = vld [vmem:[#allocation120_spill] sm:$0xff]  ;;  %v6731_v35 = vld [vmem:[#allocation146_spill] sm:$0xff]  ;;  %v6750_v17 = vld [vmem:[#allocation181_spill] sm:$0xff] }
 0x13b   : > { %3563 = vmatpush1.bf16.msra.mxu0 %v3562_v20  ;;  %v6719_v20 = vld [vmem:[#allocation129_spill] sm:$0xff]  ;;  %v6733_v61 = vld [vmem:[#allocation150_spill] sm:$0xff]  ;;  %v6749_v4 = vld [vmem:[#allocation180_spill] sm:$0xff] }
 0x13c   : > { %3565 = vmatprep.subr.bf16.mxu0 %v3564_v31  ;;  %v6727_v31 = vld [vmem:[#allocation141_spill] sm:$0xff]  ;;  %v6743_v27 = vld [vmem:[#allocation166_spill] sm:$0xff]  ;;  %v6753_v48 = vld [vmem:[#allocation192_spill] sm:$0xff] }
 0x13d   : > { %3183 = vmatpush1.bf16.msra.mxu1 %v3182_v36  ;;  %v6735_v36 = vld [vmem:[#allocation153_spill] sm:$0xff]  ;;  %v6752_v10 = vld [vmem:[#allocation190_spill] sm:$0xff]  ;;  %v6759_v23 = vld [vmem:[#allocation204_spill] sm:$0xff] }
 0x13e   : > { %3185 = vmatprep.subr.bf16.mxu1 %v3184_v1  ;;  %1071 = vmatprep.mubr.f32.mxu1 %v6759_v23  ;;  %v6760_v42 = vld [vmem:[#allocation57_spill] sm:$0xff]  ;;  %v6762_v1 = vld [vmem:[#allocation207_spill] sm:$0xff] }
 0x13f   : > { %3567 = vmatpush1.bf16.msra.mxu0 %v3566_v2  ;;  %v3574_v14 = vpack.c.bf16 %v6761_v21, %v6760_v42  ;;  %2355 = vmatprep.mubr.f32.mxu0 %v6762_v1  ;;  %v6765_v2 = vld [vmem:[#allocation66_spill] sm:$0xff]  ;;  %v6766_v39 = vld [vmem:[#allocation67_spill] sm:$0xff]  ;;  %v6769_v23 = vld [vmem:[#allocation69_spill] sm:$0xff] }
 0x140   : > { %3569 = vmatprep.subr.bf16.mxu0 %v3568_v32  ;;  %v3194_v29 = vpack.c.bf16 %v6766_v39, %v6765_v2  ;;  %v6771_v21 = vld [vmem:[#allocation74_spill] sm:$0xff]  ;;  %v6772_v42 = vld [vmem:[#allocation76_spill] sm:$0xff] }
 0x141   : > { %3187 = vmatpush1.bf16.msra.mxu1 %v3186_v55  ;;  %v3196_v55 = vpack.c.bf16 %v6768_v15, %v6767_v7  ;;  %v3580_v1 = vpack.c.bf16 %v6772_v42, %v6771_v21  ;;  %v6778_v2 = vld [vmem:[#allocation82_spill] sm:$0xff]  ;;  %v6780_v7 = vld [vmem:[#allocation88_spill] sm:$0xff]  ;;  %v6784_v21 = vld [vmem:[#allocation97_spill] sm:$0xff] }
 0x142   : > { %3189 = vmatprep.subr.bf16.mxu1 %v3188_v22  ;;  %v6764_v22 = vld [vmem:[#allocation64_spill] sm:$0xff] }
 0x143   : > { %3571 = vmatpush1.bf16.msra.mxu0 %v3570_v30  ;;  %v3576_v32 = vpack.c.bf16 %v6764_v22, %v6763_v54  ;;  %v6770_v30 = vld [vmem:[#allocation70_spill] sm:$0xff]  ;;  %v6776_v54 = vld [vmem:[#allocation85_spill] sm:$0xff] }
 0x144   : > { %3573 = vmatprep.subr.bf16.mxu0 %v3572_v16  ;;  %v3578_v25 = vpack.c.bf16 %v6770_v30, %v6769_v23  ;;  %v6773_v16 = vld [vmem:[#allocation78_spill] sm:$0xff]  ;;  %v6782_v23 = vld [vmem:[#allocation91_spill] sm:$0xff] }
 0x145   : > { %3191 = vmatpush1.bf16.msra.mxu1 %v3190_v28  ;;  %v3198_v22 = vpack.c.bf16 %v6774_v49, %v6773_v16  ;;  %v6775_v28 = vld [vmem:[#allocation84_spill] sm:$0xff]  ;;  %v6786_v16 = vld [vmem:[#allocation94_spill] sm:$0xff] }
 0x146   : > { %3193 = vmatprep.subr.bf16.mxu1 %v3192_v37  ;;  %v3200_v39 = vpack.c.bf16 %v6776_v54, %v6775_v28  ;;  %v6777_v37 = vld [vmem:[#allocation81_spill] sm:$0xff]  ;;  %v6788_v28 = vld [vmem:[#allocation100_spill] sm:$0xff] }
 0x147   : > { %3575 = vmatpush1.bf16.msra.mxu0 %v3574_v14  ;;  %v3582_v15 = vpack.c.bf16 %v6778_v2, %v6777_v37  ;;  %v6779_v14 = vld [vmem:[#allocation86_spill] sm:$0xff]  ;;  %v6790_v37 = vld [vmem:[#allocation103_spill] sm:$0xff] }
 0x148   : > { %3577 = vmatprep.subr.bf16.mxu0 %v3576_v32  ;;  %v3584_v30 = vpack.c.bf16 %v6780_v7, %v6779_v14  ;;  %v6781_v32 = vld [vmem:[#allocation90_spill] sm:$0xff]  ;;  %v6792_v14 = vld [vmem:[#allocation109_spill] sm:$0xff] }
 0x149   : > { %3195 = vmatpush1.bf16.msra.mxu1 %v3194_v29  ;;  %v3202_v42 = vpack.c.bf16 %v6782_v23, %v6781_v32  ;;  %v6783_v29 = vld [vmem:[#allocation96_spill] sm:$0xff]  ;;  %v6794_v32 = vld [vmem:[#allocation106_spill] sm:$0xff] }
 0x14a   : > { %3197 = vmatprep.subr.bf16.mxu1 %v3196_v55  ;;  %v3204_v49 = vpack.c.bf16 %v6784_v21, %v6783_v29  ;;  %v6785_v55 = vld [vmem:[#allocation93_spill] sm:$0xff]  ;;  %v6796_v29 = vld [vmem:[#allocation112_spill] sm:$0xff] }
 0x14b   : > { %3579 = vmatpush1.bf16.msra.mxu0 %v3578_v25  ;;  %v3586_v54 = vpack.c.bf16 %v6786_v16, %v6785_v55  ;;  %v6787_v25 = vld [vmem:[#allocation98_spill] sm:$0xff] }
 0x14c   : > { %3581 = vmatprep.subr.bf16.mxu0 %v3580_v1  ;;  %v3588_v2 = vpack.c.bf16 %v6788_v28, %v6787_v25  ;;  %v6789_v1 = vld [vmem:[#allocation102_spill] sm:$0xff] }
 0x14d   : > { %3199 = vmatpush1.bf16.msra.mxu1 %v3198_v22  ;;  %v3206_v7 = vpack.c.bf16 %v6790_v37, %v6789_v1  ;;  %v6791_v22 = vld [vmem:[#allocation108_spill] sm:$0xff] }
 0x14e   : > { %3201 = vmatprep.subr.bf16.mxu1 %v3200_v39  ;;  %v3208_v23 = vpack.c.bf16 %v6792_v14, %v6791_v22  ;;  %v6793_v39 = vld [vmem:[#allocation105_spill] sm:$0xff] }
 0x14f   : > { %3583 = vmatpush1.bf16.msra.mxu0 %v3582_v15  ;;  %v3590_v21 = vpack.c.bf16 %v6794_v32, %v6793_v39  ;;  %v6795_v15 = vld [vmem:[#allocation110_spill] sm:$0xff] }
 0x150   : > { %3585 = vmatprep.subr.bf16.mxu0 %v3584_v30  ;;  %v3592_v16 = vpack.c.bf16 %v6796_v29, %v6795_v15  ;;  %v6804_v30 = vpack.c.bf16 %v6724_v34, %v6723_v57 }
 0x151   : > { %3203 = vmatpush1.bf16.msra.mxu1 %v3202_v42  ;;  %v6797_v42 = vpack.c.bf16 %v6657_v53, %v6656_v45 }
 0x152   : > { %3205 = vmatprep.subr.bf16.mxu1 %v3204_v49  ;;  %v6798_v49 = vpack.c.bf16 %v6714_v8, %v6713_v38 }
 0x153   : > { %3587 = vmatpush1.bf16.msra.mxu0 %v3586_v54  ;;  %v6799_v54 = vpack.c.bf16 %v6659_v26, %v6658_v0 }
 0x154   : > { %3589 = vmatprep.subr.bf16.mxu0 %v3588_v2  ;;  %v6800_v2 = vpack.c.bf16 %v6716_v44, %v6715_v59 }
 0x155   : > { %3207 = vmatpush1.bf16.msra.mxu1 %v3206_v7  ;;  %v6802_v7 = vpack.c.bf16 %v6722_v3, %v6721_v5 }
 0x156   : > { %3209 = vmatprep.subr.bf16.mxu1 %v3208_v23  ;;  %v6803_v23 = vpack.c.bf16 %v6720_v19, %v6719_v20 }
 0x157   : > { %3591 = vmatpush1.bf16.msra.mxu0 %v3590_v21  ;;  %v6801_v21 = vpack.c.bf16 %v6718_v43, %v6717_v58 }
 0x158   : > { %3593 = vmatprep.subr.bf16.mxu0 %v3592_v16  ;;  %v6805_v16 = vpack.c.bf16 %v6726_v13, %v6725_v33 }
 0x159   : > { %3211 = vmatpush1.bf16.msra.mxu1 %v6797_v42  ;;  %v6806_v42 = vpack.c.bf16 %v6730_v62, %v6729_v63 }
 0x15a   : > { %3213 = vmatprep.subr.bf16.mxu1 %v6798_v49  ;;  %v6807_v49 = vpack.c.bf16 %v6728_v12, %v6727_v31 }
 0x15b   : > { %3595 = vmatpush1.bf16.msra.mxu0 %v6799_v54  ;;  %v6808_v54 = vpack.c.bf16 %v6732_v6, %v6731_v35 }
 0x15c   : > { %3597 = vmatprep.subr.bf16.mxu0 %v6800_v2  ;;  %v6809_v2 = vpack.c.bf16 %v6734_v52, %v6733_v61 }
 0x15d   : > { %3215 = vmatpush1.bf16.msra.mxu1 %v6801_v21  ;;  %v6810_v21 = vpack.c.bf16 %v6738_v40, %v6737_v24  ;;  %v6820_v40 = vld [vmem:[#allocation170_spill] sm:$0xff] }
 0x15e   : > { %3217 = vmatprep.subr.bf16.mxu1 %v6802_v7  ;;  %v6811_v7 = vpack.c.bf16 %v6736_v50, %v6735_v36 }
 0x15f   : > { %3599 = vmatpush1.bf16.msra.mxu0 %v6803_v23  ;;  %v6812_v23 = vld [vmem:[#allocation160_spill] sm:$0xff] }
 0x160   : > { %3601 = vmatprep.subr.bf16.mxu0 %v6804_v30  ;;  %v6813_v30 = vld [vmem:[#allocation158_spill] sm:$0xff] }
 0x161   : > { %3219 = vmatpush1.bf16.msra.mxu1 %v6805_v16  ;;  %v6814_v16 = vpack.c.bf16 %v6812_v23, %v6813_v30 }
 0x162   : > { %3221 = vmatprep.subr.bf16.mxu1 %v6806_v42  ;;  %v6815_v42 = vpack.c.bf16 %v6741_v41, %v6740_v46  ;;  %v6826_v41 = vld [vmem:[#allocation177_spill] sm:$0xff] }
 0x163   : > { %3603 = vmatpush1.bf16.msra.mxu0 %v6807_v49  ;;  %v6816_v49 = vpack.c.bf16 %v6745_v47, %v6744_v56 }
 0x164   : > { %3605 = vmatprep.subr.bf16.mxu0 %v6808_v54  ;;  %v6817_v54 = vld [vmem:[#allocation165_spill] sm:$0xff] }
 0x165   : > { %3223 = vmatpush1.bf16.msra.mxu1 %v6809_v2  ;;  %v6818_v2 = vpack.c.bf16 %v6743_v27, %v6817_v54  ;;  %v6830_v27 = vld [vmem:[#allocation186_spill] sm:$0xff] }
 0x166   : > { %3225 = vmatprep.subr.bf16.mxu1 %v6810_v21  ;;  %v6819_v21 = vld [vmem:[#allocation172_spill] sm:$0xff]  ;;  %v6931_v54 = vld [vmem:[#allocation22_spill] sm:$0xff] }
 0x167   : > { %3607 = vmatpush1.bf16.msra.mxu0 %v6811_v7  ;;  %v6821_v50 = vpack.c.bf16 %v6819_v21, %v6820_v40  ;;  %v6822_v7 = vld [vmem:[#allocation174_spill] sm:$0xff]  ;;  %v6928_v40 = vld [vmem:[#allocation200_spill] sm:$0xff] }
 0x168   : > { %3609 = vmatprep.subr.bf16.mxu0 %v6814_v16  ;;  %v6823_v23 = vpack.c.bf16 %v6748_v18, %v6822_v7  ;;  %v6824_v16 = vpack.c.bf16 %v6750_v17, %v6749_v4  ;;  %v6836_v4 = vld [vmem:[#allocation194_spill] sm:$0xff]  ;;  %v6922_v18 = vld [vmem:[#allocation19_spill] sm:$0xff] }
 0x169   : > { %3227 = vmatpush1.bf16.msra.mxu1 %v6815_v42  ;;  %v6825_v42 = vld [vmem:[#allocation178_spill] sm:$0xff] }
 0x16a   : > { %3229 = vmatprep.subr.bf16.mxu1 %v6816_v49  ;;  %v6827_v47 = vpack.c.bf16 %v6825_v42, %v6826_v41  ;;  %v6828_v49 = vpack.c.bf16 %v4612_v60, %v6701_v11  ;;  %v6919_v41 = vld [vmem:[#allocation197_spill] sm:$0xff] }
 0x16b   : > { %3611 = vmatpush1.bf16.msra.mxu0 %v6818_v2  ;;  %v6829_v2 = vld [vmem:[#allocation187_spill] sm:$0xff] }
 0x16c   : > { %3613 = vmatprep.subr.bf16.mxu0 %v6821_v50  ;;  %v6831_v21 = vpack.c.bf16 %v6829_v2, %v6830_v27  ;;  %v6832_v50 = vpack.c.bf16 %v6754_v51, %v6753_v48  ;;  %v6841_v2 = vld [vmem:[#allocation202_spill] sm:$0xff]  ;;  %v6844_v51 = vld [vmem:[#allocation15_spill] sm:$0xff] }
 0x16d   : > { %3231 = vmatpush1.bf16.msra.mxu1 %v6823_v23  ;;  %v6833_v23 = vld [vmem:[#allocation189_spill] sm:$0xff] }
 0x16e   : > { %3233 = vmatprep.subr.bf16.mxu1 %v6824_v16  ;;  %v6834_v17 = vpack.c.bf16 %v6752_v10, %v6833_v23  ;;  %v6835_v16 = vld [vmem:[#allocation196_spill] sm:$0xff]  ;;  %v6846_v10 = vld [vmem:[#allocation17_spill] sm:$0xff] }
 0x16f   : > { %3615 = vmatpush1.bf16.msra.mxu0 %v6827_v47  ;;  %v6837_v42 = vpack.c.bf16 %v6835_v16, %v6836_v4  ;;  %v6838_v47 = vld [vmem:[#allocation198_spill] sm:$0xff]  ;;  %v6850_v16 = vld [vmem:[#allocation24_spill] sm:$0xff] }
 0x170   : > { %3617 = vmatprep.subr.bf16.mxu0 %v6828_v49  ;;  %v6839_v60 = vpack.c.bf16 %v6758_v9, %v6838_v47  ;;  %v6840_v49 = vld [vmem:[#allocation11_spill] sm:$0xff]  ;;  %v6911_v47 = vld [vmem:[#allocation13_spill] sm:$0xff] }
 0x171   : > { %3235 = vmatpush1.bf16.msra.mxu1 %v6831_v21  ;;  %v6842_v21 = vld [vmem:[#allocation201_spill] sm:$0xff] }
 0x172   : > { %3237 = vmatprep.subr.bf16.mxu1 %v6832_v50  ;;  %v6843_v27 = vpack.c.bf16 %v6841_v2, %v6842_v21  ;;  %v6845_v50 = vld [vmem:[#allocation208_spill] sm:$0xff]  ;;  %v6854_v2 = vld [vmem:[#allocation26_spill] sm:$0xff]  ;;  %v6857_v21 = vld [vmem:[#allocation33_spill] sm:$0xff] }
 0x173   : > { %3619 = vmatpush1.bf16.msra.mxu0 %v6834_v17  ;;  %v6847_v17 = vld [vmem:[#allocation204_spill] sm:$0xff] }
 0x174   : > { %3621 = vmatprep.subr.bf16.mxu0 %v6837_v42  ;;  %v6848_v23 = vand.u32 4294901760, %v6847_v17  ;;  %v6849_v42 = vld [vmem:[#allocation210_spill] sm:$0xff]  ;;  %v6860_v17 = vld [vmem:[#allocation47_spill] sm:$0xff] }
 0x175   : > { %3239 = vmatpush1.bf16.msra.mxu1 %v6839_v60  ;;  %v6851_v60 = vld [vmem:[#allocation20_spill] sm:$0xff] }
 0x176   : > { %3241 = vmatprep.subr.bf16.mxu1 %v6840_v49  ;;  %v6852_v49 = vld [vmem:[#allocation207_spill] sm:$0xff] }
 0x177   : > { %3623 = vmatpush1.bf16.msra.mxu0 %v6843_v27  ;;  %v6853_v9 = vand.u32 4294901760, %v6852_v49  ;;  %v6855_v27 = vld [vmem:[#allocation30_spill] sm:$0xff] }
 0x178   : > { %3625 = vmatprep.subr.bf16.mxu0 %v6844_v51  ;;  %1074 = vmatmul.mubr.f32.vlgmr.msra.gmra.mrb[0].mxu1 %v6845_v50  ;;  %v6856_v51 = vld [vmem:[#allocation35_spill] sm:$0xff]  ;;  %v6863_v49 = vld [vmem:[#allocation54_spill] sm:$0xff] }
 0x179   : > { %3243 = vmatpush1.bf16.msra.mxu1 %v6846_v10  ;;  %1211 = vmatprep.mubr.f32.mxu1 %v6848_v23  ;;  %v6858_v10 = vld [vmem:[#allocation38_spill] sm:$0xff]  ;;  %v6859_v23 = vld [vmem:[#allocation41_spill] sm:$0xff] }
 0x17a   : > { %2358 = vmatmul.mubr.f32.vlgmr.msra.gmra.mrb[0].mxu0 %v6849_v42  ;;  %3245 = vmatprep.subr.bf16.mxu1 %v6850_v16  ;;  %v6861_v16 = vld [vmem:[#allocation44_spill] sm:$0xff] }
 0x17b   : > { %3627 = vmatpush1.bf16.msra.mxu0 %v6851_v60  ;;  %2495 = vmatprep.mubr.f32.mxu0 %v6853_v9  ;;  %v6862_v60 = vld [vmem:[#allocation50_spill] sm:$0xff]  ;;  %v6864_v9 = vld [vmem:[#allocation59_spill] sm:$0xff] }
 0x17c   : > { %3629 = vmatprep.subr.bf16.mxu0 %v6854_v2  ;;  %v6865_v2 = vld [vmem:[#allocation56_spill] sm:$0xff] }
 0x17d   : > { %3247 = vmatpush1.bf16.msra.mxu1 %v6855_v27  ;;  %v6866_v27 = vld [vmem:[#allocation63_spill] sm:$0xff] }
 0x17e   : > { %3249 = vmatprep.subr.bf16.mxu1 %v6856_v51  ;;  %v6867_v51 = vld [vmem:[#allocation65_spill] sm:$0xff] }
 0x17f   : > { %3631 = vmatpush1.bf16.msra.mxu0 %v6857_v21  ;;  %v6868_v21 = vld [vmem:[#allocation71_spill] sm:$0xff] }
 0x180   : > { %3633 = vmatprep.subr.bf16.mxu0 %v6858_v10  ;;  %v6869_v10 = vld [vmem:[#allocation68_spill] sm:$0xff] }
 0x181   : > { %3251 = vmatpush1.bf16.msra.mxu1 %v6859_v23  ;;  %v6870_v23 = vld [vmem:[#allocation75_spill] sm:$0xff] }
 0x182   : > { %3253 = vmatprep.subr.bf16.mxu1 %v6860_v17  ;;  %v6871_v17 = vld [vmem:[#allocation77_spill] sm:$0xff] }
 0x183   : > { %3635 = vmatpush1.bf16.msra.mxu0 %v6861_v16  ;;  %v6872_v16 = vld [vmem:[#allocation83_spill] sm:$0xff] }
 0x184   : > { %3637 = vmatprep.subr.bf16.mxu0 %v6862_v60  ;;  %v6873_v60 = vld [vmem:[#allocation80_spill] sm:$0xff] }
 0x185   : > { %3255 = vmatpush1.bf16.msra.mxu1 %v6863_v49  ;;  %v6874_v49 = vld [vmem:[#allocation87_spill] sm:$0xff] }
 0x186   : > { %3257 = vmatprep.subr.bf16.mxu1 %v6864_v9  ;;  %v6875_v9 = vld [vmem:[#allocation89_spill] sm:$0xff] }
 0x187   : > { %3639 = vmatpush1.bf16.msra.mxu0 %v6865_v2  ;;  %v6876_v2 = vld [vmem:[#allocation95_spill] sm:$0xff] }
 0x188   : > { %3641 = vmatprep.subr.bf16.mxu0 %v6866_v27  ;;  %v6877_v27 = vld [vmem:[#allocation92_spill] sm:$0xff] }
 0x189   : > { %3259 = vmatpush1.bf16.msra.mxu1 %v6867_v51  ;;  %v6878_v51 = vld [vmem:[#allocation99_spill] sm:$0xff] }
 0x18a   : > { %3261 = vmatprep.subr.bf16.mxu1 %v6868_v21  ;;  %v6879_v21 = vld [vmem:[#allocation101_spill] sm:$0xff] }
 0x18b   : > { %3643 = vmatpush1.bf16.msra.mxu0 %v6869_v10  ;;  %v6880_v10 = vld [vmem:[#allocation107_spill] sm:$0xff] }
 0x18c   : > { %3645 = vmatprep.subr.bf16.mxu0 %v6870_v23  ;;  %v6881_v23 = vld [vmem:[#allocation104_spill] sm:$0xff] }
 0x18d   : > { %3263 = vmatpush1.bf16.msra.mxu1 %v6871_v17  ;;  %v6882_v17 = vld [vmem:[#allocation111_spill] sm:$0xff] }
 0x18e   : > { %3265 = vmatprep.subr.bf16.mxu1 %v6872_v16  ;;  %v6883_v16 = vld [vmem:[#allocation113_spill] sm:$0xff] }
 0x18f   : > { %3647 = vmatpush1.bf16.msra.mxu0 %v6873_v60  ;;  %v6884_v60 = vld [vmem:[#allocation119_spill] sm:$0xff] }
 0x190   : > { %3649 = vmatprep.subr.bf16.mxu0 %v6874_v49  ;;  %v6885_v49 = vld [vmem:[#allocation116_spill] sm:$0xff] }
 0x191   : > { %3267 = vmatpush1.bf16.msra.mxu1 %v6875_v9  ;;  %v6886_v9 = vld [vmem:[#allocation123_spill] sm:$0xff] }
 0x192   : > { %3269 = vmatprep.subr.bf16.mxu1 %v6876_v2  ;;  %v6887_v2 = vld [vmem:[#allocation125_spill] sm:$0xff] }
 0x193   : > { %3651 = vmatpush1.bf16.msra.mxu0 %v6877_v27  ;;  %v6888_v27 = vld [vmem:[#allocation131_spill] sm:$0xff] }
 0x194   : > { %3653 = vmatprep.subr.bf16.mxu0 %v6878_v51  ;;  %v6889_v51 = vld [vmem:[#allocation128_spill] sm:$0xff] }
 0x195   : > { %3271 = vmatpush1.bf16.msra.mxu1 %v6879_v21  ;;  %v6890_v21 = vld [vmem:[#allocation135_spill] sm:$0xff] }
 0x196   : > { %3273 = vmatprep.subr.bf16.mxu1 %v6880_v10  ;;  %v6891_v10 = vld [vmem:[#allocation137_spill] sm:$0xff] }
 0x197   : > { %3655 = vmatpush1.bf16.msra.mxu0 %v6881_v23  ;;  %v6892_v23 = vld [vmem:[#allocation143_spill] sm:$0xff] }
 0x198   : > { %3657 = vmatprep.subr.bf16.mxu0 %v6882_v17  ;;  %v6893_v17 = vld [vmem:[#allocation140_spill] sm:$0xff] }
 0x199   : > { %3275 = vmatpush1.bf16.msra.mxu1 %v6883_v16  ;;  %v6894_v16 = vld [vmem:[#allocation147_spill] sm:$0xff] }
 0x19a   : > { %3277 = vmatprep.subr.bf16.mxu1 %v6884_v60  ;;  %v6895_v60 = vld [vmem:[#allocation149_spill] sm:$0xff] }
 0x19b   : > { %3659 = vmatpush1.bf16.msra.mxu0 %v6885_v49  ;;  %v6896_v49 = vld [vmem:[#allocation155_spill] sm:$0xff] }
 0x19c   : > { %3661 = vmatprep.subr.bf16.mxu0 %v6886_v9  ;;  %v6897_v9 = vld [vmem:[#allocation152_spill] sm:$0xff] }
 0x19d   : > { %3279 = vmatpush1.bf16.msra.mxu1 %v6887_v2  ;;  %v6898_v2 = vld [vmem:[#allocation159_spill] sm:$0xff] }
 0x19e   : > { %3281 = vmatprep.subr.bf16.mxu1 %v6888_v27  ;;  %v6899_v27 = vld [vmem:[#allocation161_spill] sm:$0xff] }
 0x19f   : > { %3663 = vmatpush1.bf16.msra.mxu0 %v6889_v51  ;;  %v6900_v51 = vld [vmem:[#allocation167_spill] sm:$0xff] }
 0x1a0   : > { %3665 = vmatprep.subr.bf16.mxu0 %v6890_v21  ;;  %v6901_v21 = vld [vmem:[#allocation164_spill] sm:$0xff] }
 0x1a1   : > { %3283 = vmatpush1.bf16.msra.mxu1 %v6891_v10  ;;  %v6902_v10 = vld [vmem:[#allocation171_spill] sm:$0xff] }
 0x1a2   : > { %3285 = vmatprep.subr.bf16.mxu1 %v6892_v23  ;;  %v6903_v23 = vld [vmem:[#allocation173_spill] sm:$0xff] }
 0x1a3   : > { %3667 = vmatpush1.bf16.msra.mxu0 %v6893_v17  ;;  %v6904_v17 = vld [vmem:[#allocation179_spill] sm:$0xff] }
 0x1a4   : > { %3669 = vmatprep.subr.bf16.mxu0 %v6894_v16  ;;  %v6905_v16 = vld [vmem:[#allocation176_spill] sm:$0xff] }
 0x1a5   : > { %3287 = vmatpush1.bf16.msra.mxu1 %v6895_v60  ;;  %v6906_v60 = vld [vmem:[#allocation183_spill] sm:$0xff] }
 0x1a6   : > { %3289 = vmatprep.subr.bf16.mxu1 %v6896_v49  ;;  %v6907_v49 = vld [vmem:[#allocation185_spill] sm:$0xff] }
 0x1a7   : > { %3671 = vmatpush1.bf16.msra.mxu0 %v6897_v9  ;;  %v6908_v9 = vld [vmem:[#allocation191_spill] sm:$0xff] }
 0x1a8   : > { %3673 = vmatprep.subr.bf16.mxu0 %v6898_v2  ;;  %v6909_v2 = vld [vmem:[#allocation12_spill] sm:$0xff] }
 0x1a9   : > { %3291 = vmatpush1.bf16.msra.mxu1 %v6899_v27  ;;  %v6910_v27 = vand.u32 4294901760, %v6909_v2  ;;  %v6924_v2 = vld [vmem:[#allocation23_spill] sm:$0xff] }
 0x1aa   : > { %3293 = vmatprep.subr.bf16.mxu1 %v6900_v51  ;;  %v6912_v51 = vand.u32 4294901760, %v6911_v47  ;;  %v6925_v47 = vand.u32 4294901760, %v6924_v2  ;;  %v6938_v2 = vld [vmem:[#allocation29_spill] sm:$0xff] }
 0x1ab   : > { %3675 = vmatpush1.bf16.msra.mxu0 %v6901_v21  ;;  %v6913_v21 = vld [vmem:[#allocation188_spill] sm:$0xff] }
 0x1ac   : > { %3677 = vmatprep.subr.bf16.mxu0 %v6902_v10  ;;  %v3304_v4 = vpack.c.bf16 %v6912_v51, %v6910_v27  ;;  %v6914_v10 = vld [vmem:[#allocation195_spill] sm:$0xff]  ;;  %v6926_v51 = vld [vmem:[#allocation25_spill] sm:$0xff] }
 0x1ad   : > { %3295 = vmatpush1.bf16.msra.mxu1 %v6903_v23  ;;  %v6915_v23 = vld [vmem:[#allocation14_spill] sm:$0xff]  ;;  %v6927_v27 = vand.u32 4294901760, %v6926_v51  ;;  %v6939_v51 = vand.u32 4294901760, %v6938_v2  ;;  %v6953_v2 = vld [vmem:[#allocation39_spill] sm:$0xff] }
 0x1ae   : > { %3297 = vmatprep.subr.bf16.mxu1 %v6904_v17  ;;  %v6916_v48 = vand.u32 4294901760, %v6915_v23  ;;  %v6917_v17 = vld [vmem:[#allocation16_spill] sm:$0xff] }
 0x1af   : > { %3679 = vmatpush1.bf16.msra.mxu0 %v6905_v16  ;;  %v6918_v11 = vand.u32 4294901760, %v6917_v17  ;;  %v6932_v17 = vand.u32 4294901760, %v6931_v54  ;;  %v6944_v54 = vld [vmem:[#allocation36_spill] sm:$0xff] }
 0x1b0   : > { %3681 = vmatprep.subr.bf16.mxu0 %v6906_v60  ;;  %v6920_v60 = vld [vmem:[#allocation18_spill] sm:$0xff] }
 0x1b1   : > { %3299 = vmatpush1.bf16.msra.mxu1 %v6907_v49  ;;  %v3688_v16 = vpack.c.bf16 %v6918_v11, %v6916_v48  ;;  %v6921_v49 = vand.u32 4294901760, %v6920_v60  ;;  %v6933_v11 = vand.u32 4294901760, %v6845_v50  ;;  %v6934_v60 = vld [vmem:[#allocation27_spill] sm:$0xff]  ;;  %v6946_v50 = vld [vmem:[#allocation37_spill] sm:$0xff] }
 0x1b2   : > { %3301 = vmatprep.subr.bf16.mxu1 %v6908_v9  ;;  %v6923_v9 = vand.u32 4294901760, %v6922_v18  ;;  %v6935_v18 = vand.u32 4294901760, %v6934_v60 }
 0x1b3   : > { %3683 = vmatpush1.bf16.msra.mxu0 %v6913_v21  ;;  %v3308_v21 = vpack.c.bf16 %v6927_v27, %v6925_v47  ;;  %v6940_v47 = vld [vmem:[#allocation31_spill] sm:$0xff] }
 0x1b4   : > { %3685 = vmatprep.subr.bf16.mxu0 %v6914_v10  ;;  %v3306_v7 = vpack.c.bf16 %v6923_v9, %v6921_v49  ;;  %v6929_v10 = vld [vmem:[#allocation21_spill] sm:$0xff]  ;;  %v6936_v49 = vld [vmem:[#allocation28_spill] sm:$0xff]  ;;  %v6941_v27 = vand.u32 4294901760, %v6940_v47 }
 0x1b5   : > { %3303 = vmatpush1.bf16.msra.mxu1 %v6919_v41  ;;  %v6930_v23 = vand.u32 4294901760, %v6929_v10  ;;  %v6942_v41 = vld [vmem:[#allocation203_spill] sm:$0xff]  ;;  %v6943_v10 = vand.u32 4294901760, %v6849_v42  ;;  %v6955_v47 = vld [vmem:[#allocation40_spill] sm:$0xff] }
 0x1b6   : > { %3305 = vmatprep.subr.bf16.mxu1 %v3304_v4  ;;  %v6937_v4 = vand.u32 4294901760, %v6936_v49  ;;  %v6956_v42 = vand.u32 4294901760, %v6955_v47  ;;  %v6971_v47 = vld [vmem:[#allocation52_spill] sm:$0xff] }
 0x1b7   : > { %3687 = vmatpush1.bf16.msra.mxu0 %v6928_v40  ;;  %v3690_v48 = vpack.c.bf16 %v6932_v17, %v6930_v23  ;;  %v3310_v40 = vpack.c.bf16 %v6941_v27, %v6939_v51  ;;  %v6947_v23 = vand.u32 4294901760, %v6946_v50  ;;  %v6954_v51 = vand.u32 4294901760, %v6953_v2 }
 0x1b8   : > { %3689 = vmatprep.subr.bf16.mxu0 %v3688_v16  ;;  %1215 = vmatmul.mubr.f32.vlgmr.msra.gmra.mrb[0].mxu1 %v6933_v11  ;;  %v3692_v9 = vpack.c.bf16 %v6937_v4, %v6935_v18  ;;  %v6945_v16 = vand.u32 4294901760, %v6944_v54  ;;  %v6948_v11 = vld [vmem:[#allocation32_spill] sm:$0xff]  ;;  %v6952_v4 = vld [vmem:[#allocation205_spill] sm:$0xff]  ;;  %v6959_v54 = vld [vmem:[#allocation43_spill] sm:$0xff] }
 0x1b9   : > { %3307 = vmatpush1.bf16.msra.mxu1 %v3306_v7  ;;  %1478 = vmatprep.mubr.f32.mxu1 %v6942_v41  ;;  %v6949_v60 = vand.u32 4294901760, %v6948_v11  ;;  %v6950_v7 = vld [vmem:[#allocation34_spill] sm:$0xff]  ;;  %v3696_v27 = vpack.c.bf16 %v6956_v42, %v6954_v51  ;;  %v6960_v50 = vand.u32 4294901760, %v6959_v54  ;;  %v6963_v11 = vld [vmem:[#allocation49_spill] sm:$0xff]  ;;  %v6969_v51 = vld [vmem:[#allocation51_spill] sm:$0xff]  ;;  %v6972_v42 = vand.u32 4294901760, %v6971_v47 }
 0x1ba   : > { %2499 = vmatmul.mubr.f32.vlgmr.msra.gmra.mrb[0].mxu0 %v6943_v10  ;;  %3309 = vmatprep.subr.bf16.mxu1 %v3308_v21  ;;  %v3312_v17 = vpack.c.bf16 %v6947_v23, %v6945_v16  ;;  %v6951_v18 = vand.u32 4294901760, %v6950_v7  ;;  %v6957_v21 = vld [vmem:[#allocation42_spill] sm:$0xff]  ;;  %v6964_v7 = vand.u32 4294901760, %v6963_v11  ;;  %v6975_v54 = vld [vmem:[#allocation55_spill] sm:$0xff]  ;;  %v6979_v11 = vld [vmem:[#allocation61_spill] sm:$0xff] }
 0x1bb   : > { %3691 = vmatpush1.bf16.msra.mxu0 %v3690_v48  ;;  %2762 = vmatprep.mubr.f32.mxu0 %v6952_v4  ;;  %v6958_v10 = vand.u32 4294901760, %v6957_v21  ;;  %v6961_v48 = vld [vmem:[#allocation48_spill] sm:$0xff]  ;;  %v6967_v4 = vld [vmem:[#allocation46_spill] sm:$0xff] }
 0x1bc   : > { %v3694_v49 = vpack.c.bf16 %v6951_v18, %v6949_v60  ;;  %3693 = vmatprep.subr.bf16.mxu0 %v3692_v9  ;;  %v6962_v23 = vand.u32 4294901760, %v6961_v48  ;;  %v6965_v18 = vld [vmem:[#allocation45_spill] sm:$0xff]  ;;  %v6968_v2 = vand.u32 4294901760, %v6967_v4  ;;  %v6987_v47 = vld [vmem:[#allocation64_spill] sm:$0xff] }
 0x1bd   : > { %3311 = vmatpush1.bf16.msra.mxu1 %v3310_v40  ;;  %v3314_v16 = vpack.c.bf16 %v6960_v50, %v6958_v10  ;;  %v6966_v9 = vand.u32 4294901760, %v6965_v18  ;;  %v6970_v40 = vand.u32 4294901760, %v6969_v51  ;;  %v6973_v10 = vld [vmem:[#allocation53_spill] sm:$0xff]  ;;  %v6976_v50 = vand.u32 4294901760, %v6975_v54  ;;  %v6991_v54 = vld [vmem:[#allocation67_spill] sm:$0xff] }
 0x1be   : > { %3313 = vmatprep.subr.bf16.mxu1 %v3312_v17  ;;  %v3316_v60 = vpack.c.bf16 %v6964_v7, %v6962_v23  ;;  %v6974_v17 = vand.u32 4294901760, %v6973_v10  ;;  %v6977_v23 = vld [vmem:[#allocation60_spill] sm:$0xff]  ;;  %v6980_v7 = vand.u32 4294901760, %v6979_v11  ;;  %v6981_v4 = vld [vmem:[#allocation57_spill] sm:$0xff] }
 0x1bf   : > { %3695 = vmatpush1.bf16.msra.mxu0 %v3694_v49  ;;  %v3698_v41 = vpack.c.bf16 %v6968_v2, %v6966_v9  ;;  %v3700_v21 = vpack.c.bf16 %v6972_v42, %v6970_v40  ;;  %v6978_v49 = vand.u32 4294901760, %v6977_v23  ;;  %v6983_v9 = vld [vmem:[#allocation58_spill] sm:$0xff]  ;;  %v6988_v42 = vand.u32 4294901760, %v6987_v47  ;;  %v6995_v11 = vld [vmem:[#allocation73_spill] sm:$0xff]  ;;  %v7003_v47 = vld [vmem:[#allocation76_spill] sm:$0xff] }
 0x1c0   : > { %3697 = vmatprep.subr.bf16.mxu0 %v3696_v27  ;;  %v3318_v48 = vpack.c.bf16 %v6976_v50, %v6974_v17  ;;  %v6982_v27 = vand.u32 4294901760, %v6981_v4  ;;  %v6984_v2 = vand.u32 4294901760, %v6983_v9  ;;  %v6985_v40 = vld [vmem:[#allocation62_spill] sm:$0xff]  ;;  %v6992_v50 = vand.u32 4294901760, %v6991_v54  ;;  %v7007_v54 = vld [vmem:[#allocation79_spill] sm:$0xff] }
 0x1c1   : > { %3315 = vmatpush1.bf16.msra.mxu1 %v3314_v16  ;;  %v3320_v18 = vpack.c.bf16 %v6980_v7, %v6978_v49  ;;  %v6986_v16 = vand.u32 4294901760, %v6985_v40  ;;  %v6989_v17 = vld [vmem:[#allocation66_spill] sm:$0xff]  ;;  %v6993_v49 = vld [vmem:[#allocation72_spill] sm:$0xff]  ;;  %v6996_v7 = vand.u32 4294901760, %v6995_v11  ;;  %v7011_v11 = vld [vmem:[#allocation85_spill] sm:$0xff] }
 0x1c2   : > { %3317 = vmatprep.subr.bf16.mxu1 %v3316_v60  ;;  %v3702_v51 = vpack.c.bf16 %v6984_v2, %v6982_v27  ;;  %v6990_v60 = vand.u32 4294901760, %v6989_v17  ;;  %v6997_v27 = vld [vmem:[#allocation69_spill] sm:$0xff]  ;;  %v6999_v9 = vld [vmem:[#allocation70_spill] sm:$0xff] }
 0x1c3   : > { %3699 = vmatpush1.bf16.msra.mxu0 %v3698_v41  ;;  %v3704_v10 = vpack.c.bf16 %v6988_v42, %v6986_v16  ;;  %v6994_v41 = vand.u32 4294901760, %v6993_v49  ;;  %v7000_v2 = vand.u32 4294901760, %v6999_v9  ;;  %v7001_v16 = vld [vmem:[#allocation74_spill] sm:$0xff]  ;;  %v7004_v42 = vand.u32 4294901760, %v7003_v47  ;;  %v7019_v47 = vld [vmem:[#allocation88_spill] sm:$0xff] }
 0x1c4   : > { %3701 = vmatprep.subr.bf16.mxu0 %v3700_v21  ;;  %v3322_v23 = vpack.c.bf16 %v6992_v50, %v6990_v60  ;;  %v6998_v21 = vand.u32 4294901760, %v6997_v27  ;;  %v7005_v60 = vld [vmem:[#allocation78_spill] sm:$0xff]  ;;  %v7008_v50 = vand.u32 4294901760, %v7007_v54  ;;  %v7023_v54 = vld [vmem:[#allocation91_spill] sm:$0xff] }
 0x1c5   : > { %3319 = vmatpush1.bf16.msra.mxu1 %v3318_v48  ;;  %v3324_v4 = vpack.c.bf16 %v6996_v7, %v6994_v41  ;;  %v7002_v48 = vand.u32 4294901760, %v7001_v16  ;;  %v7009_v41 = vld [vmem:[#allocation84_spill] sm:$0xff]  ;;  %v7012_v7 = vand.u32 4294901760, %v7011_v11  ;;  %v7015_v9 = vld [vmem:[#allocation82_spill] sm:$0xff]  ;;  %v7027_v11 = vld [vmem:[#allocation97_spill] sm:$0xff] }
 0x1c6   : > { %3321 = vmatprep.subr.bf16.mxu1 %v3320_v18  ;;  %v3706_v40 = vpack.c.bf16 %v7000_v2, %v6998_v21  ;;  %v7006_v18 = vand.u32 4294901760, %v7005_v60  ;;  %v7013_v21 = vld [vmem:[#allocation81_spill] sm:$0xff]  ;;  %v7016_v2 = vand.u32 4294901760, %v7015_v9 }
 0x1c7   : > { %3703 = vmatpush1.bf16.msra.mxu0 %v3702_v51  ;;  %v3708_v17 = vpack.c.bf16 %v7004_v42, %v7002_v48  ;;  %v7010_v51 = vand.u32 4294901760, %v7009_v41  ;;  %v7017_v48 = vld [vmem:[#allocation86_spill] sm:$0xff]  ;;  %v7020_v42 = vand.u32 4294901760, %v7019_v47  ;;  %v7035_v47 = vand.u32 4294901760, %v6790_v37 }
 0x1c8   : > { %3705 = vmatprep.subr.bf16.mxu0 %v3704_v10  ;;  %v3326_v49 = vpack.c.bf16 %v7008_v50, %v7006_v18  ;;  %v7014_v10 = vand.u32 4294901760, %v7013_v21  ;;  %v7021_v18 = vld [vmem:[#allocation90_spill] sm:$0xff]  ;;  %v7024_v50 = vand.u32 4294901760, %v7023_v54  ;;  %v7042_v37 = vand.u32 4294901760, %v6656_v45 }
 0x1c9   : > { %3323 = vmatpush1.bf16.msra.mxu1 %v3322_v23  ;;  %v3328_v27 = vpack.c.bf16 %v7012_v7, %v7010_v51  ;;  %v7018_v23 = vand.u32 4294901760, %v7017_v48  ;;  %v7025_v51 = vld [vmem:[#allocation96_spill] sm:$0xff]  ;;  %v7028_v7 = vand.u32 4294901760, %v7027_v11  ;;  %v7033_v48 = vand.u32 4294901760, %v6788_v28 }
 0x1ca   : > { %3325 = vmatprep.subr.bf16.mxu1 %v3324_v4  ;;  %v3710_v16 = vpack.c.bf16 %v7016_v2, %v7014_v10  ;;  %v7022_v4 = vand.u32 4294901760, %v7021_v18  ;;  %v7030_v10 = vld [vmem:[#allocation94_spill] sm:$0xff]  ;;  %v7040_v28 = vand.u32 4294901760, %v6795_v15  ;;  %v7047_v15 = vand.u32 4294901760, %v6659_v26 }
 0x1cb   : > { %3707 = vmatpush1.bf16.msra.mxu0 %v3706_v40  ;;  %v3712_v60 = vpack.c.bf16 %v7020_v42, %v7018_v23  ;;  %v7026_v40 = vand.u32 4294901760, %v7025_v51  ;;  %v7031_v9 = vand.u32 4294901760, %v7030_v10  ;;  %v7049_v45 = vand.u32 4294901760, %v6716_v44 }
 0x1cc   : > { %3709 = vmatprep.subr.bf16.mxu0 %v3708_v17  ;;  %v3330_v41 = vpack.c.bf16 %v7024_v50, %v7022_v4  ;;  %v7029_v17 = vand.u32 4294901760, %v6785_v55  ;;  %v7037_v55 = vand.u32 4294901760, %v6792_v14  ;;  %v7044_v14 = vand.u32 4294901760, %v6713_v38 }
 0x1cd   : > { %3327 = vmatpush1.bf16.msra.mxu1 %v3326_v49  ;;  %v3332_v21 = vpack.c.bf16 %v7028_v7, %v7026_v40  ;;  %v7032_v49 = vand.u32 4294901760, %v6787_v25  ;;  %v7039_v25 = vand.u32 4294901760, %v6794_v32  ;;  %v7046_v32 = vand.u32 4294901760, %v6658_v0 }
 0x1ce   : > { %3329 = vmatprep.subr.bf16.mxu1 %v3328_v27  ;;  %v3714_v2 = vpack.c.bf16 %v7031_v9, %v7029_v17  ;;  %v7034_v27 = vand.u32 4294901760, %v6789_v1  ;;  %v7041_v1 = vand.u32 4294901760, %v6796_v29  ;;  %v7048_v29 = vand.u32 4294901760, %v6715_v59 }
 0x1cf   : > { %3711 = vmatpush1.bf16.msra.mxu0 %v3710_v16  ;;  %v3716_v23 = vpack.c.bf16 %v7033_v48, %v7032_v49  ;;  %v7036_v16 = vand.u32 4294901760, %v6791_v22  ;;  %v7043_v22 = vand.u32 4294901760, %v6657_v53  ;;  %v3722_v51 = vpack.c.bf16 %v7047_v15, %v7046_v32  ;;  %v7091_v32 = vld [vmem:[#allocation174_spill] sm:$0xff] }
 0x1d0   : > { %3713 = vmatprep.subr.bf16.mxu0 %v3712_v60  ;;  %v3334_v42 = vpack.c.bf16 %v7035_v47, %v7034_v27  ;;  %v7038_v60 = vand.u32 4294901760, %v6793_v39  ;;  %v3720_v54 = vpack.c.bf16 %v7041_v1, %v7040_v28  ;;  %v7045_v39 = vand.u32 4294901760, %v6714_v8  ;;  %v7072_v47 = vld [vmem:[#allocation154_spill] sm:$0xff]  ;;  %v7083_v1 = vld [vmem:[#allocation165_spill] sm:$0xff] }
 0x1d1   : > { %3331 = vmatpush1.bf16.msra.mxu1 %v3330_v41  ;;  %v3336_v18 = vpack.c.bf16 %v7037_v55, %v7036_v16  ;;  %v3338_v50 = vpack.c.bf16 %v7043_v22, %v7042_v37  ;;  %v3724_v40 = vpack.c.bf16 %v7049_v45, %v7048_v29  ;;  %v7050_v53 = vand.u32 4294901760, %v6717_v58  ;;  %v7075_v16 = vld [vmem:[#allocation160_spill] sm:$0xff]  ;;  %v7085_v37 = vld [vmem:[#allocation166_spill] sm:$0xff] }
 0x1d2   : > { %3333 = vmatprep.subr.bf16.mxu1 %v3332_v21  ;;  %v3718_v4 = vpack.c.bf16 %v7039_v25, %v7038_v60  ;;  %v3340_v41 = vpack.c.bf16 %v7045_v39, %v7044_v14  ;;  %v7051_v38 = vand.u32 4294901760, %v6718_v43  ;;  %v7052_v8 = vand.u32 4294901760, %v6721_v5  ;;  %v7089_v39 = vld [vmem:[#allocation172_spill] sm:$0xff] }
 0x1d3   : > { %3715 = vmatpush1.bf16.msra.mxu0 %v3714_v2  ;;  %v7053_v0 = vand.u32 4294901760, %v6722_v3  ;;  %v7054_v26 = vand.u32 4294901760, %v6719_v20  ;;  %v7055_v59 = vand.u32 4294901760, %v6720_v19  ;;  %v7056_v44 = vand.u32 4294901760, %v6723_v57  ;;  %v7095_v45 = vld [vmem:[#allocation180_spill] sm:$0xff] }
 0x1d4   : > { %3717 = vmatprep.subr.bf16.mxu0 %v3716_v23  ;;  %v3342_v11 = vpack.c.bf16 %v7051_v38, %v7050_v53  ;;  %v7057_v58 = vand.u32 4294901760, %v6724_v34  ;;  %v7058_v43 = vand.u32 4294901760, %v6725_v33  ;;  %v7059_v5 = vand.u32 4294901760, %v6726_v13  ;;  %v7069_v23 = vld [vmem:[#allocation157_spill] sm:$0xff] }
 0x1d5   : > { %3335 = vmatpush1.bf16.msra.mxu1 %v3334_v42  ;;  %v3344_v7 = vpack.c.bf16 %v7053_v0, %v7052_v8  ;;  %v3726_v21 = vpack.c.bf16 %v7055_v59, %v7054_v26  ;;  %v7060_v3 = vand.u32 4294901760, %v6729_v63  ;;  %v7061_v20 = vand.u32 4294901760, %v6730_v62  ;;  %v7097_v53 = vld [vmem:[#allocation181_spill] sm:$0xff] }
 0x1d6   : > { %3337 = vmatprep.subr.bf16.mxu1 %v3336_v18  ;;  %v3728_v17 = vpack.c.bf16 %v7057_v58, %v7056_v44  ;;  %v3346_v10 = vpack.c.bf16 %v7059_v5, %v7058_v43  ;;  %v7062_v19 = vand.u32 4294901760, %v6727_v31  ;;  %v7063_v57 = vand.u32 4294901760, %v6728_v12  ;;  %v7078_v18 = vld [vmem:[#allocation163_spill] sm:$0xff]  ;;  %v7099_v8 = vld [vmem:[#allocation177_spill] sm:$0xff]  ;;  %v7105_v58 = vld [vmem:[#allocation184_spill] sm:$0xff] }
 0x1d7   : > { %3719 = vmatpush1.bf16.msra.mxu0 %v3718_v4  ;;  %v3348_v9 = vpack.c.bf16 %v7061_v20, %v7060_v3  ;;  %v7064_v34 = vand.u32 4294901760, %v6731_v35  ;;  %v7065_v33 = vand.u32 4294901760, %v6732_v6  ;;  %v7066_v13 = vand.u32 4294901760, %v6733_v61  ;;  %v7081_v4 = vld [vmem:[#allocation169_spill] sm:$0xff]  ;;  %v7107_v5 = vld [vmem:[#allocation186_spill] sm:$0xff]  ;;  %v7109_v3 = vld [vmem:[#allocation187_spill] sm:$0xff] }
 0x1d8   : > { %3721 = vmatprep.subr.bf16.mxu0 %v3720_v54  ;;  %v3730_v2 = vpack.c.bf16 %v7063_v57, %v7062_v19  ;;  %v7067_v63 = vand.u32 4294901760, %v6734_v52  ;;  %v7068_v62 = vand.u32 4294901760, %v6737_v24  ;;  %v7070_v31 = vand.u32 4294901760, %v7069_v23  ;;  %v7111_v19 = vld [vmem:[#allocation192_spill] sm:$0xff]  ;;  %v7119_v23 = vld [vmem:[#allocation194_spill] sm:$0xff] }
 0x1d9   : > { %3339 = vmatpush1.bf16.msra.mxu1 %v3338_v50  ;;  %v3732_v49 = vpack.c.bf16 %v7065_v33, %v7064_v34  ;;  %v7071_v12 = vand.u32 4294901760, %v6735_v36  ;;  %v7073_v35 = vand.u32 4294901760, %v7072_v47  ;;  %v7074_v6 = vand.u32 4294901760, %v6813_v30  ;;  %v7087_v50 = vld [vmem:[#allocation170_spill] sm:$0xff] }
 0x1da   : > { %3341 = vmatprep.subr.bf16.mxu1 %v3340_v41  ;;  %v3350_v48 = vpack.c.bf16 %v7067_v63, %v7066_v13  ;;  %v3352_v27 = vpack.c.bf16 %v7070_v31, %v7068_v62  ;;  %v7076_v61 = vand.u32 4294901760, %v7075_v16  ;;  %v7077_v52 = vand.u32 4294901760, %v6740_v46  ;;  %v7117_v63 = vld [vmem:[#allocation190_spill] sm:$0xff] }
 0x1db   : > { %3723 = vmatpush1.bf16.msra.mxu0 %v3722_v51  ;;  %v3734_v42 = vpack.c.bf16 %v7073_v35, %v7071_v12  ;;  %v7079_v24 = vand.u32 4294901760, %v7078_v18  ;;  %v7080_v25 = vand.u32 4294901760, %v6744_v56  ;;  %v7082_v36 = vand.u32 4294901760, %v7081_v4  ;;  %v7093_v51 = vld [vmem:[#allocation175_spill] sm:$0xff]  ;;  %v7123_v35 = vld [vmem:[#allocation198_spill] sm:$0xff] }
 0x1dc   : > { %3725 = vmatprep.subr.bf16.mxu0 %v3724_v40  ;;  %v3736_v55 = vpack.c.bf16 %v7076_v61, %v7074_v6  ;;  %v7084_v54 = vand.u32 4294901760, %v7083_v1  ;;  %v7086_v30 = vand.u32 4294901760, %v7085_v37  ;;  %v7088_v14 = vand.u32 4294901760, %v7087_v50  ;;  %v7125_v6 = vld [vmem:[#allocation199_spill] sm:$0xff]  ;;  %v7129_v18 = vld [vmem:[#allocation202_spill] sm:$0xff]  ;;  %v7137_v37 = vld [vmem:[#allocation24_spill] sm:$0xff] }
 0x1dd   : > { %3343 = vmatpush1.bf16.msra.mxu1 %v3342_v11  ;;  %v3354_v60 = vpack.c.bf16 %v7079_v24, %v7077_v52  ;;  %v3356_v28 = vpack.c.bf16 %v7082_v36, %v7080_v25  ;;  %v7090_v46 = vand.u32 4294901760, %v7089_v39  ;;  %v7092_v15 = vand.u32 4294901760, %v7091_v32  ;;  %v7131_v25 = vld [vmem:[#allocation11_spill] sm:$0xff]  ;;  %v7133_v36 = vld [vmem:[#allocation206_spill] sm:$0xff]  ;;  %v7145_v32 = vld [vmem:[#allocation41_spill] sm:$0xff] }
 0x1de   : > { %3345 = vmatprep.subr.bf16.mxu1 %v3344_v7  ;;  %v3738_v22 = vpack.c.bf16 %v7086_v30, %v7084_v54  ;;  %v7094_v56 = vand.u32 4294901760, %v7093_v51  ;;  %v7096_v40 = vand.u32 4294901760, %v7095_v45  ;;  %v7098_v38 = vand.u32 4294901760, %v7097_v53  ;;  %v7101_v7 = vld [vmem:[#allocation178_spill] sm:$0xff]  ;;  %v7132_v4 = vld [vmem:[#allocation15_spill] sm:$0xff]  ;;  %v7136_v54 = vld [vmem:[#allocation209_spill] sm:$0xff] }
 0x1df   : > { %3727 = vmatpush1.bf16.msra.mxu0 %v3726_v21  ;;  %v3740_v41 = vpack.c.bf16 %v7090_v46, %v7088_v14  ;;  %v7100_v0 = vand.u32 4294901760, %v7099_v8  ;;  %v7102_v26 = vand.u32 4294901760, %v7101_v7  ;;  %v7103_v21 = vld [vmem:[#allocation182_spill] sm:$0xff]  ;;  %v7110_v20 = vand.u32 4294901760, %v7109_v3  ;;  %v7135_v1 = vld [vmem:[#allocation203_spill] sm:$0xff]  ;;  %v7138_v30 = vld [vmem:[#allocation20_spill] sm:$0xff] }
 0x1e0   : > { %3729 = vmatprep.subr.bf16.mxu0 %v3728_v17  ;;  %v3358_v29 = vpack.c.bf16 %v7094_v56, %v7092_v15  ;;  %v3360_v11 = vpack.c.bf16 %v7098_v38, %v7096_v40  ;;  %v7104_v44 = vand.u32 4294901760, %v7103_v21  ;;  %v7106_v17 = vand.u32 4294901760, %v7105_v58  ;;  %v7140_v50 = vld [vmem:[#allocation26_spill] sm:$0xff]  ;;  %v7142_v39 = vld [vmem:[#allocation35_spill] sm:$0xff]  ;;  %v7143_v46 = vld [vmem:[#allocation33_spill] sm:$0xff] }
 0x1e1   : > { %3347 = vmatpush1.bf16.msra.mxu1 %v3346_v10  ;;  %v3742_v59 = vpack.c.bf16 %v7102_v26, %v7100_v0  ;;  %v7108_v10 = vand.u32 4294901760, %v7107_v5  ;;  %v7112_v57 = vand.u32 4294901760, %v7111_v19  ;;  %v7120_v31 = vand.u32 4294901760, %v7119_v23  ;;  %v7141_v14 = vld [vmem:[#allocation30_spill] sm:$0xff]  ;;  %v7146_v15 = vld [vmem:[#allocation47_spill] sm:$0xff]  ;;  %v7147_v51 = vld [vmem:[#allocation44_spill] sm:$0xff] }
 0x1e2   : > { %3349 = vmatprep.subr.bf16.mxu1 %v3348_v9  ;;  %v3744_v43 = vpack.c.bf16 %v7106_v17, %v7104_v44  ;;  %v7126_v16 = vand.u32 4294901760, %v7125_v6  ;;  %v7130_v24 = vand.u32 4294901760, %v7129_v18  ;;  %v7148_v56 = vld [vmem:[#allocation50_spill] sm:$0xff]  ;;  %v7150_v45 = vld [vmem:[#allocation59_spill] sm:$0xff]  ;;  %v7151_v40 = vld [vmem:[#allocation56_spill] sm:$0xff] }
 0x1e3   : > { %3731 = vmatpush1.bf16.msra.mxu0 %v3730_v2  ;;  %v3362_v9 = vpack.c.bf16 %v7110_v20, %v7108_v10  ;;  %v7113_v2 = vld [vmem:[#allocation193_spill] sm:$0xff]  ;;  %v7152_v53 = vld [vmem:[#allocation63_spill] sm:$0xff]  ;;  %v7155_v8 = vld [vmem:[#allocation68_spill] sm:$0xff] }
 0x1e4   : > { %3733 = vmatprep.subr.bf16.mxu0 %v3732_v49  ;;  %v7114_v34 = vand.u32 4294901760, %v7113_v2  ;;  %v7115_v49 = vld [vmem:[#allocation189_spill] sm:$0xff]  ;;  %v7156_v0 = vld [vmem:[#allocation75_spill] sm:$0xff]  ;;  %v7163_v17 = vld [vmem:[#allocation92_spill] sm:$0xff] }
 0x1e5   : > { %3351 = vmatpush1.bf16.msra.mxu1 %v3350_v48  ;;  %v7116_v13 = vand.u32 4294901760, %v7115_v49  ;;  %v7118_v48 = vand.u32 4294901760, %v7117_v63  ;;  %v7153_v38 = vld [vmem:[#allocation65_spill] sm:$0xff]  ;;  %v7158_v26 = vld [vmem:[#allocation83_spill] sm:$0xff]  ;;  %v7167_v3 = vld [vmem:[#allocation104_spill] sm:$0xff] }
 0x1e6   : > { %3353 = vmatprep.subr.bf16.mxu1 %v3352_v27  ;;  %v3364_v33 = vpack.c.bf16 %v7114_v34, %v7112_v57  ;;  %v7121_v27 = vld [vmem:[#allocation196_spill] sm:$0xff]  ;;  %v7157_v7 = vld [vmem:[#allocation77_spill] sm:$0xff]  ;;  %v7160_v21 = vld [vmem:[#allocation87_spill] sm:$0xff] }
 0x1e7   : > { %3735 = vmatpush1.bf16.msra.mxu0 %v3734_v42  ;;  %v3746_v62 = vpack.c.bf16 %v7118_v48, %v7116_v13  ;;  %v7122_v12 = vand.u32 4294901760, %v7121_v27  ;;  %v7124_v42 = vand.u32 4294901760, %v7123_v35  ;;  %v7161_v44 = vld [vmem:[#allocation89_spill] sm:$0xff]  ;;  %v7162_v58 = vld [vmem:[#allocation95_spill] sm:$0xff]  ;;  %v7171_v57 = vld [vmem:[#allocation116_spill] sm:$0xff] }
 0x1e8   : > { %3737 = vmatprep.subr.bf16.mxu0 %v3736_v55  ;;  %v7127_v55 = vld [vmem:[#allocation201_spill] sm:$0xff]  ;;  %v7166_v10 = vld [vmem:[#allocation107_spill] sm:$0xff]  ;;  %v7175_v49 = vld [vmem:[#allocation128_spill] sm:$0xff] }
 0x1e9   : > { %3355 = vmatpush1.bf16.msra.mxu1 %v3354_v60  ;;  %v3748_v47 = vpack.c.bf16 %v7122_v12, %v7120_v31  ;;  %v3366_v61 = vpack.c.bf16 %v7126_v16, %v7124_v42  ;;  %v7128_v52 = vand.u32 4294901760, %v7127_v55  ;;  %v7165_v5 = vld [vmem:[#allocation101_spill] sm:$0xff]  ;;  %v7168_v20 = vld [vmem:[#allocation111_spill] sm:$0xff]  ;;  %v7183_v12 = vld [vmem:[#allocation152_spill] sm:$0xff] }
 0x1ea   : > { %3357 = vmatprep.subr.bf16.mxu1 %v3356_v28  ;;  %v7134_v28 = vld [vmem:[#allocation17_spill] sm:$0xff]  ;;  %v7170_v19 = vld [vmem:[#allocation119_spill] sm:$0xff]  ;;  %v7187_v6 = vld [vmem:[#allocation164_spill] sm:$0xff] }
 0x1eb   : > { %3739 = vmatpush1.bf16.msra.mxu0 %v3738_v22  ;;  %v3750_v60 = vpack.c.bf16 %v7130_v24, %v7128_v52  ;;  %v7139_v22 = vld [vmem:[#allocation205_spill] sm:$0xff]  ;;  %v7172_v2 = vld [vmem:[#allocation123_spill] sm:$0xff]  ;;  %v7191_v52 = vld [vmem:[#allocation176_spill] sm:$0xff] }
 0x1ec   : > { %3741 = vmatprep.subr.bf16.mxu0 %v3740_v41  ;;  %v7144_v41 = vld [vmem:[#allocation38_spill] sm:$0xff]  ;;  %v7173_v34 = vld [vmem:[#allocation125_spill] sm:$0xff]  ;;  %v7176_v13 = vld [vmem:[#allocation135_spill] sm:$0xff] }
 0x1ed   : > { %3359 = vmatpush1.bf16.msra.mxu1 %v3358_v29  ;;  %v7149_v29 = vld [vmem:[#allocation54_spill] sm:$0xff]  ;;  %v7177_v63 = vld [vmem:[#allocation137_spill] sm:$0xff]  ;;  %v7178_v48 = vld [vmem:[#allocation143_spill] sm:$0xff] }
 0x1ee   : > { %3361 = vmatprep.subr.bf16.mxu1 %v3360_v11  ;;  %v7154_v11 = vld [vmem:[#allocation71_spill] sm:$0xff]  ;;  %v7181_v31 = vld [vmem:[#allocation149_spill] sm:$0xff] }
 0x1ef   : > { %3743 = vmatpush1.bf16.msra.mxu0 %v3742_v59  ;;  %v7159_v59 = vld [vmem:[#allocation80_spill] sm:$0xff]  ;;  %v7180_v23 = vld [vmem:[#allocation147_spill] sm:$0xff]  ;;  %v7185_v35 = vld [vmem:[#allocation161_spill] sm:$0xff] }
 0x1f0   : > { %3745 = vmatprep.subr.bf16.mxu0 %v3744_v43  ;;  %v7164_v43 = vld [vmem:[#allocation99_spill] sm:$0xff]  ;;  %v7193_v24 = vld [vmem:[#allocation185_spill] sm:$0xff] }
 0x1f1   : > { %3363 = vmatpush1.bf16.msra.mxu1 %v3362_v9  ;;  %v7169_v9 = vld [vmem:[#allocation113_spill] sm:$0xff]  ;;  %v7182_v27 = vld [vmem:[#allocation155_spill] sm:$0xff] }
 0x1f2   : > { %3365 = vmatprep.subr.bf16.mxu1 %v3364_v33  ;;  %v7174_v33 = vld [vmem:[#allocation131_spill] sm:$0xff] }
 0x1f3   : > { %3747 = vmatpush1.bf16.msra.mxu0 %v3746_v62  ;;  %v7179_v62 = vld [vmem:[#allocation140_spill] sm:$0xff]  ;;  %v7186_v42 = vld [vmem:[#allocation167_spill] sm:$0xff] }
 0x1f4   : > { %3749 = vmatprep.subr.bf16.mxu0 %v3748_v47  ;;  %v7184_v47 = vld [vmem:[#allocation159_spill] sm:$0xff] }
 0x1f5   : > { %3367 = vmatpush1.bf16.msra.mxu1 %v3366_v61  ;;  %v7188_v16 = vld [vmem:[#allocation171_spill] sm:$0xff]  ;;  %v7189_v61 = vld [vmem:[#allocation173_spill] sm:$0xff] }
 0x1f6   : > { %3369 = vmatprep.subr.bf16.mxu1 %v7131_v25  ;;  %v7190_v55 = vld [vmem:[#allocation179_spill] sm:$0xff]  ;;  %v7195_v25 = vld [vmem:[#allocation188_spill] sm:$0xff] }
 0x1f7   : > { %3751 = vmatpush1.bf16.msra.mxu0 %v3750_v60  ;;  %v7192_v18 = vld [vmem:[#allocation183_spill] sm:$0xff] }
 0x1f8   : > { %3753 = vmatprep.subr.bf16.mxu0 %v7132_v4  ;;  %1480 = vmatmul.mubr.f32.vlgmr.msra.gmra.mrb[0].mxu1 %v7133_v36  ;;  %v7194_v60 = vld [vmem:[#allocation191_spill] sm:$0xff] }
 0x1f9   : > { %3371 = vmatpush1.bf16.msra.mxu1 %v7134_v28  ;;  %1615 = vmatprep.mubr.f32.mxu1 %v7135_v1  ;;  %v7196_v4 = vld [vmem:[#allocation195_spill] sm:$0xff]  ;;  %v7197_v28 = vld [vmem:[#allocation197_spill] sm:$0xff]  ;;  %v7198_v1 = vld [vmem:[#allocation200_spill] sm:$0xff] }
 0x1fa   : > { %2764 = vmatmul.mubr.f32.vlgmr.msra.gmra.mrb[0].mxu0 %v7136_v54  ;;  %3373 = vmatprep.subr.bf16.mxu1 %v7137_v37 }
 0x1fb   : > { %3755 = vmatpush1.bf16.msra.mxu0 %v7138_v30  ;;  %2899 = vmatprep.mubr.f32.mxu0 %v7139_v22 }
 0x1fc   : > { %3757 = vmatprep.subr.bf16.mxu0 %v7140_v50 }
 0x1fd   : > { %3375 = vmatpush1.bf16.msra.mxu1 %v7141_v14 }
 0x1fe   : > { %3377 = vmatprep.subr.bf16.mxu1 %v7142_v39 }
 0x1ff   : > { %3759 = vmatpush1.bf16.msra.mxu0 %v7143_v46 }
 0x200   : > { %3761 = vmatprep.subr.bf16.mxu0 %v7144_v41 }
 0x201   : > { %3379 = vmatpush1.bf16.msra.mxu1 %v7145_v32 }
 0x202   : > { %3381 = vmatprep.subr.bf16.mxu1 %v7146_v15 }
 0x203   : > { %3763 = vmatpush1.bf16.msra.mxu0 %v7147_v51 }
 0x204   : > { %3765 = vmatprep.subr.bf16.mxu0 %v7148_v56 }
 0x205   : > { %3383 = vmatpush1.bf16.msra.mxu1 %v7149_v29 }
 0x206   : > { %3385 = vmatprep.subr.bf16.mxu1 %v7150_v45 }
 0x207   : > { %3767 = vmatpush1.bf16.msra.mxu0 %v7151_v40 }
 0x208   : > { %3769 = vmatprep.subr.bf16.mxu0 %v7152_v53 }
 0x209   : > { %3387 = vmatpush1.bf16.msra.mxu1 %v7153_v38 }
 0x20a   : > { %3389 = vmatprep.subr.bf16.mxu1 %v7154_v11 }
 0x20b   : > { %3771 = vmatpush1.bf16.msra.mxu0 %v7155_v8  ;;  %v3906_v8 = vld [vmem:[%s4199_s29] sm:$0xff] }
 0x20c   : > { %3773 = vmatprep.subr.bf16.mxu0 %v7156_v0 }
 0x20d   : > { %3391 = vmatpush1.bf16.msra.mxu1 %v7157_v7 }
 0x20e   : > { %3393 = vmatprep.subr.bf16.mxu1 %v7158_v26 }
 0x20f   : > { %3775 = vmatpush1.bf16.msra.mxu0 %v7159_v59 }
 0x210   : > { %3777 = vmatprep.subr.bf16.mxu0 %v7160_v21 }
 0x211   : > { %3395 = vmatpush1.bf16.msra.mxu1 %v7161_v44 }
 0x212   : > { %3397 = vmatprep.subr.bf16.mxu1 %v7162_v58 }
 0x213   : > { %3779 = vmatpush1.bf16.msra.mxu0 %v7163_v17 }
 0x214   : > { %3781 = vmatprep.subr.bf16.mxu0 %v7164_v43 }
 0x215   : > { %3399 = vmatpush1.bf16.msra.mxu1 %v7165_v5 }
 0x216   : > { %3401 = vmatprep.subr.bf16.mxu1 %v7166_v10 }
 0x217   : > { %3783 = vmatpush1.bf16.msra.mxu0 %v7167_v3 }
 0x218   : > { %3785 = vmatprep.subr.bf16.mxu0 %v7168_v20 }
 0x219   : > { %3403 = vmatpush1.bf16.msra.mxu1 %v7169_v9 }
 0x21a   : > { %3405 = vmatprep.subr.bf16.mxu1 %v7170_v19 }
 0x21b   : > { %3787 = vmatpush1.bf16.msra.mxu0 %v7171_v57 }
 0x21c   : > { %3789 = vmatprep.subr.bf16.mxu0 %v7172_v2 }
 0x21d   : > { %3407 = vmatpush1.bf16.msra.mxu1 %v7173_v34 }
 0x21e   : > { %3409 = vmatprep.subr.bf16.mxu1 %v7174_v33 }
 0x21f   : > { %3791 = vmatpush1.bf16.msra.mxu0 %v7175_v49 }
 0x220   : > { %3793 = vmatprep.subr.bf16.mxu0 %v7176_v13 }
 0x221   : > { %3411 = vmatpush1.bf16.msra.mxu1 %v7177_v63 }
 0x222   : > { %3413 = vmatprep.subr.bf16.mxu1 %v7178_v48 }
 0x223   : > { %3795 = vmatpush1.bf16.msra.mxu0 %v7179_v62 }
 0x224   : > { %3797 = vmatprep.subr.bf16.mxu0 %v7180_v23 }
 0x225   : > { %3415 = vmatpush1.bf16.msra.mxu1 %v7181_v31 }
 0x226   : > { %3417 = vmatprep.subr.bf16.mxu1 %v7182_v27 }
 0x227   : > { %3799 = vmatpush1.bf16.msra.mxu0 %v7183_v12 }
 0x228   : > { %3801 = vmatprep.subr.bf16.mxu0 %v7184_v47 }
 0x229   : > { %3419 = vmatpush1.bf16.msra.mxu1 %v7185_v35 }
 0x22a   : > { %3421 = vmatprep.subr.bf16.mxu1 %v7186_v42 }
 0x22b   : > { %3803 = vmatpush1.bf16.msra.mxu0 %v7187_v6 }
 0x22c   : > { %3805 = vmatprep.subr.bf16.mxu0 %v7188_v16 }
 0x22d   : > { %3423 = vmatpush1.bf16.msra.mxu1 %v7189_v61 }
 0x22e   : > { %3425 = vmatprep.subr.bf16.mxu1 %v7190_v55 }
 0x22f   : > { %3807 = vmatpush1.bf16.msra.mxu0 %v7191_v52 }
 0x230   : > { %3809 = vmatprep.subr.bf16.mxu0 %v7192_v18 }
 0x231   : > { %3427 = vmatpush1.bf16.msra.mxu1 %v7193_v24 }
 0x232   : > { %3429 = vmatprep.subr.bf16.mxu1 %v7194_v60 }
 0x233   : > { %3811 = vmatpush1.bf16.msra.mxu0 %v7195_v25 }
 0x234   : > { %3813 = vmatprep.subr.bf16.mxu0 %v7196_v4 }
 0x235   : > { %3431 = vmatpush1.bf16.msra.mxu1 %v7197_v28 }
 0x237   : > { %3815 = vmatpush1.bf16.msra.mxu0 %v7198_v1 }
 0x238   : > { %1617 = vmatmul.mubr.f32.vlgmr.msra.gmra.mrb[0].mxu1 %v7133_v36  ;;  %v2919_v36 = vlaneseq }
 0x23a   : > { %2901 = vmatmul.mubr.f32.vlgmr.msra.gmra.mrb[0].mxu0 %v7136_v54  ;;  %v2920_v54 = vshrl.u32 %v2919_v36, 7 }
 0x23c   : > { %v2921_v29 = vsub.s32 0, %v2920_v54 }
 0x30b   : > { %v1618_v37 = vpop.f32.mrb[0].mxu1 }
 0x30c   : > { %v1620_v30 = vpop.f32.mrb[1].mxu1 }
 0x30d   : > { %v2902_v22 = vpop.f32.mrb[0].mxu0 }
 0x30e   : > { %v3816_v50 = vadd.f32 %v2902_v22, %v1618_v37  ;;  %v2904_v14 = vpop.f32.mrb[1].mxu0 }
 0x30f   : > { %v3817_v39 = vadd.f32 %v2904_v14, %v1620_v30 }
 0x310   : > { %v3039_v46 = vmul.f32 -1.442695, %v3816_v50 }
 0x311   : > { %v3040_v41 = vmul.f32 -1.442695, %v3817_v39 }
 0x312   : > { %3898 = vpow2.f32 %v3039_v46 }
 0x313   : > { %3900 = vpow2.f32 %v3040_v41 }
 0x31c   : > { %v3899_v32 = vpop.eup %3898 }
 0x31d   : > { %v3901_v15 = vpop.eup %3900  ;;  %v2913_v51 = vadd.f32 1.0, %v3899_v32 }
 0x31e   : > { %v2914_v56 = vadd.f32 1.0, %v3901_v15 }
 0x31f   : > { %3902 = vrcp.f32 %v2913_v51 }
 0x320   : > { %3904 = vrcp.f32 %v2914_v56 }
 0x329   : > { %v3903_v45 = vpop.eup %3902 }
 0x32a   : > { %v3905_v40 = vpop.eup %3904  ;;  %v2922_v53 = vrot.slane %v3903_v45, %v2921_v29 }
 0x32b   : > { %v2926_v38 = vrot.slane %v3905_v40, %v2921_v29 }
 0x32d   : > { %v2929_v11 = vcombine.low %v2922_v53, %v2926_v38 }
 0x32f   : > { %v2931_v0 = vmul.f32 %v3906_v8, %v2929_v11 }
 0x331   : > { %2932 = vst [vmem:[%s174_s17] sm:$0xff] %v2931_v0 }
 0x332   : > { %3978 = shalt.err (!%p3975_p7)
}
 0x333   : > { %s3979_s6 = scalar_lea.hbm %s5849_s28, 128  ;;  %s3983_s24 = scalar_lea.hbm %s5895_s2, 256 }
 0x334   : > { %p3980_p9 = scmp.ne.s32.totalorder %s5849_s28, %s3979_s6  ;;  %p3984_p0 = scmp.lt.u32.totalorder %s5849_s28, %s5895_s2 }
 0x335   : > { %p3985_p11 = scmp.lt.u32.totalorder %s3983_s24, %s3979_s6  ;;  %p3987_p4 = scmp.lt.u32.totalorder %s3979_s6, %s5849_s28 }
 0x336   : > { %p3981_p2 = pnand %p3980_p9, %p4148_p12 }
 0x337   : > { %p3986_p1 = por %p3985_p11, %p3984_p0 }
 0x338   : > { %p3982_p5 = pneg %p3981_p2 }
 0x339   : > { %p3988_p6 = por %p3987_p4, %p3986_p1 }
 0x33b   : > { %p3989_p8 = pnand %p3988_p6, %p3982_p5 }
 0x33d   : > { %3992 = shalt.err (!%p3989_p8)
}
 0x33e   : > { %3844 = dma.vmem_to_hbm [thread:$0]  (%p4148_p12), %s5851_s27, 128, %s5849_s28, %s2934_s30  }
 0x33f PF: > { %s2960_s26 = sand.u32 1, %s4023_s9   ;;  %p7199_p10 = scmp.ne.s32.totalorder %s6412_s16, 0 }
 0x340   : > { %p7200_p13 = scmp.ge.s32.totalorder %s4035_s12, 2  ;;  %s2961_s19 = scalar_lea.sflag [#allocation4], %s2960_s26 }
 0x342   : > { %p3855_p3 = pnand %p7200_p13, %p7199_p10 }
 0x344   : > { %4018 = dma.done.wait (!%p3855_p3), %s2961_s19, 128  }
 0x345   : > { %4020 = vsyncadd (!%p3855_p3), %s2961_s19, 4294967168  ;;  %p16_p7 = scmp.ge.s32.totalorder %s4113_s21, 4   ;;  %s7201_s9 = smov %s4027_s10 }
 0x346   : > { %s7202_s10 = smov %s4031_s11  ;;  %s7203_s11 = smov %s4144_s8 }
 0x347   : > { %s7204_s12 = smov %s4113_s21  ;;  %18 = sbr.rel (!%p16_p7) target bundleno = 6 (0x6), region = 78 }
 0x34e   :  { %2966 = vsyncpa [#allocation3], 1 }
 0x34f   :  { %2968 = vsyncpa [#allocation3 + $0x1], 1 }
 0x350   :  { %2969 = vsyncpa [#allocation6], 1 }
 0x351   :  { %2970 = vsyncpa [#allocation4], 1 }
 0x352   :  { %2972 = vsyncpa [#allocation4 + $0x1], 1 }

</bundles_post_ra>
